<compile_context>
chip_gen: v7x
topology: tpu7x:2x2x1
jax: 0.10.0
libtpu: 0.0.40
codegen_flags: <defaults>
</compile_context>

<pallas_src>
import functools

import jax
import jax.numpy as jnp
from jax.experimental import pallas as pl
from jax.experimental.pallas import tpu as pltpu

HIDDEN = 1024
NEG_SLOPE = 0.01  # PyTorch LeakyReLU default


def _round_up(x, m):
    return ((x + m - 1) // m) * m


def _disc_kernel(x_ref, w1_ref, b1_ref, w2_ref, b2_ref, o_ref):
    # x_ref : (TB, Fp)  bf16     w1_ref: (Fp, H) bf16
    # b1_ref: (1, H)    f32      w2_ref: (1, H)  f32
    # b2_ref: (1, 1)    f32 in SMEM
    # o_ref : (TB, 1)   f32
    h = jnp.dot(x_ref[...], w1_ref[...], preferred_element_type=jnp.float32)
    h = h + b1_ref[...]
    h = jnp.where(h >= 0, h, NEG_SLOPE * h)            # LeakyReLU (f32, VPU)
    # N=1 output layer as multiply + row-reduce (VPU + XLU), not an MXU matmul.
    out = jnp.sum(h * w2_ref[...], axis=-1, keepdims=True) + b2_ref[0, 0]
    o_ref[...] = out.astype(o_ref.dtype)


@functools.partial(jax.jit, static_argnames=("block_b",))
def discriminator_forward(pwd, w1, b1, w2, b2, *, block_b=512):
    """pwd: (B, pass_len, 101) float32 -> (B, 1) float32."""
    b_size = pwd.shape[0]
    x2d = pwd.reshape(b_size, -1).astype(jnp.float32)
    f_in = x2d.shape[1]

    # Pad feature dim to a multiple of 256 (MXU-friendly on v6e/v7x, lane aligned).
    f_pad = _round_up(f_in, 256)
    # Batch tile: multiple of 128 rows, capped so tiles stay small on v7x (64 MiB VMEM).
    tb = min(block_b, _round_up(b_size, 128))
    b_pad = _round_up(b_size, tb)

    x_p = jnp.pad(x2d, ((0, b_pad - b_size), (0, f_pad - f_in))).astype(jnp.bfloat16)
    w1_p = jnp.pad(w1.astype(jnp.float32), ((0, f_pad - f_in), (0, 0))).astype(jnp.bfloat16)
    b1_row = b1.reshape(1, HIDDEN).astype(jnp.float32)
    w2_row = w2.reshape(1, HIDDEN).astype(jnp.float32)
    b2_s = b2.reshape(1, 1).astype(jnp.float32)

    grid = (b_pad // tb,)

    # VMEM budget: double-buffered x tiles + resident weights + h intermediate.
    vmem_bytes = (
        2 * tb * f_pad * 2          # x tiles (bf16, 2 buffers)
        + 2 * f_pad * HIDDEN * 2    # w1 (bf16, allow 2 buffers)
        + 4 * HIDDEN * 4            # b1 + w2 rows (f32, 2 buffers each)
        + 2 * tb * 4                # out tiles
        + tb * HIDDEN * 4           # h intermediate (f32)
    )
    vmem_limit = max(2 * vmem_bytes, 16 * 1024 * 1024)

    cost = pl.CostEstimate(
        flops=2 * b_pad * f_pad * HIDDEN + 3 * b_pad * HIDDEN,
        transcendentals=0,
        bytes_accessed=b_pad * f_pad * 2 + f_pad * HIDDEN * 2
        + 2 * HIDDEN * 4 + b_pad * 4,
    )

    out = pl.pallas_call(
        _disc_kernel,
        out_shape=jax.ShapeDtypeStruct((b_pad, 1), jnp.float32),
        grid=grid,
        in_specs=[
            pl.BlockSpec((tb, f_pad), lambda i: (i, 0)),        # x: streamed per tile
            pl.BlockSpec((f_pad, HIDDEN), lambda i: (0, 0)),    # w1: resident
            pl.BlockSpec((1, HIDDEN), lambda i: (0, 0)),        # b1: resident
            pl.BlockSpec((1, HIDDEN), lambda i: (0, 0)),        # w2 row: resident
            pl.BlockSpec(memory_space=pltpu.MemorySpace.SMEM),  # b2: scalar in SMEM
        ],
        out_specs=pl.BlockSpec((tb, 1), lambda i: (i, 0)),
        compiler_params=pltpu.CompilerParams(
            dimension_semantics=("parallel",),
            vmem_limit_bytes=vmem_limit,
        ),
        cost_estimate=cost,
    )(x_p, w1_p, b1_row, w2_row, b2_s)

    return out[:b_size, :]


def init_params(key, pass_len):
    """Deterministic init mimicking PyTorch's default Linear init
    (uniform(-1/sqrt(fan_in), 1/sqrt(fan_in)))."""
    in_features = pass_len * 101
    k1, k2, k3, k4 = jax.random.split(key, 4)

    bound1 = 1.0 / jnp.sqrt(in_features)
    w1 = jax.random.uniform(k1, (in_features, HIDDEN), jnp.float32, -bound1, bound1)
    b1 = jax.random.uniform(k2, (HIDDEN,), jnp.float32, -bound1, bound1)

    bound2 = 1.0 / jnp.sqrt(HIDDEN)
    w2 = jax.random.uniform(k3, (HIDDEN, 1), jnp.float32, -bound2, bound2)
    b2 = jax.random.uniform(k4, (1,), jnp.float32, -bound2, bound2)
    return w1, b1, w2, b2


if __name__ == "__main__":
    pass_len = 8
    batch = 8

    key = jax.random.PRNGKey(0)
    k_params, k_input = jax.random.split(key)
    w1, b1, w2, b2 = init_params(k_params, pass_len)

    # One-hot-ish password tensor: (B, pass_len, 101)
    pwd = jax.random.uniform(k_input, (batch, pass_len, 101), jnp.float32)

    out = discriminator_forward(pwd, w1, b1, w2, b2)
    out = jax.block_until_ready(out)

    # Pure-JAX f32 reference (kernel uses bf16 inputs for layer 1, so loose tol).
    x2d = pwd.reshape(batch, -1)
    h_ref = x2d @ w1 + b1
    h_ref = jnp.where(h_ref >= 0, h_ref, NEG_SLOPE * h_ref)
    ref = h_ref @ w2 + b2

    assert out.shape == (batch, 1)
    assert jnp.allclose(out, ref, atol=2e-2, rtol=2e-2), (
        f"max abs err {jnp.max(jnp.abs(out - ref))}"
    )

    print("KERNEL_OK")
</pallas_src>

<mosaic_0001>
module attributes {stable_mosaic.version = 11 : i64} {
  func.func @_disc_kernel(%arg0: i32, %arg1: memref<128x1024xbf16, #tpu.memory_space<vmem>>, %arg2: memref<1024x1024xbf16, #tpu.memory_space<vmem>>, %arg3: memref<1x1024xf32, #tpu.memory_space<vmem>>, %arg4: memref<1x1024xf32, #tpu.memory_space<vmem>>, %arg5: memref<1x1xf32, #tpu.memory_space<smem>>, %arg6: memref<128x1xf32, #tpu.memory_space<vmem>>) attributes {dimension_semantics = [#tpu.dimension_semantics<parallel>], iteration_bounds = array<i64: 1>, scalar_prefetch = 0 : i64, scratch_operands = 0 : i64, tpu.core_type = #tpu.core_type<tc>, window_params = [{transform_indices = @transform_0, window_bounds = array<i64: 128, 1024>}, {pipeline_mode = #tpu.pipeline_mode<synchronous>, transform_indices = @transform_1, window_bounds = array<i64: 1024, 1024>}, {pipeline_mode = #tpu.pipeline_mode<synchronous>, transform_indices = @transform_2, window_bounds = array<i64: 1, 1024>}, {pipeline_mode = #tpu.pipeline_mode<synchronous>, transform_indices = @transform_3, window_bounds = array<i64: 1, 1024>}, {transform_indices = @transform_4, window_bounds = array<i64: 1, 1>}, {transform_indices = @transform_5, window_bounds = array<i64: 128, 1>}]} {
    %c0 = arith.constant 0 : index
    %c0_0 = arith.constant 0 : index
    %0 = vector.load %arg1[%c0, %c0_0] : memref<128x1024xbf16, #tpu.memory_space<vmem>>, vector<128x1024xbf16>
    %c0_1 = arith.constant 0 : index
    %c0_2 = arith.constant 0 : index
    %1 = vector.load %arg2[%c0_1, %c0_2] : memref<1024x1024xbf16, #tpu.memory_space<vmem>>, vector<1024x1024xbf16>
    %cst = arith.constant dense<0.000000e+00> : vector<128x1024xf32>
    %2 = tpu.matmul %0, %1, %cst {dimension_numbers = #tpu.dot_dimension_numbers<[1], [0], [0], [1], [0, 0, 1, 1], [], []>} : vector<128x1024xbf16>, vector<1024x1024xbf16>, vector<128x1024xf32> -> vector<128x1024xf32>
    %c0_3 = arith.constant 0 : index
    %c0_4 = arith.constant 0 : index
    %3 = vector.load %arg3[%c0_3, %c0_4] : memref<1x1024xf32, #tpu.memory_space<vmem>>, vector<1x1024xf32>
    %4 = vector.broadcast %3 : vector<1x1024xf32> to vector<128x1024xf32>
    %5 = arith.addf %2, %4 : vector<128x1024xf32>
    %cst_5 = arith.constant 0.000000e+00 : f32
    %6 = vector.broadcast %cst_5 : f32 to vector<128x1024xf32>
    %7 = arith.cmpf oge, %5, %6 : vector<128x1024xf32>
    %cst_6 = arith.constant 0.00999999977 : f32
    %8 = vector.broadcast %cst_6 : f32 to vector<128x1024xf32>
    %9 = arith.mulf %8, %5 : vector<128x1024xf32>
    %10 = arith.select %7, %5, %9 : vector<128x1024xi1>, vector<128x1024xf32>
    %c0_7 = arith.constant 0 : index
    %c0_8 = arith.constant 0 : index
    %11 = vector.load %arg4[%c0_7, %c0_8] : memref<1x1024xf32, #tpu.memory_space<vmem>>, vector<1x1024xf32>
    %12 = vector.broadcast %11 : vector<1x1024xf32> to vector<128x1024xf32>
    %13 = arith.mulf %10, %12 : vector<128x1024xf32>
    %cst_9 = arith.constant dense<0.000000e+00> : vector<128xf32>
    %14 = vector.multi_reduction <add>, %13, %cst_9 [1] : vector<128x1024xf32> to vector<128xf32>
    %15 = vector.shape_cast %14 : vector<128xf32> to vector<128x1xf32>
    %c0_10 = arith.constant 0 : index
    %c0_11 = arith.constant 0 : index
    %16 = memref.load %arg5[%c0_10, %c0_11] : memref<1x1xf32, #tpu.memory_space<smem>>
    %17 = vector.broadcast %16 : f32 to vector<128x1xf32>
    %18 = arith.addf %15, %17 : vector<128x1xf32>
    %c0_12 = arith.constant 0 : index
    %c0_13 = arith.constant 0 : index
    %19 = vector.load %arg6[%c0_12, %c0_13] : memref<128x1xf32, #tpu.memory_space<vmem>>, vector<128x1xf32>
    tpu.vector_store %arg6[%c0_12, %c0_13], %18 {strides = array<i32>} : memref<128x1xf32, #tpu.memory_space<vmem>>, vector<128x1xf32>,
    return
  }
  func.func @transform_0(%arg0: i32) -> (i32, i32) {
    %c0_i32 = arith.constant 0 : i32
    %c0_i32_0 = arith.constant 0 : i32
    return %arg0, %c0_i32 : i32, i32
  }
  func.func @transform_1(%arg0: i32) -> (i32, i32) {
    %c0_i32 = arith.constant 0 : i32
    %c0_i32_0 = arith.constant 0 : i32
    %c0_i32_1 = arith.constant 0 : i32
    return %c0_i32, %c0_i32_0 : i32, i32
  }
  func.func @transform_2(%arg0: i32) -> (i32, i32) {
    %c0_i32 = arith.constant 0 : i32
    %c0_i32_0 = arith.constant 0 : i32
    %c0_i32_1 = arith.constant 0 : i32
    return %c0_i32, %c0_i32_0 : i32, i32
  }
  func.func @transform_3(%arg0: i32) -> (i32, i32) {
    %c0_i32 = arith.constant 0 : i32
    %c0_i32_0 = arith.constant 0 : i32
    %c0_i32_1 = arith.constant 0 : i32
    return %c0_i32, %c0_i32_0 : i32, i32
  }
  func.func @transform_4(%arg0: i32) -> (i32, i32) {
    %c0_i32 = arith.constant 0 : i32
    %c0_i32_0 = arith.constant 0 : i32
    %c0_i32_1 = arith.constant 0 : i32
    return %c0_i32, %c0_i32_0 : i32, i32
  }
  func.func @transform_5(%arg0: i32) -> (i32, i32) {
    %c0_i32 = arith.constant 0 : i32
    %c0_i32_0 = arith.constant 0 : i32
    return %arg0, %c0_i32 : i32, i32
  }
}

</mosaic_0001>

<bundles_post_ra>
// kernel: discriminator_forward.1
= control target key start
LH: loop header
LB: loop body
LE: loop exit
PB: predicated region body
PF: predicated region fallthrough
CT: control target
= control target key end

     0   :  { %s10604_s1 = inlined_call_operand.vmem [shape: bf16[1024,1024], index: 1, kind: input, shape index: {}]   ;;  %s10605_s0 = inlined_call_operand.vmem [shape: bf16[128,1024], index: 0, kind: input, shape index: {}]   ;;  %s10606_s2 = inlined_call_operand.vmem [shape: f32[1,1024], index: 2, kind: input, shape index: {}]   ;;  %s10607_s3 = inlined_call_operand.vmem [shape: f32[1,1024], index: 3, kind: input, shape index: {}]   ;;  %s10608_s4 = inlined_call_operand.<no memory space> [shape: f32[1,1], index: 4, kind: input, shape index: {}]   ;;  %s10609_s5 = inlined_call_operand.vmem [shape: f32[128,1], index: 5, kind: output, shape index: {}]  }
   0x1   :  { %v85_v0 = vld [vmem:[%s10604_s1] sm:$0xff]  ;;  %v86_v2 = vld [vmem:[%s10604_s1 + $0x8] sm:$0xff] }
   0x2   :  { %v89_v1 = vld [vmem:[%s10604_s1 + $0x20] sm:$0xff]  ;;  %v90_v4 = vld [vmem:[%s10604_s1 + $0x28] sm:$0xff] }
   0x3   :  { %v6129_v3 = vcombine.high %v85_v0, %v89_v1  ;;  %v6128_v5 = vcombine.low %v85_v0, %v89_v1  ;;  %v93_v6 = vld [vmem:[%s10604_s1 + $0x40] sm:$0xff]  ;;  %v6131_v8 = vcombine.high %v86_v2, %v90_v4  ;;  %v6130_v9 = vcombine.low %v86_v2, %v90_v4  ;;  %v94_v11 = vld [vmem:[%s10604_s1 + $0x48] sm:$0xff] }
   0x4   :  { %v97_v7 = vld [vmem:[%s10604_s1 + $0x60] sm:$0xff]  ;;  %v98_v12 = vld [vmem:[%s10604_s1 + $0x68] sm:$0xff] }
   0x5   :  { %v6137_v10 = vcombine.high %v93_v6, %v97_v7  ;;  %v101_v13 = vld [vmem:[%s10604_s1 + $0x80] sm:$0xff]  ;;  %3519 = vmatprep.subr.bf16.mxu0 %v6129_v3  ;;  %v6139_v14 = vcombine.high %v94_v11, %v98_v12  ;;  %v102_v16 = vld [vmem:[%s10604_s1 + $0x88] sm:$0xff]  ;;  %3971 = vmatprep.subr.bf16.mxu1 %v6131_v8  ;;  %v6136_v18 = vcombine.low %v93_v6, %v97_v7 }
   0x6   :  { %v105_v15 = vld [vmem:[%s10604_s1 + $0xa0] sm:$0xff]  ;;  %v106_v17 = vld [vmem:[%s10604_s1 + $0xa8] sm:$0xff]  ;;  %3520 = vmatpush1.bf16.msra.mxu0 %v6128_v5  ;;  %3972 = vmatpush1.bf16.msra.mxu1 %v6130_v9  ;;  %v6138_v19 = vcombine.low %v94_v11, %v98_v12 }
   0x7   :  { %3521 = vmatprep.subr.bf16.mxu0 %v6137_v10  ;;  %v6145_v20 = vcombine.high %v101_v13, %v105_v15  ;;  %3973 = vmatprep.subr.bf16.mxu1 %v6139_v14  ;;  %v6147_v21 = vcombine.high %v102_v16, %v106_v17  ;;  %v109_v22 = vld [vmem:[%s10604_s1 + $0xc0] sm:$0xff]  ;;  %v110_v24 = vld [vmem:[%s10604_s1 + $0xc8] sm:$0xff]  ;;  %v6144_v26 = vcombine.low %v101_v13, %v105_v15 }
   0x8   :  { %v113_v23 = vld [vmem:[%s10604_s1 + $0xe0] sm:$0xff]  ;;  %v114_v25 = vld [vmem:[%s10604_s1 + $0xe8] sm:$0xff]  ;;  %v6146_v27 = vcombine.low %v102_v16, %v106_v17 }
   0x9   :  { %v6153_v28 = vcombine.high %v109_v22, %v113_v23  ;;  %v6155_v29 = vcombine.high %v110_v24, %v114_v25  ;;  %v117_v30 = vld [vmem:[%s10604_s1 + $0x100] sm:$0xff]  ;;  %v118_v32 = vld [vmem:[%s10604_s1 + $0x108] sm:$0xff]  ;;  %v6152_v34 = vcombine.low %v109_v22, %v113_v23  ;;  %v6154_v35 = vcombine.low %v110_v24, %v114_v25 }
   0xa   :  { %3522 = vmatpush1.bf16.msra.mxu0 %v6136_v18  ;;  %3974 = vmatpush1.bf16.msra.mxu1 %v6138_v19  ;;  %v121_v31 = vld [vmem:[%s10604_s1 + $0x120] sm:$0xff]  ;;  %v122_v33 = vld [vmem:[%s10604_s1 + $0x128] sm:$0xff] }
   0xb   :  { %3523 = vmatprep.subr.bf16.mxu0 %v6145_v20  ;;  %3975 = vmatprep.subr.bf16.mxu1 %v6147_v21  ;;  %v6161_v36 = vcombine.high %v117_v30, %v121_v31  ;;  %v6163_v37 = vcombine.high %v118_v32, %v122_v33  ;;  %v125_v38 = vld [vmem:[%s10604_s1 + $0x140] sm:$0xff]  ;;  %v126_v40 = vld [vmem:[%s10604_s1 + $0x148] sm:$0xff]  ;;  %v6160_v42 = vcombine.low %v117_v30, %v121_v31 }
   0xc   :  { %v129_v39 = vld [vmem:[%s10604_s1 + $0x160] sm:$0xff]  ;;  %v130_v41 = vld [vmem:[%s10604_s1 + $0x168] sm:$0xff]  ;;  %v6162_v43 = vcombine.low %v118_v32, %v122_v33 }
   0xd   :  { %v6169_v44 = vcombine.high %v125_v38, %v129_v39  ;;  %v6171_v45 = vcombine.high %v126_v40, %v130_v41  ;;  %v133_v46 = vld [vmem:[%s10604_s1 + $0x180] sm:$0xff]  ;;  %v134_v48 = vld [vmem:[%s10604_s1 + $0x188] sm:$0xff]  ;;  %v6168_v50 = vcombine.low %v125_v38, %v129_v39  ;;  %v6170_v51 = vcombine.low %v126_v40, %v130_v41 }
   0xe   :  { %3524 = vmatpush1.bf16.msra.mxu0 %v6144_v26  ;;  %3976 = vmatpush1.bf16.msra.mxu1 %v6146_v27  ;;  %v137_v47 = vld [vmem:[%s10604_s1 + $0x1a0] sm:$0xff]  ;;  %v138_v49 = vld [vmem:[%s10604_s1 + $0x1a8] sm:$0xff] }
   0xf   :  { %3525 = vmatprep.subr.bf16.mxu0 %v6153_v28  ;;  %3977 = vmatprep.subr.bf16.mxu1 %v6155_v29  ;;  %v6177_v52 = vcombine.high %v133_v46, %v137_v47  ;;  %v7271_v53 = vld [vmem:[%s10605_s0] sm:$0xff]  ;;  %v6179_v55 = vcombine.high %v134_v48, %v138_v49  ;;  %v142_v59 = vld [vmem:[%s10604_s1 + $0x1c8] sm:$0xff]  ;;  %v6176_v61 = vcombine.low %v133_v46, %v137_v47 }
  0x10   :  { %v7276_v54 = vld [vmem:[%s10605_s0 + $0x20] sm:$0xff]  ;;  %v146_v60 = vld [vmem:[%s10604_s1 + $0x1e8] sm:$0xff]  ;;  %v6178_v62 = vcombine.low %v134_v48, %v138_v49 }
  0x11   :  { %v141_v56 = vld [vmem:[%s10604_s1 + $0x1c0] sm:$0xff]  ;;  %v7286_v58 = vcombine.high %v7271_v53, %v7276_v54  ;;  %v6187_v0 = vcombine.high %v142_v59, %v146_v60  ;;  %v150_v3 = vld [vmem:[%s10604_s1 + $0x208] sm:$0xff]  ;;  %v6186_v6 = vcombine.low %v142_v59, %v146_v60 }
  0x12   :  { %3526 = vmatpush1.bf16.msra.mxu0 %v6152_v34  ;;  %3978 = vmatpush1.bf16.msra.mxu1 %v6154_v35  ;;  %v145_v57 = vld [vmem:[%s10604_s1 + $0x1e0] sm:$0xff]  ;;  %v154_v4 = vld [vmem:[%s10604_s1 + $0x228] sm:$0xff] }
  0x13   :  { %3527 = vmatprep.subr.bf16.mxu0 %v6161_v36  ;;  %3979 = vmatprep.subr.bf16.mxu1 %v6163_v37  ;;  %v6185_v63 = vcombine.high %v141_v56, %v145_v57  ;;  %v149_v1 = vld [vmem:[%s10604_s1 + $0x200] sm:$0xff]  ;;  %v6184_v5 = vcombine.low %v141_v56, %v145_v57  ;;  %v6195_v8 = vcombine.high %v150_v3, %v154_v4  ;;  %v158_v11 = vld [vmem:[%s10604_s1 + $0x248] sm:$0xff] }
  0x14   :  { %3551 = vmatprep.mubr.bf16.mxu0 %v7286_v58  ;;  %v153_v2 = vld [vmem:[%s10604_s1 + $0x220] sm:$0xff]  ;;  %4003 = vmatprep.mubr.bf16.mxu1 %v7286_v58  ;;  %v162_v12 = vld [vmem:[%s10604_s1 + $0x268] sm:$0xff]  ;;  %v6194_v14 = vcombine.low %v150_v3, %v154_v4 }
  0x15   :  { %v6193_v7 = vcombine.high %v149_v1, %v153_v2  ;;  %v157_v9 = vld [vmem:[%s10604_s1 + $0x240] sm:$0xff]  ;;  %v6192_v13 = vcombine.low %v149_v1, %v153_v2  ;;  %v6203_v16 = vcombine.high %v158_v11, %v162_v12  ;;  %v166_v19 = vld [vmem:[%s10604_s1 + $0x288] sm:$0xff]  ;;  %v6202_v22 = vcombine.low %v158_v11, %v162_v12 }
  0x16   :  { %3528 = vmatpush1.bf16.msra.mxu0 %v6160_v42  ;;  %3980 = vmatpush1.bf16.msra.mxu1 %v6162_v43  ;;  %v161_v10 = vld [vmem:[%s10604_s1 + $0x260] sm:$0xff]  ;;  %v170_v20 = vld [vmem:[%s10604_s1 + $0x2a8] sm:$0xff] }
  0x17   :  { %3529 = vmatprep.subr.bf16.mxu0 %v6169_v44  ;;  %3981 = vmatprep.subr.bf16.mxu1 %v6171_v45  ;;  %v6201_v15 = vcombine.high %v157_v9, %v161_v10  ;;  %v165_v17 = vld [vmem:[%s10604_s1 + $0x280] sm:$0xff]  ;;  %v6200_v21 = vcombine.low %v157_v9, %v161_v10  ;;  %v6211_v24 = vcombine.high %v166_v19, %v170_v20  ;;  %v174_v27 = vld [vmem:[%s10604_s1 + $0x2c8] sm:$0xff] }
  0x18   :  { %v169_v18 = vld [vmem:[%s10604_s1 + $0x2a0] sm:$0xff]  ;;  %v178_v28 = vld [vmem:[%s10604_s1 + $0x2e8] sm:$0xff]  ;;  %v6210_v30 = vcombine.low %v166_v19, %v170_v20 }
  0x19   :  { %v6209_v23 = vcombine.high %v165_v17, %v169_v18  ;;  %v173_v25 = vld [vmem:[%s10604_s1 + $0x2c0] sm:$0xff]  ;;  %v6208_v29 = vcombine.low %v165_v17, %v169_v18  ;;  %v6219_v32 = vcombine.high %v174_v27, %v178_v28  ;;  %v182_v35 = vld [vmem:[%s10604_s1 + $0x308] sm:$0xff]  ;;  %v6218_v38 = vcombine.low %v174_v27, %v178_v28 }
  0x1a   :  { %3530 = vmatpush1.bf16.msra.mxu0 %v6168_v50  ;;  %3982 = vmatpush1.bf16.msra.mxu1 %v6170_v51  ;;  %v177_v26 = vld [vmem:[%s10604_s1 + $0x2e0] sm:$0xff]  ;;  %v186_v36 = vld [vmem:[%s10604_s1 + $0x328] sm:$0xff] }
  0x1b   :  { %3531 = vmatprep.subr.bf16.mxu0 %v6177_v52  ;;  %3983 = vmatprep.subr.bf16.mxu1 %v6179_v55  ;;  %v6217_v31 = vcombine.high %v173_v25, %v177_v26  ;;  %v181_v33 = vld [vmem:[%s10604_s1 + $0x300] sm:$0xff]  ;;  %v6216_v37 = vcombine.low %v173_v25, %v177_v26  ;;  %v6227_v40 = vcombine.high %v182_v35, %v186_v36  ;;  %v190_v43 = vld [vmem:[%s10604_s1 + $0x348] sm:$0xff] }
  0x1c   :  { %v185_v34 = vld [vmem:[%s10604_s1 + $0x320] sm:$0xff]  ;;  %v194_v44 = vld [vmem:[%s10604_s1 + $0x368] sm:$0xff]  ;;  %v6226_v46 = vcombine.low %v182_v35, %v186_v36 }
  0x1d   :  { %v6225_v39 = vcombine.high %v181_v33, %v185_v34  ;;  %v189_v41 = vld [vmem:[%s10604_s1 + $0x340] sm:$0xff]  ;;  %v6224_v45 = vcombine.low %v181_v33, %v185_v34  ;;  %v6235_v48 = vcombine.high %v190_v43, %v194_v44  ;;  %v198_v51 = vld [vmem:[%s10604_s1 + $0x388] sm:$0xff]  ;;  %v6234_v56 = vcombine.low %v190_v43, %v194_v44 }
  0x1e   :  { %3532 = vmatpush1.bf16.msra.mxu0 %v6176_v61  ;;  %3984 = vmatpush1.bf16.msra.mxu1 %v6178_v62  ;;  %v193_v42 = vld [vmem:[%s10604_s1 + $0x360] sm:$0xff]  ;;  %v202_v52 = vld [vmem:[%s10604_s1 + $0x3a8] sm:$0xff] }
  0x1f   :  { %3533 = vmatprep.subr.bf16.mxu0 %v6185_v63  ;;  %3985 = vmatprep.subr.bf16.mxu1 %v6187_v0  ;;  %v6233_v47 = vcombine.high %v189_v41, %v193_v42  ;;  %v197_v49 = vld [vmem:[%s10604_s1 + $0x380] sm:$0xff]  ;;  %v6232_v55 = vcombine.low %v189_v41, %v193_v42  ;;  %v6243_v59 = vcombine.high %v198_v51, %v202_v52  ;;  %v206_v62 = vld [vmem:[%s10604_s1 + $0x3c8] sm:$0xff] }
  0x20   :  { %v201_v50 = vld [vmem:[%s10604_s1 + $0x3a0] sm:$0xff]  ;;  %v210_v63 = vld [vmem:[%s10604_s1 + $0x3e8] sm:$0xff]  ;;  %v6242_v1 = vcombine.low %v198_v51, %v202_v52 }
  0x21   :  { %v6241_v57 = vcombine.high %v197_v49, %v201_v50  ;;  %v205_v60 = vld [vmem:[%s10604_s1 + $0x3c0] sm:$0xff]  ;;  %v6240_v0 = vcombine.low %v197_v49, %v201_v50  ;;  %v6251_v3 = vcombine.high %v206_v62, %v210_v63  ;;  %v6250_v9 = vcombine.low %v206_v62, %v210_v63  ;;  %v234_v25 = vld [vmem:[%s10604_s1 + $0x4a8] sm:$0xff] }
  0x22   :  { %3534 = vmatpush1.bf16.msra.mxu0 %v6184_v5  ;;  %3986 = vmatpush1.bf16.msra.mxu1 %v6186_v6  ;;  %v209_v61 = vld [vmem:[%s10604_s1 + $0x3e0] sm:$0xff]  ;;  %v214_v6 = vld [vmem:[%s10604_s1 + $0x408] sm:$0xff] }
  0x23   :  { %3535 = vmatprep.subr.bf16.mxu0 %v6193_v7  ;;  %3987 = vmatprep.subr.bf16.mxu1 %v6195_v8  ;;  %v6249_v2 = vcombine.high %v205_v60, %v209_v61  ;;  %v213_v4 = vld [vmem:[%s10604_s1 + $0x400] sm:$0xff]  ;;  %v218_v7 = vld [vmem:[%s10604_s1 + $0x428] sm:$0xff]  ;;  %v6248_v8 = vcombine.low %v205_v60, %v209_v61 }
  0x24   :  { %v217_v5 = vld [vmem:[%s10604_s1 + $0x420] sm:$0xff]  ;;  %v6259_v11 = vcombine.high %v214_v6, %v218_v7  ;;  %v6258_v20 = vcombine.low %v214_v6, %v218_v7  ;;  %v242_v34 = vld [vmem:[%s10604_s1 + $0x4e8] sm:$0xff] }
  0x25   :  { %v6257_v10 = vcombine.high %v213_v4, %v217_v5  ;;  %v221_v12 = vld [vmem:[%s10604_s1 + $0x440] sm:$0xff]  ;;  %v6256_v19 = vcombine.low %v213_v4, %v217_v5  ;;  %v246_v44 = vld [vmem:[%s10604_s1 + $0x508] sm:$0xff] }
  0x26   :  { %3536 = vmatpush1.bf16.msra.mxu0 %v6192_v13  ;;  %3988 = vmatpush1.bf16.msra.mxu1 %v6194_v14  ;;  %v225_v13 = vld [vmem:[%s10604_s1 + $0x460] sm:$0xff]  ;;  %v222_v14 = vld [vmem:[%s10604_s1 + $0x448] sm:$0xff] }
  0x27   :  { %3537 = vmatprep.subr.bf16.mxu0 %v6201_v15  ;;  %3989 = vmatprep.subr.bf16.mxu1 %v6203_v16  ;;  %v7415_v15 = vcombine.low %v7271_v53, %v7276_v54  ;;  %v226_v16 = vld [vmem:[%s10604_s1 + $0x468] sm:$0xff]  ;;  %v29_v17 = vld [vmem:[%s10605_s0 + $0x40] sm:$0xff]  ;;  %v6264_v26 = vcombine.low %v221_v12, %v225_v13 }
  0x28   :  { %v33_v18 = vld [vmem:[%s10605_s0 + $0x60] sm:$0xff]  ;;  %v6267_v53 = vcombine.high %v222_v14, %v226_v16  ;;  %v6266_v27 = vcombine.low %v222_v14, %v226_v16  ;;  %v254_v52 = vld [vmem:[%s10604_s1 + $0x548] sm:$0xff] }
  0x29   :  { %v7426_v54 = vcombine.high %v29_v17, %v33_v18  ;;  %v7453_v33 = vcombine.low %v29_v17, %v33_v18  ;;  %v37_v35 = vld [vmem:[%s10605_s0 + $0x80] sm:$0xff]  ;;  %v266_v4 = vld [vmem:[%s10604_s1 + $0x5a8] sm:$0xff] }
  0x2a   :  { %3538 = vmatpush1.bf16.msra.mxu0 %v6200_v21  ;;  %3990 = vmatpush1.bf16.msra.mxu1 %v6202_v22  ;;  %v6265_v21 = vcombine.high %v221_v12, %v225_v13  ;;  %v229_v22 = vld [vmem:[%s10604_s1 + $0x480] sm:$0xff]  ;;  %v274_v13 = vld [vmem:[%s10604_s1 + $0x5e8] sm:$0xff] }
  0x2b   :  { %3539 = vmatprep.subr.bf16.mxu0 %v6209_v23  ;;  %3991 = vmatprep.subr.bf16.mxu1 %v6211_v24  ;;  %v233_v23 = vld [vmem:[%s10604_s1 + $0x4a0] sm:$0xff]  ;;  %v230_v24 = vld [vmem:[%s10604_s1 + $0x488] sm:$0xff] }
  0x2c   :  { %v6273_v28 = vcombine.high %v229_v22, %v233_v23  ;;  %v41_v36 = vld [vmem:[%s10605_s0 + $0xa0] sm:$0xff] }
  0x2d   :  { %v7464_v41 = vcombine.high %v37_v35, %v41_v36  ;;  %v245_v42 = vld [vmem:[%s10604_s1 + $0x500] sm:$0xff] }
  0x2e   :  { %3540 = vmatpush1.bf16.msra.mxu0 %v6208_v29  ;;  %3992 = vmatpush1.bf16.msra.mxu1 %v6210_v30  ;;  %v6275_v29 = vcombine.high %v230_v24, %v234_v25  ;;  %v237_v30 = vld [vmem:[%s10604_s1 + $0x4c0] sm:$0xff] }
  0x2f   :  { %3541 = vmatprep.subr.bf16.mxu0 %v6217_v31  ;;  %3993 = vmatprep.subr.bf16.mxu1 %v6219_v32  ;;  %v241_v31 = vld [vmem:[%s10604_s1 + $0x4e0] sm:$0xff]  ;;  %v238_v32 = vld [vmem:[%s10604_s1 + $0x4c8] sm:$0xff] }
  0x30   :  { %v249_v43 = vld [vmem:[%s10604_s1 + $0x520] sm:$0xff] }
  0x31   :  { %v253_v50 = vld [vmem:[%s10604_s1 + $0x540] sm:$0xff]  ;;  %v6288_v60 = vcombine.low %v245_v42, %v249_v43 }
  0x32   :  { %3542 = vmatpush1.bf16.msra.mxu0 %v6216_v37  ;;  %3994 = vmatpush1.bf16.msra.mxu1 %v6218_v38  ;;  %v6272_v37 = vcombine.low %v229_v22, %v233_v23  ;;  %v6274_v38 = vcombine.low %v230_v24, %v234_v25  ;;  %v257_v51 = vld [vmem:[%s10604_s1 + $0x560] sm:$0xff]  ;;  %v278_v23 = vld [vmem:[%s10604_s1 + $0x608] sm:$0xff] }
  0x33   :  { %3543 = vmatprep.subr.bf16.mxu0 %v6225_v39  ;;  %3995 = vmatprep.subr.bf16.mxu1 %v6227_v40  ;;  %v6281_v39 = vcombine.high %v237_v30, %v241_v31  ;;  %v6283_v40 = vcombine.high %v238_v32, %v242_v34  ;;  %v6297_v62 = vcombine.high %v253_v50, %v257_v51  ;;  %v53_v14 = vld [vmem:[%s10605_s0 + $0x100] sm:$0xff]  ;;  %v282_v24 = vld [vmem:[%s10604_s1 + $0x628] sm:$0xff] }
  0x34   :  { %v6296_v5 = vcombine.low %v253_v50, %v257_v51  ;;  %v57_v16 = vld [vmem:[%s10605_s0 + $0x120] sm:$0xff] }
  0x35   :  { %v281_v22 = vld [vmem:[%s10604_s1 + $0x620] sm:$0xff] }
  0x36   :  { %3544 = vmatpush1.bf16.msra.mxu0 %v6224_v45  ;;  %3996 = vmatpush1.bf16.msra.mxu1 %v6226_v46  ;;  %v250_v45 = vld [vmem:[%s10604_s1 + $0x528] sm:$0xff]  ;;  %v6280_v46 = vcombine.low %v237_v30, %v241_v31  ;;  %v289_v30 = vld [vmem:[%s10604_s1 + $0x660] sm:$0xff] }
  0x37   :  { %3545 = vmatprep.subr.bf16.mxu0 %v6233_v47  ;;  %3997 = vmatprep.subr.bf16.mxu1 %v6235_v48  ;;  %v6282_v47 = vcombine.low %v238_v32, %v242_v34  ;;  %v6289_v48 = vcombine.high %v245_v42, %v249_v43  ;;  %v6291_v49 = vcombine.high %v246_v44, %v250_v45  ;;  %v286_v31 = vld [vmem:[%s10604_s1 + $0x648] sm:$0xff]  ;;  %v293_v43 = vld [vmem:[%s10604_s1 + $0x680] sm:$0xff] }
  0x38   :  { %v6290_v61 = vcombine.low %v246_v44, %v250_v45  ;;  %v7567_v32 = vcombine.low %v53_v14, %v57_v16  ;;  %v290_v34 = vld [vmem:[%s10604_s1 + $0x668] sm:$0xff]  ;;  %v297_v44 = vld [vmem:[%s10604_s1 + $0x6a0] sm:$0xff] }
  0x39   :  { %v294_v45 = vld [vmem:[%s10604_s1 + $0x688] sm:$0xff]  ;;  %v301_v51 = vld [vmem:[%s10604_s1 + $0x6c0] sm:$0xff] }
  0x3a   :  { %3546 = vmatpush1.bf16.msra.mxu0 %v6232_v55  ;;  %3998 = vmatpush1.bf16.msra.mxu1 %v6234_v56  ;;  %v7491_v55 = vcombine.low %v37_v35, %v41_v36  ;;  %v258_v56 = vld [vmem:[%s10604_s1 + $0x568] sm:$0xff]  ;;  %v61_v35 = vld [vmem:[%s10605_s0 + $0x140] sm:$0xff] }
  0x3b   :  { %3547 = vmatprep.subr.bf16.mxu0 %v6241_v57  ;;  %3999 = vmatprep.subr.bf16.mxu1 %v6243_v59  ;;  %v45_v57 = vld [vmem:[%s10605_s0 + $0xc0] sm:$0xff]  ;;  %v6299_v63 = vcombine.high %v254_v52, %v258_v56  ;;  %v6298_v6 = vcombine.low %v254_v52, %v258_v56  ;;  %v302_v56 = vld [vmem:[%s10604_s1 + $0x6c8] sm:$0xff] }
  0x3c   :  { %v49_v59 = vld [vmem:[%s10605_s0 + $0xe0] sm:$0xff] }
  0x3d   :  { %v7529_v12 = vcombine.low %v45_v57, %v49_v59  ;;  %v65_v36 = vld [vmem:[%s10605_s0 + $0x160] sm:$0xff] }
  0x3e   :  { %3548 = vmatpush1.bf16.msra.mxu0 %v6240_v0  ;;  %4000 = vmatpush1.bf16.msra.mxu1 %v6242_v1  ;;  %v7502_v0 = vcombine.high %v45_v57, %v49_v59  ;;  %v261_v1 = vld [vmem:[%s10604_s1 + $0x580] sm:$0xff]  ;;  %v7578_v42 = vcombine.high %v61_v35, %v65_v36  ;;  %v7605_v57 = vcombine.low %v61_v35, %v65_v36  ;;  %v306_v59 = vld [vmem:[%s10604_s1 + $0x6e8] sm:$0xff] }
  0x3f   :  { %3549 = vmatprep.subr.bf16.mxu0 %v6249_v2  ;;  %4001 = vmatprep.subr.bf16.mxu1 %v6251_v3  ;;  %v265_v2 = vld [vmem:[%s10604_s1 + $0x5a0] sm:$0xff]  ;;  %v262_v3 = vld [vmem:[%s10604_s1 + $0x588] sm:$0xff] }
  0x40   :  { %v6305_v7 = vcombine.high %v261_v1, %v265_v2  ;;  %v6304_v17 = vcombine.low %v261_v1, %v265_v2  ;;  %v6306_v18 = vcombine.low %v262_v3, %v266_v4  ;;  %v305_v52 = vld [vmem:[%s10604_s1 + $0x6e0] sm:$0xff]  ;;  %v6347_v2 = vcombine.high %v302_v56, %v306_v59 }
  0x41   :  { %v6345_v1 = vcombine.high %v301_v51, %v305_v52  ;;  %v333_v36 = vld [vmem:[%s10604_s1 + $0x7c0] sm:$0xff] }
  0x42   :  { %3550 = vmatpush1.bf16.msra.mxu0 %v6248_v8  ;;  %4002 = vmatpush1.bf16.msra.mxu1 %v6250_v9  ;;  %v6307_v8 = vcombine.high %v262_v3, %v266_v4  ;;  %v269_v9 = vld [vmem:[%s10604_s1 + $0x5c0] sm:$0xff] }
  0x43   :  { %3632 = vmatprep.subr.bf16.mxu0 %v6257_v10  ;;  %4084 = vmatprep.subr.bf16.mxu1 %v6259_v11  ;;  %v273_v10 = vld [vmem:[%s10604_s1 + $0x5e0] sm:$0xff]  ;;  %v270_v11 = vld [vmem:[%s10604_s1 + $0x5c8] sm:$0xff] }
  0x44   :  { %v6312_v25 = vcombine.low %v269_v9, %v273_v10  ;;  %v309_v4 = vld [vmem:[%s10604_s1 + $0x700] sm:$0xff] }
  0x45   :  { %3552 = vmatmul.mubr.bf16.vlgmr.msra.gmra.mrb[0].mxu0 %v7415_v15  ;;  %4004 = vmatmul.mubr.bf16.vlgmr.msra.gmra.mrb[0].mxu1 %v7415_v15 }
  0x46   :  { %3633 = vmatpush1.bf16.msra.mxu0 %v6256_v19  ;;  %4085 = vmatpush1.bf16.msra.mxu1 %v6258_v20  ;;  %v6313_v19 = vcombine.high %v269_v9, %v273_v10  ;;  %v6315_v20 = vcombine.high %v270_v11, %v274_v13  ;;  %v6346_v9 = vcombine.low %v302_v56, %v306_v59  ;;  %v346_v56 = vld [vmem:[%s10604_s1 + $0x828] sm:$0xff] }
  0x47   :  { %3634 = vmatprep.subr.bf16.mxu0 %v6265_v21  ;;  %4086 = vmatprep.subr.bf16.mxu1 %v6267_v53  ;;  %v7540_v21 = vcombine.high %v53_v14, %v57_v16  ;;  %v277_v53 = vld [vmem:[%s10604_s1 + $0x600] sm:$0xff]  ;;  %v318_v16 = vld [vmem:[%s10604_s1 + $0x748] sm:$0xff] }
  0x48   :  { %3561 = vmatprep.mubr.bf16.mxu0 %v7426_v54  ;;  %4013 = vmatprep.mubr.bf16.mxu1 %v7426_v54  ;;  %v321_v14 = vld [vmem:[%s10604_s1 + $0x760] sm:$0xff] }
  0x4a   :  { %3635 = vmatpush1.bf16.msra.mxu0 %v6264_v26  ;;  %4087 = vmatpush1.bf16.msra.mxu1 %v6266_v27  ;;  %v6314_v26 = vcombine.low %v270_v11, %v274_v13  ;;  %v6321_v27 = vcombine.high %v277_v53, %v281_v22  ;;  %v317_v13 = vld [vmem:[%s10604_s1 + $0x740] sm:$0xff] }
  0x4b   :  { %3636 = vmatprep.subr.bf16.mxu0 %v6273_v28  ;;  %4088 = vmatprep.subr.bf16.mxu1 %v6275_v29  ;;  %v6323_v28 = vcombine.high %v278_v23, %v282_v24  ;;  %v285_v29 = vld [vmem:[%s10604_s1 + $0x640] sm:$0xff] }
  0x4d   :  { %3562 = vmatmul.mubr.bf16.gmra.mrb[4].mxu0 %v7453_v33  ;;  %4014 = vmatmul.mubr.bf16.gmra.mrb[4].mxu1 %v7453_v33 }
  0x4e   :  { %3637 = vmatpush1.bf16.msra.mxu0 %v6272_v37  ;;  %4089 = vmatpush1.bf16.msra.mxu1 %v6274_v38  ;;  %v6320_v37 = vcombine.low %v277_v53, %v281_v22  ;;  %v6322_v38 = vcombine.low %v278_v23, %v282_v24  ;;  %v6361_v23 = vcombine.high %v317_v13, %v321_v14 }
  0x4f   :  { %3638 = vmatprep.subr.bf16.mxu0 %v6281_v39  ;;  %4090 = vmatprep.subr.bf16.mxu1 %v6283_v40  ;;  %v6329_v39 = vcombine.high %v285_v29, %v289_v30  ;;  %v6331_v40 = vcombine.high %v286_v31, %v290_v34 }
  0x50   :  { %3571 = vmatprep.mubr.bf16.mxu0 %v7464_v41  ;;  %4023 = vmatprep.mubr.bf16.mxu1 %v7464_v41 }
  0x52   :  { %3639 = vmatpush1.bf16.msra.mxu0 %v6280_v46  ;;  %4091 = vmatpush1.bf16.msra.mxu1 %v6282_v47  ;;  %v298_v46 = vld [vmem:[%s10604_s1 + $0x6a8] sm:$0xff]  ;;  %v6328_v47 = vcombine.low %v285_v29, %v289_v30  ;;  %v6360_v30 = vcombine.low %v317_v13, %v321_v14  ;;  %v357_v14 = vld [vmem:[%s10604_s1 + $0x880] sm:$0xff] }
  0x53   :  { %3640 = vmatprep.subr.bf16.mxu0 %v6289_v48  ;;  %4092 = vmatprep.subr.bf16.mxu1 %v6291_v49  ;;  %v6330_v48 = vcombine.low %v286_v31, %v290_v34  ;;  %v6337_v49 = vcombine.high %v293_v43, %v297_v44  ;;  %v6339_v50 = vcombine.high %v294_v45, %v298_v46  ;;  %v330_v29 = vld [vmem:[%s10604_s1 + $0x7a8] sm:$0xff] }
  0x55   :  { %3572 = vmatmul.mubr.bf16.gmra.mrb[8].mxu0 %v7491_v55  ;;  %4024 = vmatmul.mubr.bf16.gmra.mrb[8].mxu1 %v7491_v55 }
  0x56   :  { %3641 = vmatpush1.bf16.msra.mxu0 %v6288_v60  ;;  %4093 = vmatpush1.bf16.msra.mxu1 %v6290_v61  ;;  %v69_v60 = vld [vmem:[%s10605_s0 + $0x180] sm:$0xff] }
  0x57   :  { %3642 = vmatprep.subr.bf16.mxu0 %v6297_v62  ;;  %4094 = vmatprep.subr.bf16.mxu1 %v6299_v63  ;;  %v73_v61 = vld [vmem:[%s10605_s0 + $0x1a0] sm:$0xff]  ;;  %v6336_v62 = vcombine.low %v293_v43, %v297_v44  ;;  %v6338_v63 = vcombine.low %v294_v45, %v298_v46  ;;  %v22_v43 = vld [vmem:[%s10605_s0 + $0x8] sm:$0xff] }
  0x58   :  { %3581 = vmatprep.mubr.bf16.mxu0 %v7502_v0  ;;  %4033 = vmatprep.mubr.bf16.mxu1 %v7502_v0  ;;  %v7616_v3 = vcombine.high %v69_v60, %v73_v61  ;;  %v26_v44 = vld [vmem:[%s10605_s0 + $0x28] sm:$0xff] }
  0x5a   :  { %3643 = vmatpush1.bf16.msra.mxu0 %v6296_v5  ;;  %4095 = vmatpush1.bf16.msra.mxu1 %v6298_v6  ;;  %v313_v5 = vld [vmem:[%s10604_s1 + $0x720] sm:$0xff]  ;;  %v310_v6 = vld [vmem:[%s10604_s1 + $0x708] sm:$0xff] }
  0x5b   :  { %3644 = vmatprep.subr.bf16.mxu0 %v6305_v7  ;;  %4096 = vmatprep.subr.bf16.mxu1 %v6307_v8  ;;  %v314_v7 = vld [vmem:[%s10604_s1 + $0x728] sm:$0xff]  ;;  %v6344_v8 = vcombine.low %v301_v51, %v305_v52  ;;  %v6353_v10 = vcombine.high %v309_v4, %v313_v5  ;;  %v6352_v53 = vcombine.low %v309_v4, %v313_v5  ;;  %v345_v51 = vld [vmem:[%s10604_s1 + $0x820] sm:$0xff] }
  0x5c   :  { %v6355_v11 = vcombine.high %v310_v6, %v314_v7  ;;  %v6354_v22 = vcombine.low %v310_v6, %v314_v7  ;;  %v342_v52 = vld [vmem:[%s10604_s1 + $0x808] sm:$0xff]  ;;  %v7718_v4 = vcombine.low %v22_v43, %v26_v44 }
  0x5d   :  { %3582 = vmatmul.mubr.bf16.gmra.mrb[12].mxu0 %v7529_v12  ;;  %4034 = vmatmul.mubr.bf16.gmra.mrb[12].mxu1 %v7529_v12  ;;  %v354_v5 = vld [vmem:[%s10604_s1 + $0x868] sm:$0xff] }
  0x5e   :  { %3645 = vmatpush1.bf16.msra.mxu0 %v6304_v17  ;;  %4097 = vmatpush1.bf16.msra.mxu1 %v6306_v18  ;;  %v7643_v17 = vcombine.low %v69_v60, %v73_v61  ;;  %v322_v18 = vld [vmem:[%s10604_s1 + $0x768] sm:$0xff] }
  0x5f   :  { %3646 = vmatprep.subr.bf16.mxu0 %v6313_v19  ;;  %4098 = vmatprep.subr.bf16.mxu1 %v6315_v20  ;;  %v77_v19 = vld [vmem:[%s10605_s0 + $0x1c0] sm:$0xff]  ;;  %v6363_v24 = vcombine.high %v318_v16, %v322_v18  ;;  %v6362_v31 = vcombine.low %v318_v16, %v322_v18  ;;  %v30_v6 = vld [vmem:[%s10605_s0 + $0x48] sm:$0xff] }
  0x60   :  { %3591 = vmatprep.mubr.bf16.mxu0 %v7540_v21  ;;  %4043 = vmatprep.mubr.bf16.mxu1 %v7540_v21  ;;  %v81_v20 = vld [vmem:[%s10605_s0 + $0x1e0] sm:$0xff]  ;;  %v34_v7 = vld [vmem:[%s10605_s0 + $0x68] sm:$0xff] }
  0x61   :  { %v7730_v13 = vcombine.high %v30_v6, %v34_v7  ;;  %v361_v16 = vld [vmem:[%s10604_s1 + $0x8a0] sm:$0xff]  ;;  %v358_v18 = vld [vmem:[%s10604_s1 + $0x888] sm:$0xff] }
  0x62   :  { %3647 = vmatpush1.bf16.msra.mxu0 %v6312_v25  ;;  %4099 = vmatpush1.bf16.msra.mxu1 %v6314_v26  ;;  %v7654_v25 = vcombine.high %v77_v19, %v81_v20  ;;  %v325_v26 = vld [vmem:[%s10604_s1 + $0x780] sm:$0xff] }
  0x63   :  { %3648 = vmatprep.subr.bf16.mxu0 %v6321_v27  ;;  %4100 = vmatprep.subr.bf16.mxu1 %v6323_v28  ;;  %v329_v27 = vld [vmem:[%s10604_s1 + $0x7a0] sm:$0xff]  ;;  %v326_v28 = vld [vmem:[%s10604_s1 + $0x788] sm:$0xff] }
  0x64   :  { %v6369_v34 = vcombine.high %v325_v26, %v329_v27  ;;  %v6371_v35 = vcombine.high %v326_v28, %v330_v29  ;;  %v6368_v45 = vcombine.low %v325_v26, %v329_v27  ;;  %v6370_v46 = vcombine.low %v326_v28, %v330_v29  ;;  %v369_v26 = vld [vmem:[%s10604_s1 + $0x8e0] sm:$0xff]  ;;  %v366_v27 = vld [vmem:[%s10604_s1 + $0x8c8] sm:$0xff] }
  0x65   :  { %3592 = vmatmul.mubr.bf16.gmra.mrb[16].mxu0 %v7567_v32  ;;  %4044 = vmatmul.mubr.bf16.gmra.mrb[16].mxu1 %v7567_v32  ;;  %v7757_v28 = vcombine.low %v30_v6, %v34_v7  ;;  %v370_v29 = vld [vmem:[%s10604_s1 + $0x8e8] sm:$0xff]  ;;  %v389_v7 = vld [vmem:[%s10604_s1 + $0x980] sm:$0xff] }
  0x66   :  { %3649 = vmatpush1.bf16.msra.mxu0 %v6320_v37  ;;  %4101 = vmatpush1.bf16.msra.mxu1 %v6322_v38  ;;  %v337_v37 = vld [vmem:[%s10604_s1 + $0x7e0] sm:$0xff]  ;;  %v334_v38 = vld [vmem:[%s10604_s1 + $0x7c8] sm:$0xff] }
  0x67   :  { %3650 = vmatprep.subr.bf16.mxu0 %v6329_v39  ;;  %4102 = vmatprep.subr.bf16.mxu1 %v6331_v40  ;;  %v7681_v39 = vcombine.low %v77_v19, %v81_v20  ;;  %v338_v40 = vld [vmem:[%s10604_s1 + $0x7e8] sm:$0xff]  ;;  %v6376_v59 = vcombine.low %v333_v36, %v337_v37 }
  0x68   :  { %3601 = vmatprep.mubr.bf16.mxu0 %v7578_v42  ;;  %4053 = vmatprep.mubr.bf16.mxu1 %v7578_v42  ;;  %v6378_v60 = vcombine.low %v334_v38, %v338_v40  ;;  %v362_v19 = vld [vmem:[%s10604_s1 + $0x8a8] sm:$0xff] }
  0x6a   :  { %3651 = vmatpush1.bf16.msra.mxu0 %v6328_v47  ;;  %4103 = vmatpush1.bf16.msra.mxu1 %v6330_v48  ;;  %v6377_v47 = vcombine.high %v333_v36, %v337_v37  ;;  %v6379_v48 = vcombine.high %v334_v38, %v338_v40  ;;  %v6411_v37 = vcombine.high %v366_v27, %v370_v29  ;;  %v373_v40 = vld [vmem:[%s10604_s1 + $0x900] sm:$0xff] }
  0x6b   :  { %3652 = vmatprep.subr.bf16.mxu0 %v6337_v49  ;;  %4104 = vmatprep.subr.bf16.mxu1 %v6339_v50  ;;  %v7692_v49 = vcombine.high %v22_v43, %v26_v44  ;;  %v341_v50 = vld [vmem:[%s10604_s1 + $0x800] sm:$0xff]  ;;  %v374_v44 = vld [vmem:[%s10604_s1 + $0x908] sm:$0xff] }
  0x6c   :  { %v6385_v61 = vcombine.high %v341_v50, %v345_v51  ;;  %v377_v43 = vld [vmem:[%s10604_s1 + $0x920] sm:$0xff] }
  0x6d   :  { %3602 = vmatmul.mubr.bf16.gmra.mrb[20].mxu0 %v7605_v57  ;;  %4054 = vmatmul.mubr.bf16.gmra.mrb[20].mxu1 %v7605_v57 }
  0x6e   :  { %3653 = vmatpush1.bf16.msra.mxu0 %v6336_v62  ;;  %4105 = vmatpush1.bf16.msra.mxu1 %v6338_v63  ;;  %v6387_v62 = vcombine.high %v342_v52, %v346_v56  ;;  %v349_v63 = vld [vmem:[%s10604_s1 + $0x840] sm:$0xff] }
  0x6f   :  { %3654 = vmatprep.subr.bf16.mxu0 %v6345_v1  ;;  %4106 = vmatprep.subr.bf16.mxu1 %v6347_v2  ;;  %v353_v1 = vld [vmem:[%s10604_s1 + $0x860] sm:$0xff]  ;;  %v350_v2 = vld [vmem:[%s10604_s1 + $0x848] sm:$0xff] }
  0x70   :  { %3611 = vmatprep.mubr.bf16.mxu0 %v7616_v3  ;;  %4063 = vmatprep.mubr.bf16.mxu1 %v7616_v3  ;;  %v6392_v20 = vcombine.low %v349_v63, %v353_v1 }
  0x72   :  { %3655 = vmatpush1.bf16.msra.mxu0 %v6344_v8  ;;  %4107 = vmatpush1.bf16.msra.mxu1 %v6346_v9  ;;  %v6384_v8 = vcombine.low %v341_v50, %v345_v51  ;;  %v6386_v9 = vcombine.low %v342_v52, %v346_v56  ;;  %v381_v51 = vld [vmem:[%s10604_s1 + $0x940] sm:$0xff]  ;;  %v382_v56 = vld [vmem:[%s10604_s1 + $0x948] sm:$0xff] }
  0x73   :  { %3656 = vmatprep.subr.bf16.mxu0 %v6353_v10  ;;  %4108 = vmatprep.subr.bf16.mxu1 %v6355_v11  ;;  %v6393_v10 = vcombine.high %v349_v63, %v353_v1  ;;  %v6395_v11 = vcombine.high %v350_v2, %v354_v5  ;;  %v385_v52 = vld [vmem:[%s10604_s1 + $0x960] sm:$0xff]  ;;  %v6416_v63 = vcombine.low %v373_v40, %v377_v43 }
  0x75   :  { %3612 = vmatmul.mubr.bf16.gmra.mrb[24].mxu0 %v7643_v17  ;;  %4064 = vmatmul.mubr.bf16.gmra.mrb[24].mxu1 %v7643_v17 }
  0x76   :  { %3657 = vmatpush1.bf16.msra.mxu0 %v6352_v53  ;;  %4109 = vmatpush1.bf16.msra.mxu1 %v6354_v22  ;;  %v6394_v53 = vcombine.low %v350_v2, %v354_v5  ;;  %v6401_v22 = vcombine.high %v357_v14, %v361_v16  ;;  %v6425_v2 = vcombine.high %v381_v51, %v385_v52 }
  0x77   :  { %3658 = vmatprep.subr.bf16.mxu0 %v6361_v23  ;;  %4110 = vmatprep.subr.bf16.mxu1 %v6363_v24  ;;  %v6403_v23 = vcombine.high %v358_v18, %v362_v19  ;;  %v365_v24 = vld [vmem:[%s10604_s1 + $0x8c0] sm:$0xff] }
  0x78   :  { %3621 = vmatprep.mubr.bf16.mxu0 %v7654_v25  ;;  %4073 = vmatprep.mubr.bf16.mxu1 %v7654_v25  ;;  %v6409_v36 = vcombine.high %v365_v24, %v369_v26 }
  0x7a   :  { %3659 = vmatpush1.bf16.msra.mxu0 %v6360_v30  ;;  %4111 = vmatpush1.bf16.msra.mxu1 %v6362_v31  ;;  %v38_v30 = vld [vmem:[%s10605_s0 + $0x88] sm:$0xff] }
  0x7b   :  { %3660 = vmatprep.subr.bf16.mxu0 %v6369_v34  ;;  %4112 = vmatprep.subr.bf16.mxu1 %v6371_v35  ;;  %v42_v31 = vld [vmem:[%s10605_s0 + $0xa8] sm:$0xff]  ;;  %v6400_v34 = vcombine.low %v357_v14, %v361_v16  ;;  %v6402_v35 = vcombine.low %v358_v18, %v362_v19  ;;  %v397_v19 = vld [vmem:[%s10604_s1 + $0x9c0] sm:$0xff] }
  0x7c   :  { %v7768_v38 = vcombine.high %v38_v30, %v42_v31 }
  0x7d   :  { %3622 = vmatmul.mubr.bf16.gmra.mrb[28].mxu0 %v7681_v39  ;;  %4074 = vmatmul.mubr.bf16.gmra.mrb[28].mxu1 %v7681_v39 }
  0x7e   :  { %3661 = vmatpush1.bf16.msra.mxu0 %v6368_v45  ;;  %4113 = vmatpush1.bf16.msra.mxu1 %v6370_v46  ;;  %v378_v45 = vld [vmem:[%s10604_s1 + $0x928] sm:$0xff]  ;;  %v6408_v46 = vcombine.low %v365_v24, %v369_v26 }
  0x7f   :  { %3662 = vmatprep.subr.bf16.mxu0 %v6377_v47  ;;  %4114 = vmatprep.subr.bf16.mxu1 %v6379_v48  ;;  %v6410_v47 = vcombine.low %v366_v27, %v370_v29  ;;  %v6417_v48 = vcombine.high %v373_v40, %v377_v43  ;;  %v6419_v50 = vcombine.high %v374_v44, %v378_v45  ;;  %v54_v24 = vld [vmem:[%s10605_s0 + $0x108] sm:$0xff] }
  0x80   :  { %3664 = vmatprep.mubr.bf16.mxu0 %v7692_v49  ;;  %4116 = vmatprep.mubr.bf16.mxu1 %v7692_v49  ;;  %v6418_v1 = vcombine.low %v374_v44, %v378_v45  ;;  %v58_v26 = vld [vmem:[%s10605_s0 + $0x128] sm:$0xff] }
  0x81   :  { %v410_v40 = vld [vmem:[%s10604_s1 + $0xa28] sm:$0xff] }
  0x82   :  { %3663 = vmatpush1.bf16.msra.mxu0 %v6376_v59  ;;  %4115 = vmatpush1.bf16.msra.mxu1 %v6378_v60  ;;  %v7795_v59 = vcombine.low %v38_v30, %v42_v31  ;;  %v386_v60 = vld [vmem:[%s10604_s1 + $0x968] sm:$0xff] }
  0x83   :  { %3745 = vmatprep.subr.bf16.mxu0 %v6385_v61  ;;  %4197 = vmatprep.subr.bf16.mxu1 %v6387_v62  ;;  %v46_v61 = vld [vmem:[%s10605_s0 + $0xc8] sm:$0xff]  ;;  %v6427_v5 = vcombine.high %v382_v56, %v386_v60  ;;  %v6426_v14 = vcombine.low %v382_v56, %v386_v60 }
  0x84   :  { %v50_v62 = vld [vmem:[%s10605_s0 + $0xe8] sm:$0xff] }
  0x85   :  { %3665 = vmatmul.mubr.bf16.vlgmr.msra.gmra.mrb[0].mxu0 %v7718_v4  ;;  %4117 = vmatmul.mubr.bf16.vlgmr.msra.gmra.mrb[0].mxu1 %v7718_v4  ;;  %v7806_v6 = vcombine.high %v46_v61, %v50_v62  ;;  %v62_v56 = vld [vmem:[%s10605_s0 + $0x148] sm:$0xff] }
  0x86   :  { %3746 = vmatpush1.bf16.msra.mxu0 %v6384_v8  ;;  %4198 = vmatpush1.bf16.msra.mxu1 %v6386_v9  ;;  %v393_v8 = vld [vmem:[%s10604_s1 + $0x9a0] sm:$0xff]  ;;  %v390_v9 = vld [vmem:[%s10604_s1 + $0x988] sm:$0xff] }
  0x87   :  { %3747 = vmatprep.subr.bf16.mxu0 %v6393_v10  ;;  %4199 = vmatprep.subr.bf16.mxu1 %v6395_v11  ;;  %v394_v10 = vld [vmem:[%s10604_s1 + $0x9a8] sm:$0xff]  ;;  %v6424_v11 = vcombine.low %v381_v51, %v385_v52  ;;  %v6433_v16 = vcombine.high %v389_v7, %v393_v8  ;;  %v6432_v27 = vcombine.low %v389_v7, %v393_v8  ;;  %v425_v7 = vld [vmem:[%s10604_s1 + $0xaa0] sm:$0xff] }
  0x88   :  { %3674 = vmatprep.mubr.bf16.mxu0 %v7730_v13  ;;  %4126 = vmatprep.mubr.bf16.mxu1 %v7730_v13  ;;  %v6435_v18 = vcombine.high %v390_v9, %v394_v10  ;;  %v6434_v29 = vcombine.low %v390_v9, %v394_v10  ;;  %v7871_v51 = vcombine.low %v54_v24, %v58_v26  ;;  %v418_v52 = vld [vmem:[%s10604_s1 + $0xa68] sm:$0xff] }
  0x89   :  { %v66_v60 = vld [vmem:[%s10605_s0 + $0x168] sm:$0xff] }
  0x8a   :  { %3748 = vmatpush1.bf16.msra.mxu0 %v6392_v20  ;;  %4200 = vmatpush1.bf16.msra.mxu1 %v6394_v53  ;;  %v401_v20 = vld [vmem:[%s10604_s1 + $0x9e0] sm:$0xff]  ;;  %v398_v53 = vld [vmem:[%s10604_s1 + $0x9c8] sm:$0xff] }
  0x8b   :  { %3749 = vmatprep.subr.bf16.mxu0 %v6401_v22  ;;  %4201 = vmatprep.subr.bf16.mxu1 %v6403_v23  ;;  %v7833_v22 = vcombine.low %v46_v61, %v50_v62  ;;  %v402_v23 = vld [vmem:[%s10604_s1 + $0x9e8] sm:$0xff]  ;;  %v6441_v30 = vcombine.high %v397_v19, %v401_v20  ;;  %v6440_v43 = vcombine.low %v397_v19, %v401_v20  ;;  %v433_v19 = vld [vmem:[%s10604_s1 + $0xae0] sm:$0xff] }
  0x8c   :  { %v6443_v31 = vcombine.high %v398_v53, %v402_v23  ;;  %v6442_v44 = vcombine.low %v398_v53, %v402_v23  ;;  %v422_v8 = vld [vmem:[%s10604_s1 + $0xa88] sm:$0xff]  ;;  %v7909_v53 = vcombine.low %v62_v56, %v66_v60 }
  0x8d   :  { %3675 = vmatmul.mubr.bf16.gmra.mrb[4].mxu0 %v7757_v28  ;;  %4127 = vmatmul.mubr.bf16.gmra.mrb[4].mxu1 %v7757_v28  ;;  %v426_v9 = vld [vmem:[%s10604_s1 + $0xaa8] sm:$0xff] }
  0x8e   :  { %3750 = vmatpush1.bf16.msra.mxu0 %v6400_v34  ;;  %4202 = vmatpush1.bf16.msra.mxu1 %v6402_v35  ;;  %v7844_v34 = vcombine.high %v54_v24, %v58_v26  ;;  %v405_v35 = vld [vmem:[%s10604_s1 + $0xa00] sm:$0xff]  ;;  %v430_v20 = vld [vmem:[%s10604_s1 + $0xac8] sm:$0xff] }
  0x8f   :  { %3751 = vmatprep.subr.bf16.mxu0 %v6409_v36  ;;  %4203 = vmatprep.subr.bf16.mxu1 %v6411_v37  ;;  %v409_v36 = vld [vmem:[%s10604_s1 + $0xa20] sm:$0xff]  ;;  %v406_v37 = vld [vmem:[%s10604_s1 + $0xa08] sm:$0xff] }
  0x90   :  { %3684 = vmatprep.mubr.bf16.mxu0 %v7768_v38  ;;  %4136 = vmatprep.mubr.bf16.mxu1 %v7768_v38  ;;  %v6449_v45 = vcombine.high %v405_v35, %v409_v36  ;;  %v6448_v61 = vcombine.low %v405_v35, %v409_v36  ;;  %v6450_v62 = vcombine.low %v406_v37, %v410_v40  ;;  %v434_v23 = vld [vmem:[%s10604_s1 + $0xae8] sm:$0xff]  ;;  %v437_v36 = vld [vmem:[%s10604_s1 + $0xb00] sm:$0xff] }
  0x91   :  { %v70_v24 = vld [vmem:[%s10605_s0 + $0x188] sm:$0xff] }
  0x92   :  { %3752 = vmatpush1.bf16.msra.mxu0 %v6408_v46  ;;  %4204 = vmatpush1.bf16.msra.mxu1 %v6410_v47  ;;  %v6451_v46 = vcombine.high %v406_v37, %v410_v40  ;;  %v413_v47 = vld [vmem:[%s10604_s1 + $0xa40] sm:$0xff]  ;;  %v74_v26 = vld [vmem:[%s10605_s0 + $0x1a8] sm:$0xff] }
  0x93   :  { %3753 = vmatprep.subr.bf16.mxu0 %v6417_v48  ;;  %4205 = vmatprep.subr.bf16.mxu1 %v6419_v50  ;;  %v417_v48 = vld [vmem:[%s10604_s1 + $0xa60] sm:$0xff]  ;;  %v414_v50 = vld [vmem:[%s10604_s1 + $0xa48] sm:$0xff]  ;;  %v7920_v35 = vcombine.high %v70_v24, %v74_v26 }
  0x94   :  { %v6456_v10 = vcombine.low %v413_v47, %v417_v48  ;;  %v441_v37 = vld [vmem:[%s10604_s1 + $0xb20] sm:$0xff]  ;;  %v438_v40 = vld [vmem:[%s10604_s1 + $0xb08] sm:$0xff] }
  0x95   :  { %3685 = vmatmul.mubr.bf16.gmra.mrb[8].mxu0 %v7795_v59  ;;  %4137 = vmatmul.mubr.bf16.gmra.mrb[8].mxu1 %v7795_v59 }
  0x96   :  { %3754 = vmatpush1.bf16.msra.mxu0 %v6416_v63  ;;  %4206 = vmatpush1.bf16.msra.mxu1 %v6418_v1  ;;  %v6457_v63 = vcombine.high %v413_v47, %v417_v48  ;;  %v6459_v1 = vcombine.high %v414_v50, %v418_v52  ;;  %v445_v48 = vld [vmem:[%s10604_s1 + $0xb40] sm:$0xff] }
  0x97   :  { %3755 = vmatprep.subr.bf16.mxu0 %v6425_v2  ;;  %4207 = vmatprep.subr.bf16.mxu1 %v6427_v5  ;;  %v7882_v2 = vcombine.high %v62_v56, %v66_v60  ;;  %v421_v5 = vld [vmem:[%s10604_s1 + $0xa80] sm:$0xff]  ;;  %v7947_v56 = vcombine.low %v70_v24, %v74_v26  ;;  %v450_v60 = vld [vmem:[%s10604_s1 + $0xb68] sm:$0xff] }
  0x98   :  { %3694 = vmatprep.mubr.bf16.mxu0 %v7806_v6  ;;  %4146 = vmatprep.mubr.bf16.mxu1 %v7806_v6  ;;  %v465_v24 = vld [vmem:[%s10604_s1 + $0xbe0] sm:$0xff]  ;;  %v462_v26 = vld [vmem:[%s10604_s1 + $0xbc8] sm:$0xff] }
  0x9a   :  { %3756 = vmatpush1.bf16.msra.mxu0 %v6424_v11  ;;  %4208 = vmatpush1.bf16.msra.mxu1 %v6426_v14  ;;  %v6458_v11 = vcombine.low %v414_v50, %v418_v52  ;;  %v6465_v14 = vcombine.high %v421_v5, %v425_v7  ;;  %v449_v50 = vld [vmem:[%s10604_s1 + $0xb60] sm:$0xff]  ;;  %v446_v52 = vld [vmem:[%s10604_s1 + $0xb48] sm:$0xff] }
  0x9b   :  { %3757 = vmatprep.subr.bf16.mxu0 %v6433_v16  ;;  %4209 = vmatprep.subr.bf16.mxu1 %v6435_v18  ;;  %v6467_v16 = vcombine.high %v422_v8, %v426_v9  ;;  %v429_v18 = vld [vmem:[%s10604_s1 + $0xac0] sm:$0xff] }
  0x9d   :  { %3695 = vmatmul.mubr.bf16.gmra.mrb[12].mxu0 %v7833_v22  ;;  %4147 = vmatmul.mubr.bf16.gmra.mrb[12].mxu1 %v7833_v22 }
  0x9e   :  { %3758 = vmatpush1.bf16.msra.mxu0 %v6432_v27  ;;  %4210 = vmatpush1.bf16.msra.mxu1 %v6434_v29  ;;  %v6464_v27 = vcombine.low %v421_v5, %v425_v7  ;;  %v6466_v29 = vcombine.low %v422_v8, %v426_v9  ;;  %v6489_v5 = vcombine.high %v445_v48, %v449_v50  ;;  %v453_v9 = vld [vmem:[%s10604_s1 + $0xb80] sm:$0xff] }
  0x9f   :  { %3759 = vmatprep.subr.bf16.mxu0 %v6441_v30  ;;  %4211 = vmatprep.subr.bf16.mxu1 %v6443_v31  ;;  %v6473_v30 = vcombine.high %v429_v18, %v433_v19  ;;  %v6475_v31 = vcombine.high %v430_v20, %v434_v23  ;;  %v6491_v7 = vcombine.high %v446_v52, %v450_v60 }
  0xa0   :  { %3704 = vmatprep.mubr.bf16.mxu0 %v7844_v34  ;;  %4156 = vmatprep.mubr.bf16.mxu1 %v7844_v34 }
  0xa2   :  { %3760 = vmatpush1.bf16.msra.mxu0 %v6440_v43  ;;  %4212 = vmatpush1.bf16.msra.mxu1 %v6442_v44  ;;  %v442_v43 = vld [vmem:[%s10604_s1 + $0xb28] sm:$0xff]  ;;  %v6472_v44 = vcombine.low %v429_v18, %v433_v19  ;;  %v6490_v18 = vcombine.low %v446_v52, %v450_v60 }
  0xa3   :  { %3761 = vmatprep.subr.bf16.mxu0 %v6449_v45  ;;  %4213 = vmatprep.subr.bf16.mxu1 %v6451_v46  ;;  %v6474_v45 = vcombine.low %v430_v20, %v434_v23  ;;  %v6481_v46 = vcombine.high %v437_v36, %v441_v37  ;;  %v6483_v47 = vcombine.high %v438_v40, %v442_v43  ;;  %v461_v23 = vld [vmem:[%s10604_s1 + $0xbc0] sm:$0xff] }
  0xa5   :  { %3705 = vmatmul.mubr.bf16.gmra.mrb[16].mxu0 %v7871_v51  ;;  %4157 = vmatmul.mubr.bf16.gmra.mrb[16].mxu1 %v7871_v51 }
  0xa6   :  { %3762 = vmatpush1.bf16.msra.mxu0 %v6448_v61  ;;  %4214 = vmatpush1.bf16.msra.mxu1 %v6450_v62  ;;  %v78_v61 = vld [vmem:[%s10605_s0 + $0x1c8] sm:$0xff] }
  0xa7   :  { %3763 = vmatprep.subr.bf16.mxu0 %v6457_v63  ;;  %4215 = vmatprep.subr.bf16.mxu1 %v6459_v1  ;;  %v82_v62 = vld [vmem:[%s10605_s0 + $0x1e8] sm:$0xff]  ;;  %v6480_v63 = vcombine.low %v437_v36, %v441_v37  ;;  %v6482_v1 = vcombine.low %v438_v40, %v442_v43  ;;  %v6505_v40 = vcombine.high %v461_v23, %v465_v24 }
  0xa8   :  { %3714 = vmatprep.mubr.bf16.mxu0 %v7882_v2  ;;  %4166 = vmatprep.mubr.bf16.mxu1 %v7882_v2  ;;  %v7958_v8 = vcombine.high %v78_v61, %v82_v62 }
  0xaa   :  { %3764 = vmatpush1.bf16.msra.mxu0 %v6456_v10  ;;  %4216 = vmatpush1.bf16.msra.mxu1 %v6458_v11  ;;  %v457_v10 = vld [vmem:[%s10604_s1 + $0xba0] sm:$0xff]  ;;  %v454_v11 = vld [vmem:[%s10604_s1 + $0xb88] sm:$0xff] }
  0xab   :  { %3765 = vmatprep.subr.bf16.mxu0 %v6465_v14  ;;  %4217 = vmatprep.subr.bf16.mxu1 %v6467_v16  ;;  %v458_v14 = vld [vmem:[%s10604_s1 + $0xba8] sm:$0xff]  ;;  %v6488_v16 = vcombine.low %v445_v48, %v449_v50  ;;  %v6497_v19 = vcombine.high %v453_v9, %v457_v10  ;;  %v6496_v36 = vcombine.low %v453_v9, %v457_v10  ;;  %v31_v9 = vld [vmem:[%s10605_s0 + $0x50] sm:$0xff] }
  0xac   :  { %v6499_v20 = vcombine.high %v454_v11, %v458_v14  ;;  %v6498_v37 = vcombine.low %v454_v11, %v458_v14  ;;  %v474_v48 = vld [vmem:[%s10604_s1 + $0xc28] sm:$0xff]  ;;  %v6504_v50 = vcombine.low %v461_v23, %v465_v24  ;;  %v35_v10 = vld [vmem:[%s10605_s0 + $0x70] sm:$0xff]  ;;  %v489_v23 = vld [vmem:[%s10604_s1 + $0xca0] sm:$0xff] }
  0xad   :  { %3715 = vmatmul.mubr.bf16.gmra.mrb[20].mxu0 %v7909_v53  ;;  %4167 = vmatmul.mubr.bf16.gmra.mrb[20].mxu1 %v7909_v53  ;;  %v486_v24 = vld [vmem:[%s10604_s1 + $0xc88] sm:$0xff] }
  0xae   :  { %3766 = vmatpush1.bf16.msra.mxu0 %v6464_v27  ;;  %4218 = vmatpush1.bf16.msra.mxu1 %v6466_v29  ;;  %v7985_v27 = vcombine.low %v78_v61, %v82_v62  ;;  %v466_v29 = vld [vmem:[%s10604_s1 + $0xbe8] sm:$0xff]  ;;  %v477_v62 = vld [vmem:[%s10604_s1 + $0xc40] sm:$0xff] }
  0xaf   :  { %3767 = vmatprep.subr.bf16.mxu0 %v6473_v30  ;;  %4219 = vmatprep.subr.bf16.mxu1 %v6475_v31  ;;  %v23_v30 = vld [vmem:[%s10605_s0 + $0x10] sm:$0xff]  ;;  %v6507_v43 = vcombine.high %v462_v26, %v466_v29  ;;  %v6506_v52 = vcombine.low %v462_v26, %v466_v29  ;;  %v490_v26 = vld [vmem:[%s10604_s1 + $0xca8] sm:$0xff] }
  0xb0   :  { %3724 = vmatprep.mubr.bf16.mxu0 %v7920_v35  ;;  %4176 = vmatprep.mubr.bf16.mxu1 %v7920_v35  ;;  %v27_v31 = vld [vmem:[%s10605_s0 + $0x30] sm:$0xff] }
  0xb2   :  { %3768 = vmatpush1.bf16.msra.mxu0 %v6472_v44  ;;  %4220 = vmatpush1.bf16.msra.mxu1 %v6474_v45  ;;  %v7996_v44 = vcombine.high %v23_v30, %v27_v31  ;;  %v469_v45 = vld [vmem:[%s10604_s1 + $0xc00] sm:$0xff] }
  0xb3   :  { %3769 = vmatprep.subr.bf16.mxu0 %v6481_v46  ;;  %4221 = vmatprep.subr.bf16.mxu1 %v6483_v47  ;;  %v473_v46 = vld [vmem:[%s10604_s1 + $0xc20] sm:$0xff]  ;;  %v470_v47 = vld [vmem:[%s10604_s1 + $0xc08] sm:$0xff] }
  0xb4   :  { %v6513_v60 = vcombine.high %v469_v45, %v473_v46  ;;  %v6515_v61 = vcombine.high %v470_v47, %v474_v48  ;;  %v6512_v11 = vcombine.low %v469_v45, %v473_v46  ;;  %v6514_v14 = vcombine.low %v470_v47, %v474_v48  ;;  %v498_v46 = vld [vmem:[%s10604_s1 + $0xce8] sm:$0xff]  ;;  %v39_v47 = vld [vmem:[%s10605_s0 + $0x90] sm:$0xff] }
  0xb5   :  { %3725 = vmatmul.mubr.bf16.gmra.mrb[24].mxu0 %v7947_v56  ;;  %4177 = vmatmul.mubr.bf16.gmra.mrb[24].mxu1 %v7947_v56  ;;  %v8061_v45 = vcombine.low %v31_v9, %v35_v10  ;;  %v43_v48 = vld [vmem:[%s10605_s0 + $0xb0] sm:$0xff] }
  0xb6   :  { %3770 = vmatpush1.bf16.msra.mxu0 %v6480_v63  ;;  %4222 = vmatpush1.bf16.msra.mxu1 %v6482_v1  ;;  %v481_v63 = vld [vmem:[%s10604_s1 + $0xc60] sm:$0xff]  ;;  %v478_v1 = vld [vmem:[%s10604_s1 + $0xc48] sm:$0xff] }
  0xb7   :  { %3771 = vmatprep.subr.bf16.mxu0 %v6489_v5  ;;  %4223 = vmatprep.subr.bf16.mxu1 %v6491_v7  ;;  %v8022_v5 = vcombine.low %v23_v30, %v27_v31  ;;  %v482_v7 = vld [vmem:[%s10604_s1 + $0xc68] sm:$0xff]  ;;  %v6520_v29 = vcombine.low %v477_v62, %v481_v63 }
  0xb8   :  { %3734 = vmatprep.mubr.bf16.mxu0 %v7958_v8  ;;  %4186 = vmatprep.mubr.bf16.mxu1 %v7958_v8  ;;  %v6522_v30 = vcombine.low %v478_v1, %v482_v7 }
  0xba   :  { %3772 = vmatpush1.bf16.msra.mxu0 %v6488_v16  ;;  %4224 = vmatpush1.bf16.msra.mxu1 %v6490_v18  ;;  %v6521_v16 = vcombine.high %v477_v62, %v481_v63  ;;  %v6523_v18 = vcombine.high %v478_v1, %v482_v7  ;;  %v8072_v62 = vcombine.high %v39_v47, %v43_v48  ;;  %v501_v63 = vld [vmem:[%s10604_s1 + $0xd00] sm:$0xff]  ;;  %v502_v7 = vld [vmem:[%s10604_s1 + $0xd08] sm:$0xff] }
  0xbb   :  { %3773 = vmatprep.subr.bf16.mxu0 %v6497_v19  ;;  %4225 = vmatprep.subr.bf16.mxu1 %v6499_v20  ;;  %v8034_v19 = vcombine.high %v31_v9, %v35_v10  ;;  %v485_v20 = vld [vmem:[%s10604_s1 + $0xc80] sm:$0xff]  ;;  %v506_v9 = vld [vmem:[%s10604_s1 + $0xd28] sm:$0xff] }
  0xbc   :  { %v6529_v31 = vcombine.high %v485_v20, %v489_v23  ;;  %v505_v1 = vld [vmem:[%s10604_s1 + $0xd20] sm:$0xff] }
  0xbd   :  { %3735 = vmatmul.mubr.bf16.gmra.mrb[28].mxu0 %v7985_v27  ;;  %4187 = vmatmul.mubr.bf16.gmra.mrb[28].mxu1 %v7985_v27 }
  0xbe   :  { %3774 = vmatpush1.bf16.msra.mxu0 %v6496_v36  ;;  %4226 = vmatpush1.bf16.msra.mxu1 %v6498_v37  ;;  %v6531_v36 = vcombine.high %v486_v24, %v490_v26  ;;  %v493_v37 = vld [vmem:[%s10604_s1 + $0xcc0] sm:$0xff] }
  0xbf   :  { %3775 = vmatprep.subr.bf16.mxu0 %v6505_v40  ;;  %4227 = vmatprep.subr.bf16.mxu1 %v6507_v43  ;;  %v497_v40 = vld [vmem:[%s10604_s1 + $0xce0] sm:$0xff]  ;;  %v494_v43 = vld [vmem:[%s10604_s1 + $0xcc8] sm:$0xff] }
  0xc0   :  { %3777 = vmatprep.mubr.bf16.mxu0 %v7996_v44  ;;  %4229 = vmatprep.mubr.bf16.mxu1 %v7996_v44  ;;  %v6536_v10 = vcombine.low %v493_v37, %v497_v40 }
  0xc2   :  { %3776 = vmatpush1.bf16.msra.mxu0 %v6504_v50  ;;  %4228 = vmatpush1.bf16.msra.mxu1 %v6506_v52  ;;  %v6528_v50 = vcombine.low %v485_v20, %v489_v23  ;;  %v6530_v52 = vcombine.low %v486_v24, %v490_v26  ;;  %v513_v20 = vld [vmem:[%s10604_s1 + $0xd60] sm:$0xff]  ;;  %v510_v23 = vld [vmem:[%s10604_s1 + $0xd48] sm:$0xff]  ;;  %v8099_v24 = vcombine.low %v39_v47, %v43_v48 }
  0xc3   :  { %3858 = vmatprep.subr.bf16.mxu0 %v6513_v60  ;;  %4310 = vmatprep.subr.bf16.mxu1 %v6515_v61  ;;  %v6537_v60 = vcombine.high %v493_v37, %v497_v40  ;;  %v6539_v61 = vcombine.high %v494_v43, %v498_v46  ;;  %v514_v26 = vld [vmem:[%s10604_s1 + $0xd68] sm:$0xff]  ;;  %v521_v47 = vld [vmem:[%s10604_s1 + $0xda0] sm:$0xff] }
  0xc4   :  { %v6555_v40 = vcombine.high %v510_v23, %v514_v26  ;;  %v518_v48 = vld [vmem:[%s10604_s1 + $0xd88] sm:$0xff] }
  0xc5   :  { %3778 = vmatmul.mubr.bf16.vlgmr.msra.gmra.mrb[0].mxu0 %v8022_v5  ;;  %4230 = vmatmul.mubr.bf16.vlgmr.msra.gmra.mrb[0].mxu1 %v8022_v5 }
  0xc6   :  { %3859 = vmatpush1.bf16.msra.mxu0 %v6512_v11  ;;  %4311 = vmatpush1.bf16.msra.mxu1 %v6514_v14  ;;  %v6538_v11 = vcombine.low %v494_v43, %v498_v46  ;;  %v6545_v14 = vcombine.high %v501_v63, %v505_v1  ;;  %v517_v46 = vld [vmem:[%s10604_s1 + $0xd80] sm:$0xff] }
  0xc7   :  { %3860 = vmatprep.subr.bf16.mxu0 %v6521_v16  ;;  %4312 = vmatprep.subr.bf16.mxu1 %v6523_v18  ;;  %v6547_v16 = vcombine.high %v502_v7, %v506_v9  ;;  %v509_v18 = vld [vmem:[%s10604_s1 + $0xd40] sm:$0xff] }
  0xc8   :  { %3787 = vmatprep.mubr.bf16.mxu0 %v8034_v19  ;;  %4239 = vmatprep.mubr.bf16.mxu1 %v8034_v19  ;;  %v6553_v37 = vcombine.high %v509_v18, %v513_v20 }
  0xca   :  { %3861 = vmatpush1.bf16.msra.mxu0 %v6520_v29  ;;  %4313 = vmatpush1.bf16.msra.mxu1 %v6522_v30  ;;  %v47_v29 = vld [vmem:[%s10605_s0 + $0xd0] sm:$0xff] }
  0xcb   :  { %3862 = vmatprep.subr.bf16.mxu0 %v6529_v31  ;;  %4314 = vmatprep.subr.bf16.mxu1 %v6531_v36  ;;  %v51_v30 = vld [vmem:[%s10605_s0 + $0xf0] sm:$0xff]  ;;  %v6544_v31 = vcombine.low %v501_v63, %v505_v1  ;;  %v6546_v36 = vcombine.low %v502_v7, %v506_v9  ;;  %v525_v1 = vld [vmem:[%s10604_s1 + $0xdc0] sm:$0xff]  ;;  %v526_v9 = vld [vmem:[%s10604_s1 + $0xdc8] sm:$0xff] }
  0xcc   :  { %v8110_v43 = vcombine.high %v47_v29, %v51_v30  ;;  %v529_v7 = vld [vmem:[%s10604_s1 + $0xde0] sm:$0xff] }
  0xcd   :  { %3788 = vmatmul.mubr.bf16.gmra.mrb[4].mxu0 %v8061_v45  ;;  %4240 = vmatmul.mubr.bf16.gmra.mrb[4].mxu1 %v8061_v45 }
  0xce   :  { %3863 = vmatpush1.bf16.msra.mxu0 %v6528_v50  ;;  %4315 = vmatpush1.bf16.msra.mxu1 %v6530_v52  ;;  %v522_v50 = vld [vmem:[%s10604_s1 + $0xda8] sm:$0xff]  ;;  %v6552_v52 = vcombine.low %v509_v18, %v513_v20  ;;  %v6560_v18 = vcombine.low %v517_v46, %v521_v47 }
  0xcf   :  { %3864 = vmatprep.subr.bf16.mxu0 %v6537_v60  ;;  %4316 = vmatprep.subr.bf16.mxu1 %v6539_v61  ;;  %v6554_v60 = vcombine.low %v510_v23, %v514_v26  ;;  %v6561_v61 = vcombine.high %v517_v46, %v521_v47  ;;  %v6563_v63 = vcombine.high %v518_v48, %v522_v50 }
  0xd0   :  { %3797 = vmatprep.mubr.bf16.mxu0 %v8072_v62  ;;  %4249 = vmatprep.mubr.bf16.mxu1 %v8072_v62  ;;  %v6562_v20 = vcombine.low %v518_v48, %v522_v50  ;;  %v6569_v23 = vcombine.high %v525_v1, %v529_v7  ;;  %v541_v50 = vld [vmem:[%s10604_s1 + $0xe40] sm:$0xff] }
  0xd2   :  { %3865 = vmatpush1.bf16.msra.mxu0 %v6536_v10  ;;  %4317 = vmatpush1.bf16.msra.mxu1 %v6538_v11  ;;  %v8137_v10 = vcombine.low %v47_v29, %v51_v30  ;;  %v530_v11 = vld [vmem:[%s10604_s1 + $0xde8] sm:$0xff]  ;;  %v533_v30 = vld [vmem:[%s10604_s1 + $0xe00] sm:$0xff] }
  0xd3   :  { %3866 = vmatprep.subr.bf16.mxu0 %v6545_v14  ;;  %4318 = vmatprep.subr.bf16.mxu1 %v6547_v16  ;;  %v55_v14 = vld [vmem:[%s10605_s0 + $0x110] sm:$0xff]  ;;  %v6571_v26 = vcombine.high %v526_v9, %v530_v11  ;;  %v6570_v46 = vcombine.low %v526_v9, %v530_v11 }
  0xd4   :  { %v59_v16 = vld [vmem:[%s10605_s0 + $0x130] sm:$0xff] }
  0xd5   :  { %3798 = vmatmul.mubr.bf16.gmra.mrb[8].mxu0 %v8099_v24  ;;  %4250 = vmatmul.mubr.bf16.gmra.mrb[8].mxu1 %v8099_v24  ;;  %v8148_v29 = vcombine.high %v55_v14, %v59_v16 }
  0xd6   :  { %3867 = vmatpush1.bf16.msra.mxu0 %v6544_v31  ;;  %4319 = vmatpush1.bf16.msra.mxu1 %v6546_v36  ;;  %v537_v31 = vld [vmem:[%s10604_s1 + $0xe20] sm:$0xff]  ;;  %v534_v36 = vld [vmem:[%s10604_s1 + $0xe08] sm:$0xff] }
  0xd7   :  { %3868 = vmatprep.subr.bf16.mxu0 %v6553_v37  ;;  %4320 = vmatprep.subr.bf16.mxu1 %v6555_v40  ;;  %v538_v37 = vld [vmem:[%s10604_s1 + $0xe28] sm:$0xff]  ;;  %v6568_v40 = vcombine.low %v525_v1, %v529_v7  ;;  %v6577_v47 = vcombine.high %v533_v30, %v537_v31  ;;  %v63_v1 = vld [vmem:[%s10605_s0 + $0x150] sm:$0xff]  ;;  %v6576_v9 = vcombine.low %v533_v30, %v537_v31 }
  0xd8   :  { %3807 = vmatprep.mubr.bf16.mxu0 %v8110_v43  ;;  %4259 = vmatprep.mubr.bf16.mxu1 %v8110_v43  ;;  %v6579_v48 = vcombine.high %v534_v36, %v538_v37  ;;  %v67_v7 = vld [vmem:[%s10605_s0 + $0x170] sm:$0xff]  ;;  %v6578_v11 = vcombine.low %v534_v36, %v538_v37  ;;  %v554_v30 = vld [vmem:[%s10604_s1 + $0xea8] sm:$0xff] }
  0xda   :  { %3869 = vmatpush1.bf16.msra.mxu0 %v6552_v52  ;;  %4321 = vmatpush1.bf16.msra.mxu1 %v6554_v60  ;;  %v545_v52 = vld [vmem:[%s10604_s1 + $0xe60] sm:$0xff]  ;;  %v542_v60 = vld [vmem:[%s10604_s1 + $0xe48] sm:$0xff] }
  0xdb   :  { %3870 = vmatprep.subr.bf16.mxu0 %v6561_v61  ;;  %4322 = vmatprep.subr.bf16.mxu1 %v6563_v63  ;;  %v8175_v61 = vcombine.low %v55_v14, %v59_v16  ;;  %v546_v63 = vld [vmem:[%s10604_s1 + $0xe68] sm:$0xff]  ;;  %v8186_v16 = vcombine.high %v63_v1, %v67_v7  ;;  %v6584_v31 = vcombine.low %v541_v50, %v545_v52 }
  0xdc   :  { %v6587_v14 = vcombine.high %v542_v60, %v546_v63  ;;  %v6586_v36 = vcombine.low %v542_v60, %v546_v63  ;;  %v71_v60 = vld [vmem:[%s10605_s0 + $0x190] sm:$0xff] }
  0xdd   :  { %3808 = vmatmul.mubr.bf16.gmra.mrb[12].mxu0 %v8137_v10  ;;  %4260 = vmatmul.mubr.bf16.gmra.mrb[12].mxu1 %v8137_v10  ;;  %10668 = vst [vmem:[#allocation3_spill] sm:$0xff] %v8186_v16  ;;  %v75_v63 = vld [vmem:[%s10605_s0 + $0x1b0] sm:$0xff] }
  0xde   :  { %3871 = vmatpush1.bf16.msra.mxu0 %v6560_v18  ;;  %4323 = vmatpush1.bf16.msra.mxu1 %v6562_v20  ;;  %v6585_v18 = vcombine.high %v541_v50, %v545_v52  ;;  %v549_v20 = vld [vmem:[%s10604_s1 + $0xe80] sm:$0xff]  ;;  %v8213_v50 = vcombine.low %v63_v1, %v67_v7  ;;  %v562_v52 = vld [vmem:[%s10604_s1 + $0xee8] sm:$0xff]  ;;  %v8224_v7 = vcombine.high %v71_v60, %v75_v63 }
  0xdf   :  { %3872 = vmatprep.subr.bf16.mxu0 %v6569_v23  ;;  %4324 = vmatprep.subr.bf16.mxu1 %v6571_v26  ;;  %v553_v23 = vld [vmem:[%s10604_s1 + $0xea0] sm:$0xff]  ;;  %v550_v26 = vld [vmem:[%s10604_s1 + $0xe88] sm:$0xff] }
  0xe0   :  { %3817 = vmatprep.mubr.bf16.mxu0 %v8148_v29  ;;  %4269 = vmatprep.mubr.bf16.mxu1 %v8148_v29  ;;  %v6593_v37 = vcombine.high %v549_v20, %v553_v23  ;;  %10669 = vst [vmem:[#allocation4_spill] sm:$0xff] %v8213_v50  ;;  %10670 = vst [vmem:[#allocation5_spill] sm:$0xff] %v8224_v7 }
  0xe2   :  { %3873 = vmatpush1.bf16.msra.mxu0 %v6568_v40  ;;  %4325 = vmatpush1.bf16.msra.mxu1 %v6570_v46  ;;  %v6595_v40 = vcombine.high %v550_v26, %v554_v30  ;;  %v557_v46 = vld [vmem:[%s10604_s1 + $0xec0] sm:$0xff] }
  0xe3   :  { %3874 = vmatprep.subr.bf16.mxu0 %v6577_v47  ;;  %4326 = vmatprep.subr.bf16.mxu1 %v6579_v48  ;;  %v561_v47 = vld [vmem:[%s10604_s1 + $0xee0] sm:$0xff]  ;;  %v558_v48 = vld [vmem:[%s10604_s1 + $0xec8] sm:$0xff] }
  0xe4   :  { %v6603_v1 = vcombine.high %v558_v48, %v562_v52 }
  0xe5   :  { %3818 = vmatmul.mubr.bf16.gmra.mrb[16].mxu0 %v8175_v61  ;;  %4270 = vmatmul.mubr.bf16.gmra.mrb[16].mxu1 %v8175_v61 }
  0xe6   :  { %3875 = vmatpush1.bf16.msra.mxu0 %v6576_v9  ;;  %4327 = vmatpush1.bf16.msra.mxu1 %v6578_v11  ;;  %v6592_v9 = vcombine.low %v549_v20, %v553_v23  ;;  %v6594_v11 = vcombine.low %v550_v26, %v554_v30  ;;  %v566_v20 = vld [vmem:[%s10604_s1 + $0xf08] sm:$0xff]  ;;  %v6600_v26 = vcombine.low %v557_v46, %v561_v47 }
  0xe7   :  { %3876 = vmatprep.subr.bf16.mxu0 %v6585_v18  ;;  %4328 = vmatprep.subr.bf16.mxu1 %v6587_v14  ;;  %v6601_v18 = vcombine.high %v557_v46, %v561_v47  ;;  %v565_v14 = vld [vmem:[%s10604_s1 + $0xf00] sm:$0xff]  ;;  %v570_v23 = vld [vmem:[%s10604_s1 + $0xf28] sm:$0xff]  ;;  %v6602_v30 = vcombine.low %v558_v48, %v562_v52  ;;  %v8251_v47 = vcombine.low %v71_v60, %v75_v63  ;;  %v79_v52 = vld [vmem:[%s10605_s0 + $0x1d0] sm:$0xff] }
  0xe8   :  { %3827 = vmatprep.mubr.bf16.mxu0 %v8186_v16  ;;  %4279 = vmatprep.mubr.bf16.mxu1 %v8186_v16  ;;  %v569_v16 = vld [vmem:[%s10604_s1 + $0xf20] sm:$0xff]  ;;  %v574_v46 = vld [vmem:[%s10604_s1 + $0xf48] sm:$0xff] }
  0xe9   :  { %10671 = vst [vmem:[#allocation6_spill] sm:$0xff] %v8251_v47  ;;  %v578_v48 = vld [vmem:[%s10604_s1 + $0xf68] sm:$0xff] }
  0xea   :  { %3877 = vmatpush1.bf16.msra.mxu0 %v6584_v31  ;;  %4329 = vmatpush1.bf16.msra.mxu1 %v6586_v36  ;;  %v6609_v31 = vcombine.high %v565_v14, %v569_v16  ;;  %v6611_v36 = vcombine.high %v566_v20, %v570_v23  ;;  %v6619_v60 = vcombine.high %v574_v46, %v578_v48 }
  0xeb   :  { %3878 = vmatprep.subr.bf16.mxu0 %v6593_v37  ;;  %4330 = vmatprep.subr.bf16.mxu1 %v6595_v40  ;;  %v573_v37 = vld [vmem:[%s10604_s1 + $0xf40] sm:$0xff] }
  0xec   :  { %v577_v40 = vld [vmem:[%s10604_s1 + $0xf60] sm:$0xff] }
  0xed   :  { %3828 = vmatmul.mubr.bf16.gmra.mrb[20].mxu0 %v8213_v50  ;;  %4280 = vmatmul.mubr.bf16.gmra.mrb[20].mxu1 %v8213_v50  ;;  %v585_v50 = vld [vmem:[%s10604_s1 + $0xfa0] sm:$0xff] }
  0xee   :  { %3879 = vmatpush1.bf16.msra.mxu0 %v6592_v9  ;;  %4331 = vmatpush1.bf16.msra.mxu1 %v6594_v11  ;;  %v83_v9 = vld [vmem:[%s10605_s0 + $0x1f0] sm:$0xff]  ;;  %v6608_v11 = vcombine.low %v565_v14, %v569_v16  ;;  %v582_v16 = vld [vmem:[%s10604_s1 + $0xf88] sm:$0xff] }
  0xef   :  { %3880 = vmatprep.subr.bf16.mxu0 %v6601_v18  ;;  %4332 = vmatprep.subr.bf16.mxu1 %v6603_v1  ;;  %v6610_v18 = vcombine.low %v566_v20, %v570_v23  ;;  %v6617_v1 = vcombine.high %v573_v37, %v577_v40  ;;  %v8262_v63 = vcombine.high %v79_v52, %v83_v9  ;;  %v586_v14 = vld [vmem:[%s10604_s1 + $0xfa8] sm:$0xff] }
  0xf0   :  { %3837 = vmatprep.mubr.bf16.mxu0 %v8224_v7  ;;  %4289 = vmatprep.mubr.bf16.mxu1 %v8224_v7  ;;  %v581_v7 = vld [vmem:[%s10604_s1 + $0xf80] sm:$0xff]  ;;  %v6616_v20 = vcombine.low %v573_v37, %v577_v40  ;;  %v6618_v23 = vcombine.low %v574_v46, %v578_v48  ;;  %v590_v37 = vld [vmem:[%s10604_s1 + $0xfc8] sm:$0xff]  ;;  %v8289_v40 = vcombine.low %v79_v52, %v83_v9  ;;  %v24_v48 = vld [vmem:[%s10605_s0 + $0x18] sm:$0xff] }
  0xf1   :  { %10672 = vst [vmem:[#allocation7_spill] sm:$0xff] %v8262_v63  ;;  %v594_v46 = vld [vmem:[%s10604_s1 + $0xfe8] sm:$0xff] }
  0xf2   :  { %3881 = vmatpush1.bf16.msra.mxu0 %v6600_v26  ;;  %4333 = vmatpush1.bf16.msra.mxu1 %v6602_v30  ;;  %v6625_v26 = vcombine.high %v581_v7, %v585_v50  ;;  %v6627_v30 = vcombine.high %v582_v16, %v586_v14  ;;  %10673 = vst [vmem:[#allocation8_spill] sm:$0xff] %v8289_v40 }
  0xf3   :  { %3882 = vmatprep.subr.bf16.mxu0 %v6609_v31  ;;  %4334 = vmatprep.subr.bf16.mxu1 %v6611_v36  ;;  %v589_v31 = vld [vmem:[%s10604_s1 + $0xfc0] sm:$0xff]  ;;  %v6635_v52 = vcombine.high %v590_v37, %v594_v46 }
  0xf4   :  { %v593_v36 = vld [vmem:[%s10604_s1 + $0xfe0] sm:$0xff] }
  0xf5   :  { %3838 = vmatmul.mubr.bf16.gmra.mrb[24].mxu0 %v8251_v47  ;;  %4290 = vmatmul.mubr.bf16.gmra.mrb[24].mxu1 %v8251_v47  ;;  %v91_v47 = vld [vmem:[%s10604_s1 + $0x30] sm:$0xff] }
  0xf6   :  { %3883 = vmatpush1.bf16.msra.mxu0 %v6608_v11  ;;  %4335 = vmatpush1.bf16.msra.mxu1 %v6610_v18  ;;  %v28_v11 = vld [vmem:[%s10605_s0 + $0x38] sm:$0xff]  ;;  %v6624_v18 = vcombine.low %v581_v7, %v585_v50 }
  0xf7   :  { %3884 = vmatprep.subr.bf16.mxu0 %v6617_v1  ;;  %4336 = vmatprep.subr.bf16.mxu1 %v6619_v60  ;;  %v6626_v1 = vcombine.low %v582_v16, %v586_v14  ;;  %v6633_v60 = vcombine.high %v589_v31, %v593_v36  ;;  %v8300_v9 = vcombine.high %v24_v48, %v28_v11  ;;  %v88_v50 = vld [vmem:[%s10604_s1 + $0x18] sm:$0xff] }
  0xf8   :  { %3847 = vmatprep.mubr.bf16.mxu0 %v8262_v63  ;;  %4299 = vmatprep.mubr.bf16.mxu1 %v8262_v63  ;;  %v87_v63 = vld [vmem:[%s10604_s1 + $0x10] sm:$0xff]  ;;  %v92_v7 = vld [vmem:[%s10604_s1 + $0x38] sm:$0xff]  ;;  %v6632_v16 = vcombine.low %v589_v31, %v593_v36  ;;  %v6634_v14 = vcombine.low %v590_v37, %v594_v46  ;;  %v8326_v36 = vcombine.low %v24_v48, %v28_v11 }
  0xf9   :  { %10674 = vst [vmem:[#allocation9_spill] sm:$0xff] %v8300_v9  ;;  %v96_v31 = vld [vmem:[%s10604_s1 + $0x58] sm:$0xff]  ;;  %v6134_v48 = vcombine.low %v88_v50, %v92_v7 }
  0xfa   :  { %3885 = vmatpush1.bf16.msra.mxu0 %v6616_v20  ;;  %4337 = vmatpush1.bf16.msra.mxu1 %v6618_v23  ;;  %v6133_v20 = vcombine.high %v87_v63, %v91_v47  ;;  %v6135_v23 = vcombine.high %v88_v50, %v92_v7  ;;  %10675 = vst [vmem:[#allocation10_spill] sm:$0xff] %v8326_v36  ;;  %v100_v37 = vld [vmem:[%s10604_s1 + $0x78] sm:$0xff] }
  0xfb   :  { %3886 = vmatprep.subr.bf16.mxu0 %v6625_v26  ;;  %4338 = vmatprep.subr.bf16.mxu1 %v6627_v30  ;;  %v95_v26 = vld [vmem:[%s10604_s1 + $0x50] sm:$0xff]  ;;  %v32_v46 = vld [vmem:[%s10605_s0 + $0x58] sm:$0xff]  ;;  %v6142_v7 = vcombine.low %v96_v31, %v100_v37 }
  0xfc   :  { %v99_v30 = vld [vmem:[%s10604_s1 + $0x70] sm:$0xff] }
  0xfd   :  { %3848 = vmatmul.mubr.bf16.gmra.mrb[28].mxu0 %v8289_v40  ;;  %4300 = vmatmul.mubr.bf16.gmra.mrb[28].mxu1 %v8289_v40  ;;  %v6141_v11 = vcombine.high %v95_v26, %v99_v30  ;;  %v107_v40 = vld [vmem:[%s10604_s1 + $0xb0] sm:$0xff]  ;;  %v6140_v50 = vcombine.low %v95_v26, %v99_v30  ;;  %v112_v26 = vld [vmem:[%s10604_s1 + $0xd8] sm:$0xff] }
  0xfe   :  { %3887 = vmatpush1.bf16.msra.mxu0 %v6624_v18  ;;  %4339 = vmatpush1.bf16.msra.mxu1 %v6626_v1  ;;  %v36_v18 = vld [vmem:[%s10605_s0 + $0x78] sm:$0xff]  ;;  %v6132_v1 = vcombine.low %v87_v63, %v91_v47 }
  0xff   :  { %3888 = vmatprep.subr.bf16.mxu0 %v6633_v60  ;;  %4340 = vmatprep.subr.bf16.mxu1 %v6635_v52  ;;  %v6143_v60 = vcombine.high %v96_v31, %v100_v37  ;;  %v8338_v52 = vcombine.high %v32_v46, %v36_v18  ;;  %v104_v47 = vld [vmem:[%s10604_s1 + $0x98] sm:$0xff]  ;;  %v8365_v30 = vcombine.low %v32_v46, %v36_v18 }
 0x100   :  { %3890 = vmatprep.mubr.bf16.mxu0 %v8300_v9  ;;  %4342 = vmatprep.mubr.bf16.mxu1 %v8300_v9  ;;  %v103_v9 = vld [vmem:[%s10604_s1 + $0x90] sm:$0xff]  ;;  %v108_v63 = vld [vmem:[%s10604_s1 + $0xb8] sm:$0xff] }
 0x101   :  { %10676 = vst [vmem:[#allocation11_spill] sm:$0xff] %v8338_v52  ;;  %10677 = vst [vmem:[#allocation12_spill] sm:$0xff] %v8365_v30  ;;  %v116_v31 = vld [vmem:[%s10604_s1 + $0xf8] sm:$0xff] }
 0x102   :  { %3889 = vmatpush1.bf16.msra.mxu0 %v6632_v16  ;;  %4341 = vmatpush1.bf16.msra.mxu1 %v6634_v14  ;;  %v6149_v16 = vcombine.high %v103_v9, %v107_v40  ;;  %v6151_v14 = vcombine.high %v104_v47, %v108_v63  ;;  %v40_v37 = vld [vmem:[%s10605_s0 + $0x98] sm:$0xff]  ;;  %v6159_v46 = vcombine.high %v112_v26, %v116_v31 }
 0x103   :  { %4423 = vmatprep.subr.bf16.mxu0 %v6133_v20  ;;  %4875 = vmatprep.subr.bf16.mxu1 %v6135_v23  ;;  %v111_v20 = vld [vmem:[%s10604_s1 + $0xd0] sm:$0xff] }
 0x104   :  { %v115_v23 = vld [vmem:[%s10604_s1 + $0xf0] sm:$0xff] }
 0x105   :  { %3891 = vmatmul.mubr.bf16.vlgmr.msra.gmra.mrb[0].mxu0 %v8326_v36  ;;  %4343 = vmatmul.mubr.bf16.vlgmr.msra.gmra.mrb[0].mxu1 %v8326_v36  ;;  %v123_v36 = vld [vmem:[%s10604_s1 + $0x130] sm:$0xff] }
 0x106   :  { %4424 = vmatpush1.bf16.msra.mxu0 %v6132_v1  ;;  %4876 = vmatpush1.bf16.msra.mxu1 %v6134_v48  ;;  %v44_v1 = vld [vmem:[%s10605_s0 + $0xb8] sm:$0xff]  ;;  %v6148_v48 = vcombine.low %v103_v9, %v107_v40 }
 0x107   :  { %4425 = vmatprep.subr.bf16.mxu0 %v6141_v11  ;;  %4877 = vmatprep.subr.bf16.mxu1 %v6143_v60  ;;  %v6150_v11 = vcombine.low %v104_v47, %v108_v63  ;;  %v6157_v60 = vcombine.high %v111_v20, %v115_v23  ;;  %v8376_v18 = vcombine.high %v40_v37, %v44_v1  ;;  %v120_v40 = vld [vmem:[%s10604_s1 + $0x118] sm:$0xff] }
 0x108   :  { %3900 = vmatprep.mubr.bf16.mxu0 %v8338_v52  ;;  %4352 = vmatprep.mubr.bf16.mxu1 %v8338_v52  ;;  %v119_v52 = vld [vmem:[%s10604_s1 + $0x110] sm:$0xff]  ;;  %v124_v9 = vld [vmem:[%s10604_s1 + $0x138] sm:$0xff]  ;;  %v6156_v47 = vcombine.low %v111_v20, %v115_v23  ;;  %v6158_v63 = vcombine.low %v112_v26, %v116_v31  ;;  %v8403_v23 = vcombine.low %v40_v37, %v44_v1 }
 0x109   :  { %10678 = vst [vmem:[#allocation13_spill] sm:$0xff] %v8376_v18  ;;  %v128_v20 = vld [vmem:[%s10604_s1 + $0x158] sm:$0xff] }
 0x10a   :  { %4426 = vmatpush1.bf16.msra.mxu0 %v6140_v50  ;;  %4878 = vmatpush1.bf16.msra.mxu1 %v6142_v7  ;;  %v6165_v50 = vcombine.high %v119_v52, %v123_v36  ;;  %v6167_v7 = vcombine.high %v120_v40, %v124_v9  ;;  %10679 = vst [vmem:[#allocation14_spill] sm:$0xff] %v8403_v23  ;;  %v132_v26 = vld [vmem:[%s10604_s1 + $0x178] sm:$0xff] }
 0x10b   :  { %4427 = vmatprep.subr.bf16.mxu0 %v6149_v16  ;;  %4879 = vmatprep.subr.bf16.mxu1 %v6151_v14  ;;  %v127_v16 = vld [vmem:[%s10604_s1 + $0x150] sm:$0xff]  ;;  %v48_v31 = vld [vmem:[%s10605_s0 + $0xd8] sm:$0xff]  ;;  %v6175_v37 = vcombine.high %v128_v20, %v132_v26 }
 0x10c   :  { %v131_v14 = vld [vmem:[%s10604_s1 + $0x170] sm:$0xff] }
 0x10d   :  { %3901 = vmatmul.mubr.bf16.gmra.mrb[4].mxu0 %v8365_v30  ;;  %4353 = vmatmul.mubr.bf16.gmra.mrb[4].mxu1 %v8365_v30  ;;  %v139_v30 = vld [vmem:[%s10604_s1 + $0x1b0] sm:$0xff] }
 0x10e   :  { %4428 = vmatpush1.bf16.msra.mxu0 %v6148_v48  ;;  %4880 = vmatpush1.bf16.msra.mxu1 %v6150_v11  ;;  %v52_v48 = vld [vmem:[%s10605_s0 + $0xf8] sm:$0xff]  ;;  %v6164_v11 = vcombine.low %v119_v52, %v123_v36 }
 0x10f   :  { %4429 = vmatprep.subr.bf16.mxu0 %v6157_v60  ;;  %4881 = vmatprep.subr.bf16.mxu1 %v6159_v46  ;;  %v6166_v60 = vcombine.low %v120_v40, %v124_v9  ;;  %v6173_v46 = vcombine.high %v127_v16, %v131_v14  ;;  %v8414_v1 = vcombine.high %v48_v31, %v52_v48  ;;  %v136_v36 = vld [vmem:[%s10604_s1 + $0x198] sm:$0xff] }
 0x110   :  { %3910 = vmatprep.mubr.bf16.mxu0 %v8376_v18  ;;  %4362 = vmatprep.mubr.bf16.mxu1 %v8376_v18  ;;  %v135_v18 = vld [vmem:[%s10604_s1 + $0x190] sm:$0xff]  ;;  %v140_v52 = vld [vmem:[%s10604_s1 + $0x1b8] sm:$0xff]  ;;  %v6172_v40 = vcombine.low %v127_v16, %v131_v14  ;;  %v6174_v9 = vcombine.low %v128_v20, %v132_v26  ;;  %v8441_v14 = vcombine.low %v48_v31, %v52_v48 }
 0x111   :  { %10680 = vst [vmem:[#allocation15_spill] sm:$0xff] %v8414_v1  ;;  %v144_v16 = vld [vmem:[%s10604_s1 + $0x1d8] sm:$0xff] }
 0x112   :  { %4430 = vmatpush1.bf16.msra.mxu0 %v6156_v47  ;;  %4882 = vmatpush1.bf16.msra.mxu1 %v6158_v63  ;;  %v6181_v47 = vcombine.high %v135_v18, %v139_v30  ;;  %v6183_v63 = vcombine.high %v136_v36, %v140_v52  ;;  %10681 = vst [vmem:[#allocation16_spill] sm:$0xff] %v8441_v14  ;;  %v148_v20 = vld [vmem:[%s10604_s1 + $0x1f8] sm:$0xff] }
 0x113   :  { %4431 = vmatprep.subr.bf16.mxu0 %v6165_v50  ;;  %4883 = vmatprep.subr.bf16.mxu1 %v6167_v7  ;;  %v143_v50 = vld [vmem:[%s10604_s1 + $0x1d0] sm:$0xff]  ;;  %v56_v26 = vld [vmem:[%s10605_s0 + $0x118] sm:$0xff]  ;;  %v6191_v31 = vcombine.high %v144_v16, %v148_v20 }
 0x114   :  { %v147_v7 = vld [vmem:[%s10604_s1 + $0x1f0] sm:$0xff] }
 0x115   :  { %3911 = vmatmul.mubr.bf16.gmra.mrb[8].mxu0 %v8403_v23  ;;  %4363 = vmatmul.mubr.bf16.gmra.mrb[8].mxu1 %v8403_v23  ;;  %v155_v23 = vld [vmem:[%s10604_s1 + $0x230] sm:$0xff] }
 0x116   :  { %4432 = vmatpush1.bf16.msra.mxu0 %v6164_v11  ;;  %4884 = vmatpush1.bf16.msra.mxu1 %v6166_v60  ;;  %v60_v11 = vld [vmem:[%s10605_s0 + $0x138] sm:$0xff]  ;;  %v6180_v60 = vcombine.low %v135_v18, %v139_v30 }
 0x117   :  { %4433 = vmatprep.subr.bf16.mxu0 %v6173_v46  ;;  %4885 = vmatprep.subr.bf16.mxu1 %v6175_v37  ;;  %v6182_v46 = vcombine.low %v136_v36, %v140_v52  ;;  %v6189_v37 = vcombine.high %v143_v50, %v147_v7  ;;  %v8452_v48 = vcombine.high %v56_v26, %v60_v11  ;;  %v152_v30 = vld [vmem:[%s10604_s1 + $0x218] sm:$0xff] }
 0x118   :  { %3920 = vmatprep.mubr.bf16.mxu0 %v8414_v1  ;;  %4372 = vmatprep.mubr.bf16.mxu1 %v8414_v1  ;;  %v151_v1 = vld [vmem:[%s10604_s1 + $0x210] sm:$0xff]  ;;  %v156_v18 = vld [vmem:[%s10604_s1 + $0x238] sm:$0xff]  ;;  %v6188_v36 = vcombine.low %v143_v50, %v147_v7  ;;  %v6190_v52 = vcombine.low %v144_v16, %v148_v20  ;;  %v8479_v7 = vcombine.low %v56_v26, %v60_v11 }
 0x119   :  { %10682 = vst [vmem:[#allocation17_spill] sm:$0xff] %v8452_v48  ;;  %v160_v50 = vld [vmem:[%s10604_s1 + $0x258] sm:$0xff] }
 0x11a   :  { %4434 = vmatpush1.bf16.msra.mxu0 %v6172_v40  ;;  %4886 = vmatpush1.bf16.msra.mxu1 %v6174_v9  ;;  %v6197_v40 = vcombine.high %v151_v1, %v155_v23  ;;  %v6199_v9 = vcombine.high %v152_v30, %v156_v18  ;;  %10683 = vst [vmem:[#allocation18_spill] sm:$0xff] %v8479_v7  ;;  %v164_v16 = vld [vmem:[%s10604_s1 + $0x278] sm:$0xff] }
 0x11b   :  { %4435 = vmatprep.subr.bf16.mxu0 %v6181_v47  ;;  %4887 = vmatprep.subr.bf16.mxu1 %v6183_v63  ;;  %v159_v47 = vld [vmem:[%s10604_s1 + $0x250] sm:$0xff]  ;;  %v64_v20 = vld [vmem:[%s10605_s0 + $0x158] sm:$0xff]  ;;  %v6207_v26 = vcombine.high %v160_v50, %v164_v16 }
 0x11c   :  { %v163_v63 = vld [vmem:[%s10604_s1 + $0x270] sm:$0xff] }
 0x11d   :  { %3921 = vmatmul.mubr.bf16.gmra.mrb[12].mxu0 %v8441_v14  ;;  %4373 = vmatmul.mubr.bf16.gmra.mrb[12].mxu1 %v8441_v14  ;;  %v171_v14 = vld [vmem:[%s10604_s1 + $0x2b0] sm:$0xff] }
 0x11e   :  { %4436 = vmatpush1.bf16.msra.mxu0 %v6180_v60  ;;  %4888 = vmatpush1.bf16.msra.mxu1 %v6182_v46  ;;  %v68_v60 = vld [vmem:[%s10605_s0 + $0x178] sm:$0xff]  ;;  %v6196_v46 = vcombine.low %v151_v1, %v155_v23 }
 0x11f   :  { %4437 = vmatprep.subr.bf16.mxu0 %v6189_v37  ;;  %4889 = vmatprep.subr.bf16.mxu1 %v6191_v31  ;;  %v6198_v37 = vcombine.low %v152_v30, %v156_v18  ;;  %v6205_v31 = vcombine.high %v159_v47, %v163_v63  ;;  %v8490_v11 = vcombine.high %v64_v20, %v68_v60  ;;  %v168_v23 = vld [vmem:[%s10604_s1 + $0x298] sm:$0xff] }
 0x120   :  { %3930 = vmatprep.mubr.bf16.mxu0 %v8452_v48  ;;  %4382 = vmatprep.mubr.bf16.mxu1 %v8452_v48  ;;  %v167_v48 = vld [vmem:[%s10604_s1 + $0x290] sm:$0xff]  ;;  %v172_v1 = vld [vmem:[%s10604_s1 + $0x2b8] sm:$0xff]  ;;  %v6204_v30 = vcombine.low %v159_v47, %v163_v63  ;;  %v6206_v18 = vcombine.low %v160_v50, %v164_v16  ;;  %v8517_v63 = vcombine.low %v64_v20, %v68_v60 }
 0x121   :  { %10684 = vst [vmem:[#allocation19_spill] sm:$0xff] %v8490_v11  ;;  %v176_v47 = vld [vmem:[%s10604_s1 + $0x2d8] sm:$0xff] }
 0x122   :  { %4438 = vmatpush1.bf16.msra.mxu0 %v6188_v36  ;;  %4890 = vmatpush1.bf16.msra.mxu1 %v6190_v52  ;;  %v6213_v36 = vcombine.high %v167_v48, %v171_v14  ;;  %v6215_v52 = vcombine.high %v168_v23, %v172_v1  ;;  %10685 = vst [vmem:[#allocation20_spill] sm:$0xff] %v8517_v63  ;;  %v180_v50 = vld [vmem:[%s10604_s1 + $0x2f8] sm:$0xff] }
 0x123   :  { %4439 = vmatprep.subr.bf16.mxu0 %v6197_v40  ;;  %4891 = vmatprep.subr.bf16.mxu1 %v6199_v9  ;;  %v175_v40 = vld [vmem:[%s10604_s1 + $0x2d0] sm:$0xff]  ;;  %v72_v16 = vld [vmem:[%s10605_s0 + $0x198] sm:$0xff]  ;;  %v6223_v20 = vcombine.high %v176_v47, %v180_v50 }
 0x124   :  { %v179_v9 = vld [vmem:[%s10604_s1 + $0x2f0] sm:$0xff] }
 0x125   :  { %3931 = vmatmul.mubr.bf16.gmra.mrb[16].mxu0 %v8479_v7  ;;  %4383 = vmatmul.mubr.bf16.gmra.mrb[16].mxu1 %v8479_v7  ;;  %v187_v7 = vld [vmem:[%s10604_s1 + $0x330] sm:$0xff] }
 0x126   :  { %4440 = vmatpush1.bf16.msra.mxu0 %v6196_v46  ;;  %4892 = vmatpush1.bf16.msra.mxu1 %v6198_v37  ;;  %v76_v46 = vld [vmem:[%s10605_s0 + $0x1b8] sm:$0xff]  ;;  %v6212_v37 = vcombine.low %v167_v48, %v171_v14 }
 0x127   :  { %4441 = vmatprep.subr.bf16.mxu0 %v6205_v31  ;;  %4893 = vmatprep.subr.bf16.mxu1 %v6207_v26  ;;  %v6214_v31 = vcombine.low %v168_v23, %v172_v1  ;;  %v6221_v26 = vcombine.high %v175_v40, %v179_v9  ;;  %v8528_v60 = vcombine.high %v72_v16, %v76_v46  ;;  %v184_v14 = vld [vmem:[%s10604_s1 + $0x318] sm:$0xff] }
 0x128   :  { %3940 = vmatprep.mubr.bf16.mxu0 %v8490_v11  ;;  %4392 = vmatprep.mubr.bf16.mxu1 %v8490_v11  ;;  %v183_v11 = vld [vmem:[%s10604_s1 + $0x310] sm:$0xff]  ;;  %v188_v48 = vld [vmem:[%s10604_s1 + $0x338] sm:$0xff]  ;;  %v6220_v23 = vcombine.low %v175_v40, %v179_v9  ;;  %v6222_v1 = vcombine.low %v176_v47, %v180_v50  ;;  %v8555_v9 = vcombine.low %v72_v16, %v76_v46 }
 0x129   :  { %10686 = vst [vmem:[#allocation21_spill] sm:$0xff] %v8528_v60  ;;  %v192_v40 = vld [vmem:[%s10604_s1 + $0x358] sm:$0xff] }
 0x12a   :  { %4442 = vmatpush1.bf16.msra.mxu0 %v6204_v30  ;;  %4894 = vmatpush1.bf16.msra.mxu1 %v6206_v18  ;;  %v6229_v30 = vcombine.high %v183_v11, %v187_v7  ;;  %v6231_v18 = vcombine.high %v184_v14, %v188_v48  ;;  %10687 = vst [vmem:[#allocation22_spill] sm:$0xff] %v8555_v9  ;;  %v196_v47 = vld [vmem:[%s10604_s1 + $0x378] sm:$0xff] }
 0x12b   :  { %4443 = vmatprep.subr.bf16.mxu0 %v6213_v36  ;;  %4895 = vmatprep.subr.bf16.mxu1 %v6215_v52  ;;  %v191_v36 = vld [vmem:[%s10604_s1 + $0x350] sm:$0xff]  ;;  %v80_v50 = vld [vmem:[%s10605_s0 + $0x1d8] sm:$0xff]  ;;  %v6239_v16 = vcombine.high %v192_v40, %v196_v47 }
 0x12c   :  { %v195_v52 = vld [vmem:[%s10604_s1 + $0x370] sm:$0xff] }
 0x12d   :  { %3941 = vmatmul.mubr.bf16.gmra.mrb[20].mxu0 %v8517_v63  ;;  %4393 = vmatmul.mubr.bf16.gmra.mrb[20].mxu1 %v8517_v63  ;;  %v203_v63 = vld [vmem:[%s10604_s1 + $0x3b0] sm:$0xff] }
 0x12e   :  { %4444 = vmatpush1.bf16.msra.mxu0 %v6212_v37  ;;  %4896 = vmatpush1.bf16.msra.mxu1 %v6214_v31  ;;  %v84_v37 = vld [vmem:[%s10605_s0 + $0x1f8] sm:$0xff]  ;;  %v6228_v31 = vcombine.low %v183_v11, %v187_v7 }
 0x12f   :  { %4445 = vmatprep.subr.bf16.mxu0 %v6221_v26  ;;  %4897 = vmatprep.subr.bf16.mxu1 %v6223_v20  ;;  %v6230_v26 = vcombine.low %v184_v14, %v188_v48  ;;  %v6237_v20 = vcombine.high %v191_v36, %v195_v52  ;;  %v8566_v46 = vcombine.high %v80_v50, %v84_v37  ;;  %v200_v7 = vld [vmem:[%s10604_s1 + $0x398] sm:$0xff] }
 0x130   :  { %3950 = vmatprep.mubr.bf16.mxu0 %v8528_v60  ;;  %4402 = vmatprep.mubr.bf16.mxu1 %v8528_v60  ;;  %v199_v60 = vld [vmem:[%s10604_s1 + $0x390] sm:$0xff]  ;;  %v204_v11 = vld [vmem:[%s10604_s1 + $0x3b8] sm:$0xff]  ;;  %v6236_v14 = vcombine.low %v191_v36, %v195_v52  ;;  %v6238_v48 = vcombine.low %v192_v40, %v196_v47 }
 0x131   :  { %10688 = vst [vmem:[#allocation23_spill] sm:$0xff] %v8566_v46  ;;  %v208_v36 = vld [vmem:[%s10604_s1 + $0x3d8] sm:$0xff]  ;;  %v6244_v40 = vcombine.low %v199_v60, %v203_v63  ;;  %v6246_v47 = vcombine.low %v200_v7, %v204_v11 }
 0x132   :  { %4446 = vmatpush1.bf16.msra.mxu0 %v6220_v23  ;;  %4898 = vmatpush1.bf16.msra.mxu1 %v6222_v1  ;;  %v6245_v23 = vcombine.high %v199_v60, %v203_v63  ;;  %v6247_v1 = vcombine.high %v200_v7, %v204_v11  ;;  %v212_v52 = vld [vmem:[%s10604_s1 + $0x3f8] sm:$0xff] }
 0x133   :  { %4447 = vmatprep.subr.bf16.mxu0 %v6229_v30  ;;  %4899 = vmatprep.subr.bf16.mxu1 %v6231_v18  ;;  %v207_v30 = vld [vmem:[%s10604_s1 + $0x3d0] sm:$0xff]  ;;  %v216_v63 = vld [vmem:[%s10604_s1 + $0x418] sm:$0xff]  ;;  %v6254_v7 = vcombine.low %v208_v36, %v212_v52 }
 0x134   :  { %v211_v18 = vld [vmem:[%s10604_s1 + $0x3f0] sm:$0xff]  ;;  %v220_v60 = vld [vmem:[%s10604_s1 + $0x438] sm:$0xff] }
 0x135   :  { %3951 = vmatmul.mubr.bf16.gmra.mrb[24].mxu0 %v8555_v9  ;;  %4403 = vmatmul.mubr.bf16.gmra.mrb[24].mxu1 %v8555_v9 }
 0x136   :  { %4448 = vmatpush1.bf16.msra.mxu0 %v6228_v31  ;;  %4900 = vmatpush1.bf16.msra.mxu1 %v6230_v26  ;;  %v8590_v31 = vcombine.low %v80_v50, %v84_v37  ;;  %v6253_v26 = vcombine.high %v207_v30, %v211_v18  ;;  %v215_v50 = vld [vmem:[%s10604_s1 + $0x410] sm:$0xff] }
 0x137   :  { %4449 = vmatprep.subr.bf16.mxu0 %v6237_v20  ;;  %4901 = vmatprep.subr.bf16.mxu1 %v6239_v16  ;;  %v6255_v20 = vcombine.high %v208_v36, %v212_v52  ;;  %v219_v37 = vld [vmem:[%s10604_s1 + $0x430] sm:$0xff]  ;;  %v6252_v16 = vcombine.low %v207_v30, %v211_v18  ;;  %v228_v30 = vld [vmem:[%s10604_s1 + $0x478] sm:$0xff]  ;;  %v6262_v36 = vcombine.low %v216_v63, %v220_v60 }
 0x138   :  { %3960 = vmatprep.mubr.bf16.mxu0 %v8566_v46  ;;  %4412 = vmatprep.mubr.bf16.mxu1 %v8566_v46  ;;  %10689 = vst [vmem:[#allocation24_spill] sm:$0xff] %v8590_v31  ;;  %v6261_v11 = vcombine.high %v215_v50, %v219_v37  ;;  %v6260_v18 = vcombine.low %v215_v50, %v219_v37  ;;  %v9525_v46 = vld [vmem:[%s10604_s1 + $0xfd8] sm:$0xff] }
 0x13a   :  { %4450 = vmatpush1.bf16.msra.mxu0 %v6236_v14  ;;  %4902 = vmatpush1.bf16.msra.mxu1 %v6238_v48  ;;  %v6263_v14 = vcombine.high %v216_v63, %v220_v60  ;;  %v223_v48 = vld [vmem:[%s10604_s1 + $0x450] sm:$0xff] }
 0x13b   :  { %4451 = vmatprep.subr.bf16.mxu0 %v6245_v23  ;;  %4903 = vmatprep.subr.bf16.mxu1 %v6247_v1  ;;  %v227_v23 = vld [vmem:[%s10604_s1 + $0x470] sm:$0xff]  ;;  %v224_v1 = vld [vmem:[%s10604_s1 + $0x458] sm:$0xff] }
 0x13c   :  { %v6269_v52 = vcombine.high %v223_v48, %v227_v23  ;;  %v6268_v50 = vcombine.low %v223_v48, %v227_v23  ;;  %v6270_v37 = vcombine.low %v224_v1, %v228_v30 }
 0x13d   :  { %3961 = vmatmul.mubr.bf16.gmra.mrb[28].mxu0 %v8590_v31  ;;  %4413 = vmatmul.mubr.bf16.gmra.mrb[28].mxu1 %v8590_v31 }
 0x13e   :  { %4452 = vmatpush1.bf16.msra.mxu0 %v6244_v40  ;;  %4904 = vmatpush1.bf16.msra.mxu1 %v6246_v47  ;;  %v6271_v40 = vcombine.high %v224_v1, %v228_v30  ;;  %v235_v47 = vld [vmem:[%s10604_s1 + $0x4b0] sm:$0xff] }
 0x13f   :  { %4453 = vmatprep.subr.bf16.mxu0 %v6253_v26  ;;  %4905 = vmatprep.subr.bf16.mxu1 %v6255_v20  ;;  %v232_v26 = vld [vmem:[%s10604_s1 + $0x498] sm:$0xff]  ;;  %v251_v30 = vld [vmem:[%s10604_s1 + $0x530] sm:$0xff] }
 0x140   :  { %4455 = vmatprep.mubr.bf16.mxu0 %v7286_v58  ;;  %4907 = vmatprep.mubr.bf16.mxu1 %v7286_v58  ;;  %v231_v58 = vld [vmem:[%s10604_s1 + $0x490] sm:$0xff]  ;;  %v236_v20 = vld [vmem:[%s10604_s1 + $0x4b8] sm:$0xff] }
 0x141   :  { %v6277_v63 = vcombine.high %v231_v58, %v235_v47  ;;  %v6279_v60 = vcombine.high %v232_v26, %v236_v20  ;;  %v6278_v48 = vcombine.low %v232_v26, %v236_v20  ;;  %v255_v26 = vld [vmem:[%s10604_s1 + $0x550] sm:$0xff] }
 0x142   :  { %4454 = vmatpush1.bf16.msra.mxu0 %v6252_v16  ;;  %4906 = vmatpush1.bf16.msra.mxu1 %v6254_v7  ;;  %v239_v16 = vld [vmem:[%s10604_s1 + $0x4d0] sm:$0xff] }
 0x143   :  { %4536 = vmatprep.subr.bf16.mxu0 %v6261_v11  ;;  %4988 = vmatprep.subr.bf16.mxu1 %v6263_v14  ;;  %v243_v7 = vld [vmem:[%s10604_s1 + $0x4f0] sm:$0xff]  ;;  %v244_v11 = vld [vmem:[%s10604_s1 + $0x4f8] sm:$0xff]  ;;  %v6276_v14 = vcombine.low %v231_v58, %v235_v47 }
 0x144   :  { %v6285_v23 = vcombine.high %v239_v16, %v243_v7  ;;  %v259_v20 = vld [vmem:[%s10604_s1 + $0x570] sm:$0xff] }
 0x145   :  { %4456 = vmatmul.mubr.bf16.vlgmr.msra.gmra.mrb[32].mxu0 %v7415_v15  ;;  %4908 = vmatmul.mubr.bf16.vlgmr.msra.gmra.mrb[32].mxu1 %v7415_v15  ;;  %v240_v15 = vld [vmem:[%s10604_s1 + $0x4d8] sm:$0xff] }
 0x146   :  { %4537 = vmatpush1.bf16.msra.mxu0 %v6260_v18  ;;  %4989 = vmatpush1.bf16.msra.mxu1 %v6262_v36  ;;  %v6287_v1 = vcombine.high %v240_v15, %v244_v11  ;;  %v248_v18 = vld [vmem:[%s10604_s1 + $0x518] sm:$0xff] }
 0x147   :  { %4538 = vmatprep.subr.bf16.mxu0 %v6269_v52  ;;  %4990 = vmatprep.subr.bf16.mxu1 %v6271_v40  ;;  %v252_v36 = vld [vmem:[%s10604_s1 + $0x538] sm:$0xff]  ;;  %v6284_v52 = vcombine.low %v239_v16, %v243_v7  ;;  %v6286_v40 = vcombine.low %v240_v15, %v244_v11  ;;  %v267_v7 = vld [vmem:[%s10604_s1 + $0x5b0] sm:$0xff] }
 0x148   :  { %4465 = vmatprep.mubr.bf16.mxu0 %v7426_v54  ;;  %4917 = vmatprep.mubr.bf16.mxu1 %v7426_v54  ;;  %v247_v54 = vld [vmem:[%s10604_s1 + $0x510] sm:$0xff]  ;;  %v6295_v47 = vcombine.high %v248_v18, %v252_v36  ;;  %v264_v15 = vld [vmem:[%s10604_s1 + $0x598] sm:$0xff] }
 0x149   :  { %v6293_v58 = vcombine.high %v247_v54, %v251_v30  ;;  %v268_v11 = vld [vmem:[%s10604_s1 + $0x5b8] sm:$0xff] }
 0x14a   :  { %4539 = vmatpush1.bf16.msra.mxu0 %v6268_v50  ;;  %4991 = vmatpush1.bf16.msra.mxu1 %v6270_v37  ;;  %v260_v50 = vld [vmem:[%s10604_s1 + $0x578] sm:$0xff]  ;;  %v6292_v37 = vcombine.low %v247_v54, %v251_v30  ;;  %v271_v54 = vld [vmem:[%s10604_s1 + $0x5d0] sm:$0xff] }
 0x14b   :  { %4540 = vmatprep.subr.bf16.mxu0 %v6277_v63  ;;  %4992 = vmatprep.subr.bf16.mxu1 %v6279_v60  ;;  %v6294_v63 = vcombine.low %v248_v18, %v252_v36  ;;  %v6301_v60 = vcombine.high %v255_v26, %v259_v20  ;;  %v275_v30 = vld [vmem:[%s10604_s1 + $0x5f0] sm:$0xff]  ;;  %v276_v18 = vld [vmem:[%s10604_s1 + $0x5f8] sm:$0xff] }
 0x14d   :  { %4466 = vmatmul.mubr.bf16.gmra.mrb[36].mxu0 %v7453_v33  ;;  %4918 = vmatmul.mubr.bf16.gmra.mrb[36].mxu1 %v7453_v33  ;;  %v256_v33 = vld [vmem:[%s10604_s1 + $0x558] sm:$0xff] }
 0x14e   :  { %4541 = vmatpush1.bf16.msra.mxu0 %v6276_v14  ;;  %4993 = vmatpush1.bf16.msra.mxu1 %v6278_v48  ;;  %v6303_v16 = vcombine.high %v256_v33, %v260_v50  ;;  %v6300_v14 = vcombine.low %v255_v26, %v259_v20  ;;  %v6302_v48 = vcombine.low %v256_v33, %v260_v50  ;;  %v280_v26 = vld [vmem:[%s10604_s1 + $0x618] sm:$0xff] }
 0x14f   :  { %4542 = vmatprep.subr.bf16.mxu0 %v6285_v23  ;;  %4994 = vmatprep.subr.bf16.mxu1 %v6287_v1  ;;  %v6311_v1 = vcombine.high %v264_v15, %v268_v11  ;;  %v284_v20 = vld [vmem:[%s10604_s1 + $0x638] sm:$0xff]  ;;  %v6316_v33 = vcombine.low %v271_v54, %v275_v30 }
 0x150   :  { %4475 = vmatprep.mubr.bf16.mxu0 %v7464_v41  ;;  %4927 = vmatprep.mubr.bf16.mxu1 %v7464_v41  ;;  %v263_v41 = vld [vmem:[%s10604_s1 + $0x590] sm:$0xff] }
 0x151   :  { %v6309_v23 = vcombine.high %v263_v41, %v267_v7  ;;  %v6308_v36 = vcombine.low %v263_v41, %v267_v7  ;;  %v292_v41 = vld [vmem:[%s10604_s1 + $0x678] sm:$0xff] }
 0x152   :  { %4543 = vmatpush1.bf16.msra.mxu0 %v6284_v52  ;;  %4995 = vmatpush1.bf16.msra.mxu1 %v6286_v40  ;;  %v6310_v52 = vcombine.low %v264_v15, %v268_v11  ;;  %v6317_v40 = vcombine.high %v271_v54, %v275_v30  ;;  %v6326_v15 = vcombine.low %v280_v26, %v284_v20 }
 0x153   :  { %4544 = vmatprep.subr.bf16.mxu0 %v6293_v58  ;;  %4996 = vmatprep.subr.bf16.mxu1 %v6295_v47  ;;  %v283_v47 = vld [vmem:[%s10604_s1 + $0x630] sm:$0xff] }
 0x155   :  { %4476 = vmatmul.mubr.bf16.gmra.mrb[40].mxu0 %v7491_v55  ;;  %4928 = vmatmul.mubr.bf16.gmra.mrb[40].mxu1 %v7491_v55  ;;  %v272_v55 = vld [vmem:[%s10604_s1 + $0x5d8] sm:$0xff] }
 0x156   :  { %4545 = vmatpush1.bf16.msra.mxu0 %v6292_v37  ;;  %4997 = vmatpush1.bf16.msra.mxu1 %v6294_v63  ;;  %v6319_v58 = vcombine.high %v272_v55, %v276_v18  ;;  %v6318_v50 = vcombine.low %v272_v55, %v276_v18  ;;  %v6327_v63 = vcombine.high %v280_v26, %v284_v20  ;;  %v315_v20 = vld [vmem:[%s10604_s1 + $0x730] sm:$0xff] }
 0x157   :  { %4546 = vmatprep.subr.bf16.mxu0 %v6301_v60  ;;  %4998 = vmatprep.subr.bf16.mxu1 %v6303_v16  ;;  %v287_v60 = vld [vmem:[%s10604_s1 + $0x650] sm:$0xff] }
 0x158   :  { %4485 = vmatprep.mubr.bf16.mxu0 %v7502_v0  ;;  %4937 = vmatprep.mubr.bf16.mxu1 %v7502_v0  ;;  %v279_v0 = vld [vmem:[%s10604_s1 + $0x610] sm:$0xff] }
 0x159   :  { %v6325_v37 = vcombine.high %v279_v0, %v283_v47  ;;  %v291_v16 = vld [vmem:[%s10604_s1 + $0x670] sm:$0xff]  ;;  %v6324_v7 = vcombine.low %v279_v0, %v283_v47 }
 0x15a   :  { %4547 = vmatpush1.bf16.msra.mxu0 %v6300_v14  ;;  %4999 = vmatpush1.bf16.msra.mxu1 %v6302_v48  ;;  %v6333_v11 = vcombine.high %v287_v60, %v291_v16  ;;  %v299_v48 = vld [vmem:[%s10604_s1 + $0x6b0] sm:$0xff]  ;;  %v6332_v54 = vcombine.low %v287_v60, %v291_v16 }
 0x15b   :  { %4548 = vmatprep.subr.bf16.mxu0 %v6309_v23  ;;  %5000 = vmatprep.subr.bf16.mxu1 %v6311_v1  ;;  %v296_v23 = vld [vmem:[%s10604_s1 + $0x698] sm:$0xff] }
 0x15c   :  { %v300_v1 = vld [vmem:[%s10604_s1 + $0x6b8] sm:$0xff] }
 0x15d   :  { %4486 = vmatmul.mubr.bf16.gmra.mrb[44].mxu0 %v7529_v12  ;;  %4938 = vmatmul.mubr.bf16.gmra.mrb[44].mxu1 %v7529_v12  ;;  %v288_v12 = vld [vmem:[%s10604_s1 + $0x658] sm:$0xff]  ;;  %v6343_v18 = vcombine.high %v296_v23, %v300_v1  ;;  %v6342_v0 = vcombine.low %v296_v23, %v300_v1 }
 0x15e   :  { %4549 = vmatpush1.bf16.msra.mxu0 %v6308_v36  ;;  %5001 = vmatpush1.bf16.msra.mxu1 %v6310_v52  ;;  %v6335_v14 = vcombine.high %v288_v12, %v292_v41  ;;  %v6334_v30 = vcombine.low %v288_v12, %v292_v41  ;;  %v303_v36 = vld [vmem:[%s10604_s1 + $0x6d0] sm:$0xff]  ;;  %v328_v23 = vld [vmem:[%s10604_s1 + $0x798] sm:$0xff] }
 0x15f   :  { %4550 = vmatprep.subr.bf16.mxu0 %v6317_v40  ;;  %5002 = vmatprep.subr.bf16.mxu1 %v6319_v58  ;;  %v307_v52 = vld [vmem:[%s10604_s1 + $0x6f0] sm:$0xff]  ;;  %v308_v40 = vld [vmem:[%s10604_s1 + $0x6f8] sm:$0xff] }
 0x160   :  { %4495 = vmatprep.mubr.bf16.mxu0 %v7540_v21  ;;  %4947 = vmatprep.mubr.bf16.mxu1 %v7540_v21  ;;  %v295_v21 = vld [vmem:[%s10604_s1 + $0x690] sm:$0xff]  ;;  %v6349_v47 = vcombine.high %v303_v36, %v307_v52  ;;  %v332_v1 = vld [vmem:[%s10604_s1 + $0x7b8] sm:$0xff] }
 0x161   :  { %v6341_v55 = vcombine.high %v295_v21, %v299_v48  ;;  %v6340_v58 = vcombine.low %v295_v21, %v299_v48  ;;  %v319_v12 = vld [vmem:[%s10604_s1 + $0x750] sm:$0xff] }
 0x162   :  { %4551 = vmatpush1.bf16.msra.mxu0 %v6316_v33  ;;  %5003 = vmatpush1.bf16.msra.mxu1 %v6318_v50  ;;  %v312_v33 = vld [vmem:[%s10604_s1 + $0x718] sm:$0xff]  ;;  %v323_v41 = vld [vmem:[%s10604_s1 + $0x770] sm:$0xff] }
 0x163   :  { %4552 = vmatprep.subr.bf16.mxu0 %v6325_v37  ;;  %5004 = vmatprep.subr.bf16.mxu1 %v6327_v63  ;;  %v316_v50 = vld [vmem:[%s10604_s1 + $0x738] sm:$0xff]  ;;  %v6348_v37 = vcombine.low %v303_v36, %v307_v52  ;;  %v331_v48 = vld [vmem:[%s10604_s1 + $0x7b0] sm:$0xff] }
 0x164   :  { %v6359_v16 = vcombine.high %v312_v33, %v316_v50  ;;  %v335_v36 = vld [vmem:[%s10604_s1 + $0x7d0] sm:$0xff] }
 0x165   :  { %4496 = vmatmul.mubr.bf16.gmra.mrb[48].mxu0 %v7567_v32  ;;  %4948 = vmatmul.mubr.bf16.gmra.mrb[48].mxu1 %v7567_v32  ;;  %v304_v32 = vld [vmem:[%s10604_s1 + $0x6d8] sm:$0xff]  ;;  %v339_v52 = vld [vmem:[%s10604_s1 + $0x7f0] sm:$0xff] }
 0x166   :  { %4553 = vmatpush1.bf16.msra.mxu0 %v6324_v7  ;;  %5005 = vmatpush1.bf16.msra.mxu1 %v6326_v15  ;;  %v6351_v26 = vcombine.high %v304_v32, %v308_v40  ;;  %v6350_v63 = vcombine.low %v304_v32, %v308_v40  ;;  %v324_v7 = vld [vmem:[%s10604_s1 + $0x778] sm:$0xff] }
 0x167   :  { %4554 = vmatprep.subr.bf16.mxu0 %v6333_v11  ;;  %5006 = vmatprep.subr.bf16.mxu1 %v6335_v14  ;;  %v6358_v11 = vcombine.low %v312_v33, %v316_v50  ;;  %v6365_v14 = vcombine.high %v319_v12, %v323_v41  ;;  %v340_v32 = vld [vmem:[%s10604_s1 + $0x7f8] sm:$0xff]  ;;  %v6380_v33 = vcombine.low %v335_v36, %v339_v52 }
 0x168   :  { %4505 = vmatprep.mubr.bf16.mxu0 %v7578_v42  ;;  %4957 = vmatprep.mubr.bf16.mxu1 %v7578_v42  ;;  %v311_v42 = vld [vmem:[%s10604_s1 + $0x710] sm:$0xff] }
 0x169   :  { %v6357_v60 = vcombine.high %v311_v42, %v315_v20  ;;  %v6356_v15 = vcombine.low %v311_v42, %v315_v20  ;;  %v344_v42 = vld [vmem:[%s10604_s1 + $0x818] sm:$0xff] }
 0x16a   :  { %4555 = vmatpush1.bf16.msra.mxu0 %v6332_v54  ;;  %5007 = vmatpush1.bf16.msra.mxu1 %v6334_v30  ;;  %v6364_v54 = vcombine.low %v319_v12, %v323_v41  ;;  %v348_v20 = vld [vmem:[%s10604_s1 + $0x838] sm:$0xff] }
 0x16b   :  { %4556 = vmatprep.subr.bf16.mxu0 %v6341_v55  ;;  %5008 = vmatprep.subr.bf16.mxu1 %v6343_v18  ;;  %v6375_v18 = vcombine.high %v328_v23, %v332_v1  ;;  %v356_v12 = vld [vmem:[%s10604_s1 + $0x878] sm:$0xff] }
 0x16d   :  { %4506 = vmatmul.mubr.bf16.gmra.mrb[52].mxu0 %v7605_v57  ;;  %4958 = vmatmul.mubr.bf16.gmra.mrb[52].mxu1 %v7605_v57  ;;  %v320_v57 = vld [vmem:[%s10604_s1 + $0x758] sm:$0xff] }
 0x16e   :  { %4557 = vmatpush1.bf16.msra.mxu0 %v6340_v58  ;;  %5009 = vmatpush1.bf16.msra.mxu1 %v6342_v0  ;;  %v6367_v21 = vcombine.high %v320_v57, %v324_v7  ;;  %v6366_v30 = vcombine.low %v320_v57, %v324_v7  ;;  %v6374_v58 = vcombine.low %v328_v23, %v332_v1 }
 0x16f   :  { %4558 = vmatprep.subr.bf16.mxu0 %v6349_v47  ;;  %5010 = vmatprep.subr.bf16.mxu1 %v6351_v26  ;;  %v6381_v0 = vcombine.high %v335_v36, %v339_v52  ;;  %v347_v26 = vld [vmem:[%s10604_s1 + $0x830] sm:$0xff]  ;;  %v6390_v57 = vcombine.low %v344_v42, %v348_v20 }
 0x170   :  { %4515 = vmatprep.mubr.bf16.mxu0 %v7616_v3  ;;  %4967 = vmatprep.mubr.bf16.mxu1 %v7616_v3  ;;  %v327_v3 = vld [vmem:[%s10604_s1 + $0x790] sm:$0xff] }
 0x171   :  { %v6373_v55 = vcombine.high %v327_v3, %v331_v48  ;;  %v6372_v40 = vcombine.low %v327_v3, %v331_v48 }
 0x172   :  { %4559 = vmatpush1.bf16.msra.mxu0 %v6348_v37  ;;  %5011 = vmatpush1.bf16.msra.mxu1 %v6350_v63  ;;  %v6391_v63 = vcombine.high %v344_v42, %v348_v20  ;;  %v383_v42 = vld [vmem:[%s10604_s1 + $0x950] sm:$0xff] }
 0x173   :  { %4560 = vmatprep.subr.bf16.mxu0 %v6357_v60  ;;  %5012 = vmatprep.subr.bf16.mxu1 %v6359_v16  ;;  %v351_v60 = vld [vmem:[%s10604_s1 + $0x850] sm:$0xff] }
 0x174   :  { %v355_v16 = vld [vmem:[%s10604_s1 + $0x870] sm:$0xff] }
 0x175   :  { %4516 = vmatmul.mubr.bf16.gmra.mrb[56].mxu0 %v7643_v17  ;;  %4968 = vmatmul.mubr.bf16.gmra.mrb[56].mxu1 %v7643_v17  ;;  %v336_v17 = vld [vmem:[%s10604_s1 + $0x7d8] sm:$0xff]  ;;  %v6397_v7 = vcombine.high %v351_v60, %v355_v16  ;;  %v6396_v3 = vcombine.low %v351_v60, %v355_v16  ;;  %v387_v20 = vld [vmem:[%s10604_s1 + $0x970] sm:$0xff] }
 0x176   :  { %4561 = vmatpush1.bf16.msra.mxu0 %v6356_v15  ;;  %5013 = vmatpush1.bf16.msra.mxu1 %v6358_v11  ;;  %v6383_v47 = vcombine.high %v336_v17, %v340_v32  ;;  %v6382_v50 = vcombine.low %v336_v17, %v340_v32  ;;  %v363_v11 = vld [vmem:[%s10604_s1 + $0x8b0] sm:$0xff] }
 0x177   :  { %4562 = vmatprep.subr.bf16.mxu0 %v6365_v14  ;;  %5014 = vmatprep.subr.bf16.mxu1 %v6367_v21  ;;  %v360_v14 = vld [vmem:[%s10604_s1 + $0x898] sm:$0xff]  ;;  %v379_v32 = vld [vmem:[%s10604_s1 + $0x930] sm:$0xff] }
 0x178   :  { %4525 = vmatprep.mubr.bf16.mxu0 %v7654_v25  ;;  %4977 = vmatprep.mubr.bf16.mxu1 %v7654_v25  ;;  %v343_v25 = vld [vmem:[%s10604_s1 + $0x810] sm:$0xff]  ;;  %v364_v21 = vld [vmem:[%s10604_s1 + $0x8b8] sm:$0xff] }
 0x179   :  { %v6389_v37 = vcombine.high %v343_v25, %v347_v26  ;;  %v6388_v41 = vcombine.low %v343_v25, %v347_v26  ;;  %v6407_v1 = vcombine.high %v360_v14, %v364_v21  ;;  %v6406_v36 = vcombine.low %v360_v14, %v364_v21  ;;  %v395_v16 = vld [vmem:[%s10604_s1 + $0x9b0] sm:$0xff]  ;;  %v404_v14 = vld [vmem:[%s10604_s1 + $0x9f8] sm:$0xff] }
 0x17a   :  { %4563 = vmatpush1.bf16.msra.mxu0 %v6364_v54  ;;  %5015 = vmatpush1.bf16.msra.mxu1 %v6366_v30  ;;  %v367_v54 = vld [vmem:[%s10604_s1 + $0x8d0] sm:$0xff] }
 0x17b   :  { %4564 = vmatprep.subr.bf16.mxu0 %v6373_v55  ;;  %5016 = vmatprep.subr.bf16.mxu1 %v6375_v18  ;;  %v371_v30 = vld [vmem:[%s10604_s1 + $0x8f0] sm:$0xff]  ;;  %v372_v55 = vld [vmem:[%s10604_s1 + $0x8f8] sm:$0xff] }
 0x17c   :  { %v6413_v52 = vcombine.high %v367_v54, %v371_v30 }
 0x17d   :  { %4526 = vmatmul.mubr.bf16.gmra.mrb[60].mxu0 %v7681_v39  ;;  %4978 = vmatmul.mubr.bf16.gmra.mrb[60].mxu1 %v7681_v39  ;;  %v352_v39 = vld [vmem:[%s10604_s1 + $0x858] sm:$0xff] }
 0x17e   :  { %4565 = vmatpush1.bf16.msra.mxu0 %v6372_v40  ;;  %5017 = vmatpush1.bf16.msra.mxu1 %v6374_v58  ;;  %v6399_v15 = vcombine.high %v352_v39, %v356_v12  ;;  %v6398_v48 = vcombine.low %v352_v39, %v356_v12  ;;  %v376_v40 = vld [vmem:[%s10604_s1 + $0x918] sm:$0xff] }
 0x17f   :  { %4566 = vmatprep.subr.bf16.mxu0 %v6381_v0  ;;  %5018 = vmatprep.subr.bf16.mxu1 %v6383_v47  ;;  %v380_v58 = vld [vmem:[%s10604_s1 + $0x938] sm:$0xff]  ;;  %v6412_v0 = vcombine.low %v367_v54, %v371_v30 }
 0x180   :  { %4568 = vmatprep.mubr.bf16.mxu0 %v7692_v49  ;;  %5020 = vmatprep.mubr.bf16.mxu1 %v7692_v49  ;;  %v359_v49 = vld [vmem:[%s10604_s1 + $0x890] sm:$0xff]  ;;  %v6423_v26 = vcombine.high %v376_v40, %v380_v58  ;;  %v392_v39 = vld [vmem:[%s10604_s1 + $0x998] sm:$0xff] }
 0x181   :  { %v6405_v23 = vcombine.high %v359_v49, %v363_v11  ;;  %v6404_v18 = vcombine.low %v359_v49, %v363_v11  ;;  %v396_v12 = vld [vmem:[%s10604_s1 + $0x9b8] sm:$0xff]  ;;  %v399_v49 = vld [vmem:[%s10604_s1 + $0x9d0] sm:$0xff] }
 0x182   :  { %4567 = vmatpush1.bf16.msra.mxu0 %v6380_v33  ;;  %5019 = vmatpush1.bf16.msra.mxu1 %v6382_v50  ;;  %v388_v33 = vld [vmem:[%s10604_s1 + $0x978] sm:$0xff]  ;;  %v403_v11 = vld [vmem:[%s10604_s1 + $0x9f0] sm:$0xff] }
 0x183   :  { %4649 = vmatprep.subr.bf16.mxu0 %v6389_v37  ;;  %5101 = vmatprep.subr.bf16.mxu1 %v6391_v63  ;;  %v6422_v37 = vcombine.low %v376_v40, %v380_v58  ;;  %v6429_v63 = vcombine.high %v383_v42, %v387_v20  ;;  %v408_v54 = vld [vmem:[%s10604_s1 + $0xa18] sm:$0xff] }
 0x184   :  { %v412_v30 = vld [vmem:[%s10604_s1 + $0xa38] sm:$0xff] }
 0x185   :  { %4569 = vmatmul.mubr.bf16.vlgmr.msra.gmra.mrb[32].mxu0 %v7718_v4  ;;  %5021 = vmatmul.mubr.bf16.vlgmr.msra.gmra.mrb[32].mxu1 %v7718_v4  ;;  %v368_v4 = vld [vmem:[%s10604_s1 + $0x8d8] sm:$0xff]  ;;  %v6454_v40 = vcombine.low %v408_v54, %v412_v30 }
 0x186   :  { %4650 = vmatpush1.bf16.msra.mxu0 %v6388_v41  ;;  %5102 = vmatpush1.bf16.msra.mxu1 %v6390_v57  ;;  %v6415_v17 = vcombine.high %v368_v4, %v372_v55  ;;  %v6414_v47 = vcombine.low %v368_v4, %v372_v55  ;;  %v6428_v41 = vcombine.low %v383_v42, %v387_v20 }
 0x187   :  { %4651 = vmatprep.subr.bf16.mxu0 %v6397_v7  ;;  %5103 = vmatprep.subr.bf16.mxu1 %v6399_v15  ;;  %v6439_v15 = vcombine.high %v392_v39, %v396_v12  ;;  %v6444_v4 = vcombine.low %v399_v49, %v403_v11 }
 0x188   :  { %4578 = vmatprep.mubr.bf16.mxu0 %v7730_v13  ;;  %5030 = vmatprep.mubr.bf16.mxu1 %v7730_v13  ;;  %v375_v13 = vld [vmem:[%s10604_s1 + $0x910] sm:$0xff] }
 0x189   :  { %v6421_v25 = vcombine.high %v375_v13, %v379_v32  ;;  %v6420_v50 = vcombine.low %v375_v13, %v379_v32  ;;  %v420_v13 = vld [vmem:[%s10604_s1 + $0xa78] sm:$0xff] }
 0x18a   :  { %4652 = vmatpush1.bf16.msra.mxu0 %v6396_v3  ;;  %5104 = vmatpush1.bf16.msra.mxu1 %v6398_v48  ;;  %v6438_v3 = vcombine.low %v392_v39, %v396_v12  ;;  %v6445_v48 = vcombine.high %v399_v49, %v403_v11  ;;  %v443_v12 = vld [vmem:[%s10604_s1 + $0xb30] sm:$0xff] }
 0x18b   :  { %4653 = vmatprep.subr.bf16.mxu0 %v6405_v23  ;;  %5105 = vmatprep.subr.bf16.mxu1 %v6407_v1  ;;  %v411_v1 = vld [vmem:[%s10604_s1 + $0xa30] sm:$0xff] }
 0x18d   :  { %4579 = vmatmul.mubr.bf16.gmra.mrb[36].mxu0 %v7757_v28  ;;  %5031 = vmatmul.mubr.bf16.gmra.mrb[36].mxu1 %v7757_v28  ;;  %v384_v28 = vld [vmem:[%s10604_s1 + $0x958] sm:$0xff] }
 0x18e   :  { %4654 = vmatpush1.bf16.msra.mxu0 %v6404_v18  ;;  %5106 = vmatpush1.bf16.msra.mxu1 %v6406_v36  ;;  %v6431_v60 = vcombine.high %v384_v28, %v388_v33  ;;  %v6430_v57 = vcombine.low %v384_v28, %v388_v33  ;;  %v6455_v36 = vcombine.high %v408_v54, %v412_v30  ;;  %v456_v54 = vld [vmem:[%s10604_s1 + $0xb98] sm:$0xff] }
 0x18f   :  { %4655 = vmatprep.subr.bf16.mxu0 %v6413_v52  ;;  %5107 = vmatprep.subr.bf16.mxu1 %v6415_v17  ;;  %v415_v52 = vld [vmem:[%s10604_s1 + $0xa50] sm:$0xff]  ;;  %v460_v30 = vld [vmem:[%s10604_s1 + $0xbb8] sm:$0xff] }
 0x190   :  { %4588 = vmatprep.mubr.bf16.mxu0 %v7768_v38  ;;  %5040 = vmatprep.mubr.bf16.mxu1 %v7768_v38  ;;  %v391_v38 = vld [vmem:[%s10604_s1 + $0x990] sm:$0xff] }
 0x191   :  { %v6437_v7 = vcombine.high %v391_v38, %v395_v16  ;;  %v6436_v21 = vcombine.low %v391_v38, %v395_v16  ;;  %v419_v17 = vld [vmem:[%s10604_s1 + $0xa70] sm:$0xff] }
 0x192   :  { %4656 = vmatpush1.bf16.msra.mxu0 %v6412_v0  ;;  %5108 = vmatpush1.bf16.msra.mxu1 %v6414_v47  ;;  %v6461_v58 = vcombine.high %v415_v52, %v419_v17  ;;  %v427_v47 = vld [vmem:[%s10604_s1 + $0xab0] sm:$0xff]  ;;  %v6460_v42 = vcombine.low %v415_v52, %v419_v17 }
 0x193   :  { %4657 = vmatprep.subr.bf16.mxu0 %v6421_v25  ;;  %5109 = vmatprep.subr.bf16.mxu1 %v6423_v26  ;;  %v424_v25 = vld [vmem:[%s10604_s1 + $0xa98] sm:$0xff]  ;;  %v463_v52 = vld [vmem:[%s10604_s1 + $0xbd0] sm:$0xff] }
 0x194   :  { %v428_v26 = vld [vmem:[%s10604_s1 + $0xab8] sm:$0xff]  ;;  %v467_v17 = vld [vmem:[%s10604_s1 + $0xbf0] sm:$0xff] }
 0x195   :  { %4589 = vmatmul.mubr.bf16.gmra.mrb[40].mxu0 %v7795_v59  ;;  %5041 = vmatmul.mubr.bf16.gmra.mrb[40].mxu1 %v7795_v59  ;;  %v400_v59 = vld [vmem:[%s10604_s1 + $0x9d8] sm:$0xff]  ;;  %v6471_v33 = vcombine.high %v424_v25, %v428_v26  ;;  %v6470_v38 = vcombine.low %v424_v25, %v428_v26  ;;  %v6508_v25 = vcombine.low %v463_v52, %v467_v17 }
 0x196   :  { %4658 = vmatpush1.bf16.msra.mxu0 %v6420_v50  ;;  %5110 = vmatpush1.bf16.msra.mxu1 %v6422_v37  ;;  %v6447_v23 = vcombine.high %v400_v59, %v404_v14  ;;  %v6446_v55 = vcombine.low %v400_v59, %v404_v14  ;;  %v431_v50 = vld [vmem:[%s10604_s1 + $0xad0] sm:$0xff] }
 0x197   :  { %4659 = vmatprep.subr.bf16.mxu0 %v6429_v63  ;;  %5111 = vmatprep.subr.bf16.mxu1 %v6431_v60  ;;  %v435_v37 = vld [vmem:[%s10604_s1 + $0xaf0] sm:$0xff]  ;;  %v436_v63 = vld [vmem:[%s10604_s1 + $0xaf8] sm:$0xff] }
 0x198   :  { %4598 = vmatprep.mubr.bf16.mxu0 %v7806_v6  ;;  %5050 = vmatprep.mubr.bf16.mxu1 %v7806_v6  ;;  %v407_v6 = vld [vmem:[%s10604_s1 + $0xa10] sm:$0xff]  ;;  %v6477_v16 = vcombine.high %v431_v50, %v435_v37 }
 0x199   :  { %v6453_v18 = vcombine.high %v407_v6, %v411_v1  ;;  %v6452_v32 = vcombine.low %v407_v6, %v411_v1  ;;  %v447_v59 = vld [vmem:[%s10604_s1 + $0xb50] sm:$0xff] }
 0x19a   :  { %4660 = vmatpush1.bf16.msra.mxu0 %v6428_v41  ;;  %5112 = vmatpush1.bf16.msra.mxu1 %v6430_v57  ;;  %v440_v41 = vld [vmem:[%s10604_s1 + $0xb18] sm:$0xff]  ;;  %v451_v14 = vld [vmem:[%s10604_s1 + $0xb70] sm:$0xff] }
 0x19b   :  { %4661 = vmatprep.subr.bf16.mxu0 %v6437_v7  ;;  %5113 = vmatprep.subr.bf16.mxu1 %v6439_v15  ;;  %v444_v57 = vld [vmem:[%s10604_s1 + $0xb38] sm:$0xff]  ;;  %v6476_v7 = vcombine.low %v431_v50, %v435_v37  ;;  %v459_v1 = vld [vmem:[%s10604_s1 + $0xbb0] sm:$0xff]  ;;  %v599_v50 = vlaneseq }
 0x19c   :  { %v6487_v11 = vcombine.high %v440_v41, %v444_v57  ;;  %v484_v37 = vld [vmem:[%s10604_s1 + $0xc78] sm:$0xff] }
 0x19d   :  { %4599 = vmatmul.mubr.bf16.gmra.mrb[44].mxu0 %v7833_v22  ;;  %5051 = vmatmul.mubr.bf16.gmra.mrb[44].mxu1 %v7833_v22  ;;  %v416_v22 = vld [vmem:[%s10604_s1 + $0xa58] sm:$0xff] }
 0x19e   :  { %4662 = vmatpush1.bf16.msra.mxu0 %v6436_v21  ;;  %5114 = vmatpush1.bf16.msra.mxu1 %v6438_v3  ;;  %v6463_v0 = vcombine.high %v416_v22, %v420_v13  ;;  %v6462_v20 = vcombine.low %v416_v22, %v420_v13  ;;  %v452_v21 = vld [vmem:[%s10604_s1 + $0xb78] sm:$0xff] }
 0x19f   :  { %4663 = vmatprep.subr.bf16.mxu0 %v6445_v48  ;;  %5115 = vmatprep.subr.bf16.mxu1 %v6447_v23  ;;  %v6486_v48 = vcombine.low %v440_v41, %v444_v57  ;;  %v6493_v23 = vcombine.high %v447_v59, %v451_v14  ;;  %v468_v22 = vld [vmem:[%s10604_s1 + $0xbf8] sm:$0xff]  ;;  %v9101_v57 = vld [vmem:[%s10604_s1 + $0xcd0] sm:$0xff] }
 0x1a0   :  { %4608 = vmatprep.mubr.bf16.mxu0 %v7844_v34  ;;  %5060 = vmatprep.mubr.bf16.mxu1 %v7844_v34  ;;  %v423_v34 = vld [vmem:[%s10604_s1 + $0xa90] sm:$0xff] }
 0x1a1   :  { %v6469_v28 = vcombine.high %v423_v34, %v427_v47  ;;  %v6468_v60 = vcombine.low %v423_v34, %v427_v47  ;;  %v472_v34 = vld [vmem:[%s10604_s1 + $0xc18] sm:$0xff] }
 0x1a2   :  { %4664 = vmatpush1.bf16.msra.mxu0 %v6444_v4  ;;  %5116 = vmatpush1.bf16.msra.mxu1 %v6446_v55  ;;  %v6492_v4 = vcombine.low %v447_v59, %v451_v14  ;;  %v476_v47 = vld [vmem:[%s10604_s1 + $0xc38] sm:$0xff]  ;;  %v9123_v59 = vld [vmem:[%s10604_s1 + $0xd10] sm:$0xff] }
 0x1a3   :  { %4665 = vmatprep.subr.bf16.mxu0 %v6453_v18  ;;  %5117 = vmatprep.subr.bf16.mxu1 %v6455_v36  ;;  %v6503_v36 = vcombine.high %v456_v54, %v460_v30  ;;  %v9128_v14 = vld [vmem:[%s10604_s1 + $0xd30] sm:$0xff] }
 0x1a5   :  { %4609 = vmatmul.mubr.bf16.gmra.mrb[48].mxu0 %v7871_v51  ;;  %5061 = vmatmul.mubr.bf16.gmra.mrb[48].mxu1 %v7871_v51  ;;  %v432_v51 = vld [vmem:[%s10604_s1 + $0xad8] sm:$0xff] }
 0x1a6   :  { %4666 = vmatpush1.bf16.msra.mxu0 %v6452_v32  ;;  %5118 = vmatpush1.bf16.msra.mxu1 %v6454_v40  ;;  %v6479_v39 = vcombine.high %v432_v51, %v436_v63  ;;  %v6478_v15 = vcombine.low %v432_v51, %v436_v63  ;;  %v6502_v32 = vcombine.low %v456_v54, %v460_v30 }
 0x1a7   :  { %4667 = vmatprep.subr.bf16.mxu0 %v6461_v58  ;;  %5119 = vmatprep.subr.bf16.mxu1 %v6463_v0  ;;  %v6509_v40 = vcombine.high %v463_v52, %v467_v17  ;;  %v475_v0 = vld [vmem:[%s10604_s1 + $0xc30] sm:$0xff]  ;;  %v6518_v63 = vcombine.low %v472_v34, %v476_v47 }
 0x1a8   :  { %4618 = vmatprep.mubr.bf16.mxu0 %v7882_v2  ;;  %5070 = vmatprep.mubr.bf16.mxu1 %v7882_v2  ;;  %v439_v2 = vld [vmem:[%s10604_s1 + $0xb10] sm:$0xff] }
 0x1a9   :  { %v6485_v49 = vcombine.high %v439_v2, %v443_v12  ;;  %v6484_v3 = vcombine.low %v439_v2, %v443_v12  ;;  %v9090_v2 = vld [vmem:[%s10604_s1 + $0xc98] sm:$0xff] }
 0x1aa   :  { %4668 = vmatpush1.bf16.msra.mxu0 %v6460_v42  ;;  %5120 = vmatpush1.bf16.msra.mxu1 %v6462_v20  ;;  %v6519_v20 = vcombine.high %v472_v34, %v476_v47  ;;  %v9095_v12 = vld [vmem:[%s10604_s1 + $0xcb8] sm:$0xff] }
 0x1ab   :  { %4669 = vmatprep.subr.bf16.mxu0 %v6469_v28  ;;  %5121 = vmatprep.subr.bf16.mxu1 %v6471_v33  ;;  %v479_v28 = vld [vmem:[%s10604_s1 + $0xc50] sm:$0xff]  ;;  %v6534_v54 = vcombine.low %v9090_v2, %v9095_v12  ;;  %v9207_v34 = vld [vmem:[%s10604_s1 + $0xd98] sm:$0xff] }
 0x1ac   :  { %v483_v33 = vld [vmem:[%s10604_s1 + $0xc70] sm:$0xff]  ;;  %v9212_v47 = vld [vmem:[%s10604_s1 + $0xdb8] sm:$0xff] }
 0x1ad   :  { %4619 = vmatmul.mubr.bf16.gmra.mrb[52].mxu0 %v7909_v53  ;;  %5071 = vmatmul.mubr.bf16.gmra.mrb[52].mxu1 %v7909_v53  ;;  %v448_v53 = vld [vmem:[%s10604_s1 + $0xb58] sm:$0xff]  ;;  %v6524_v41 = vcombine.low %v479_v28, %v483_v33 }
 0x1ae   :  { %4670 = vmatpush1.bf16.msra.mxu0 %v6468_v60  ;;  %5122 = vmatpush1.bf16.msra.mxu1 %v6470_v38  ;;  %v6495_v6 = vcombine.high %v448_v53, %v452_v21  ;;  %v6494_v55 = vcombine.low %v448_v53, %v452_v21  ;;  %v6525_v60 = vcombine.high %v479_v28, %v483_v33  ;;  %v9136_v21 = vld [vmem:[%s10604_s1 + $0xd18] sm:$0xff]  ;;  %v9225_v28 = vld [vmem:[%s10604_s1 + $0xdd0] sm:$0xff] }
 0x1af   :  { %4671 = vmatprep.subr.bf16.mxu0 %v6477_v16  ;;  %5123 = vmatprep.subr.bf16.mxu1 %v6479_v39  ;;  %v9082_v16 = vld [vmem:[%s10604_s1 + $0xcb0] sm:$0xff]  ;;  %v9084_v39 = vshrl.u32 %v599_v50, 7  ;;  %v6535_v53 = vcombine.high %v9090_v2, %v9095_v12  ;;  %v9235_v50 = vld [vmem:[%s10604_s1 + $0xdd8] sm:$0xff] }
 0x1b0   :  { %4628 = vmatprep.mubr.bf16.mxu0 %v7920_v35  ;;  %5080 = vmatprep.mubr.bf16.mxu1 %v7920_v35  ;;  %v455_v35 = vld [vmem:[%s10604_s1 + $0xb90] sm:$0xff] }
 0x1b1   :  { %v6501_v18 = vcombine.high %v455_v35, %v459_v1  ;;  %v6500_v13 = vcombine.low %v455_v35, %v459_v1  ;;  %10690 = vst [vmem:[#allocation25_spill] sm:$0xff] %v9084_v39  ;;  %v605_v35 = vsub.s32 1, %v9084_v39  ;;  %v9230_v33 = vld [vmem:[%s10604_s1 + $0xdf0] sm:$0xff] }
 0x1b2   :  { %4672 = vmatpush1.bf16.msra.mxu0 %v6476_v7  ;;  %5124 = vmatpush1.bf16.msra.mxu1 %v6478_v15  ;;  %v9106_v7 = vld [vmem:[%s10604_s1 + $0xcf0] sm:$0xff]  ;;  %v9111_v15 = vld [vmem:[%s10604_s1 + $0xcd8] sm:$0xff] }
 0x1b3   :  { %4673 = vmatprep.subr.bf16.mxu0 %v6485_v49  ;;  %5125 = vmatprep.subr.bf16.mxu1 %v6487_v11  ;;  %v9118_v11 = vld [vmem:[%s10604_s1 + $0xcf8] sm:$0xff]  ;;  %v6540_v30 = vcombine.low %v9101_v57, %v9106_v7 }
 0x1b4   :  { %v6542_v52 = vcombine.low %v9111_v15, %v9118_v11  ;;  %v6543_v17 = vcombine.high %v9111_v15, %v9118_v11  ;;  %v9396_v15 = vld [vmem:[%s10604_s1 + $0xf18] sm:$0xff] }
 0x1b5   :  { %4629 = vmatmul.mubr.bf16.gmra.mrb[56].mxu0 %v7947_v56  ;;  %5081 = vmatmul.mubr.bf16.gmra.mrb[56].mxu1 %v7947_v56  ;;  %v464_v56 = vld [vmem:[%s10604_s1 + $0xbd8] sm:$0xff] }
 0x1b6   :  { %4674 = vmatpush1.bf16.msra.mxu0 %v6484_v3  ;;  %5126 = vmatpush1.bf16.msra.mxu1 %v6486_v48  ;;  %v6511_v58 = vcombine.high %v464_v56, %v468_v22  ;;  %v6510_v26 = vcombine.low %v464_v56, %v468_v22  ;;  %v9141_v3 = vld [vmem:[%s10604_s1 + $0xd38] sm:$0xff]  ;;  %v597_v48 = vld [vmem:[%s10606_s2] sm:$0xff]  ;;  %v6549_v56 = vcombine.high %v9123_v59, %v9128_v14 }
 0x1b7   :  { %4675 = vmatprep.subr.bf16.mxu0 %v6493_v23  ;;  %5127 = vmatprep.subr.bf16.mxu1 %v6495_v6  ;;  %v601_v23 = vsub.s32 0, %v9084_v39  ;;  %v609_v6 = vsub.s32 2, %v9084_v39  ;;  %v5711_v22 = vld [vmem:[%s10607_s3] sm:$0xff]  ;;  %v9401_v11 = vld [vmem:[%s10604_s1 + $0xf38] sm:$0xff] }
 0x1b8   :  { %4638 = vmatprep.mubr.bf16.mxu0 %v7958_v8  ;;  %5090 = vmatprep.mubr.bf16.mxu1 %v7958_v8  ;;  %v471_v8 = vld [vmem:[%s10604_s1 + $0xc10] sm:$0xff]  ;;  %v9266_v12 = vrot.slane %v5711_v22, %v605_v35 }
 0x1b9   :  { %v6517_v42 = vcombine.high %v471_v8, %v475_v0  ;;  %v6516_v51 = vcombine.low %v471_v8, %v475_v0  ;;  %v6551_v8 = vcombine.high %v9136_v21, %v9141_v3  ;;  %v9202_v0 = vld [vmem:[%s10604_s1 + $0xdb0] sm:$0xff]  ;;  %v9264_v2 = vrot.slane %v5711_v22, %v609_v6 }
 0x1ba   :  { %4676 = vmatpush1.bf16.msra.mxu0 %v6492_v4  ;;  %5128 = vmatpush1.bf16.msra.mxu1 %v6494_v55  ;;  %v613_v4 = vsub.s32 3, %v9084_v39  ;;  %v9160_v55 = vld [vmem:[%s10604_s1 + $0xd50] sm:$0xff] }
 0x1bb   :  { %4677 = vmatprep.subr.bf16.mxu0 %v6501_v18  ;;  %5129 = vmatprep.subr.bf16.mxu1 %v6503_v36  ;;  %v9170_v18 = vld [vmem:[%s10604_s1 + $0xd58] sm:$0xff]  ;;  %v6541_v36 = vcombine.high %v9101_v57, %v9106_v7  ;;  %v9374_v7 = vld [vmem:[%s10604_s1 + $0xf10] sm:$0xff] }
 0x1bc   :  { %v9369_v57 = vld [vmem:[%s10604_s1 + $0xef8] sm:$0xff] }
 0x1bd   :  { %4639 = vmatmul.mubr.bf16.gmra.mrb[60].mxu0 %v7985_v27  ;;  %5091 = vmatmul.mubr.bf16.gmra.mrb[60].mxu1 %v7985_v27  ;;  %v480_v27 = vld [vmem:[%s10604_s1 + $0xc58] sm:$0xff] }
 0x1be   :  { %4678 = vmatpush1.bf16.msra.mxu0 %v6500_v13  ;;  %5130 = vmatpush1.bf16.msra.mxu1 %v6502_v32  ;;  %v6527_v38 = vcombine.high %v480_v27, %v484_v37  ;;  %v9186_v13 = vld [vmem:[%s10604_s1 + $0xd78] sm:$0xff]  ;;  %v9191_v32 = vld [vmem:[%s10604_s1 + $0xd90] sm:$0xff] }
 0x1bf   :  { %4679 = vmatprep.subr.bf16.mxu0 %v6509_v40  ;;  %5131 = vmatprep.subr.bf16.mxu1 %v6511_v58  ;;  %v6548_v40 = vcombine.low %v9123_v59, %v9128_v14  ;;  %v9466_v58 = vld [vmem:[%s10604_s1 + $0xf98] sm:$0xff]  ;;  %v10695_v59 = vcombine.low %v9136_v21, %v9141_v3  ;;  %v9493_v21 = vld [vmem:[%s10604_s1 + $0xff0] sm:$0xff] }
 0x1c0   :  { %4681 = vmatprep.mubr.bf16.mxu0 %v7996_v44  ;;  %5133 = vmatprep.mubr.bf16.mxu1 %v7996_v44  ;;  %v9077_v44 = vld [vmem:[%s10604_s1 + $0xc90] sm:$0xff]  ;;  %10693 = vst [vmem:[#allocation28_spill] sm:$0xff] %v9466_v58  ;;  %10698 = vst [vmem:[#allocation31_spill] sm:$0xff] %v9493_v21 }
 0x1c1   :  { %v6533_v49 = vcombine.high %v9077_v44, %v9082_v16  ;;  %v6532_v1 = vcombine.low %v9077_v44, %v9082_v16  ;;  %v9259_v44 = vld [vmem:[%s10604_s1 + $0xe30] sm:$0xff]  ;;  %v9262_v16 = vrot.slane %v5711_v22, %v601_v23 }
 0x1c2   :  { %4680 = vmatpush1.bf16.msra.mxu0 %v6508_v25  ;;  %5132 = vmatpush1.bf16.msra.mxu1 %v6510_v26  ;;  %v9214_v25 = vrot.slane %v597_v48, %v601_v23  ;;  %v9216_v26 = vrot.slane %v597_v48, %v609_v6  ;;  %v9292_v23 = vld [vmem:[%s10604_s1 + $0xe70] sm:$0xff]  ;;  %v9297_v6 = vld [vmem:[%s10604_s1 + $0xe58] sm:$0xff] }
 0x1c3   :  { %4762 = vmatprep.subr.bf16.mxu0 %v6517_v42  ;;  %5214 = vmatprep.subr.bf16.mxu1 %v6519_v20  ;;  %v9218_v42 = vrot.slane %v597_v48, %v605_v35  ;;  %v9302_v35 = vld [vmem:[%s10604_s1 + $0xe78] sm:$0xff]  ;;  %v9446_v20 = vld [vmem:[%s10604_s1 + $0xf90] sm:$0xff] }
 0x1c5   :  { %4682 = vmatmul.mubr.bf16.vlgmr.msra.gmra.mrb[32].mxu0 %v8022_v5  ;;  %5134 = vmatmul.mubr.bf16.vlgmr.msra.gmra.mrb[32].mxu1 %v8022_v5  ;;  %v6526_v5 = vcombine.low %v480_v27, %v484_v37  ;;  %v9238_v27 = vrot.slane %v597_v48, %v613_v4  ;;  %v9338_v48 = vld [vmem:[%s10604_s1 + $0xeb8] sm:$0xff] }
 0x1c6   :  { %4763 = vmatpush1.bf16.msra.mxu0 %v6516_v51  ;;  %5215 = vmatpush1.bf16.msra.mxu1 %v6518_v63  ;;  %v9364_v37 = vld [vmem:[%s10604_s1 + $0xed8] sm:$0xff]  ;;  %v9451_v51 = vld [vmem:[%s10604_s1 + $0xfb0] sm:$0xff] }
 0x1c7   :  { %4764 = vmatprep.subr.bf16.mxu0 %v6525_v60  ;;  %5216 = vmatprep.subr.bf16.mxu1 %v6527_v38  ;;  %v9249_v60 = vld [vmem:[%s10604_s1 + $0xdf8] sm:$0xff]  ;;  %v9254_v38 = vld [vmem:[%s10604_s1 + $0xe10] sm:$0xff]  ;;  %10692 = vst [vmem:[#allocation27_spill] sm:$0xff] %v9451_v51 }
 0x1c8   :  { %4691 = vmatprep.mubr.bf16.mxu0 %v8034_v19  ;;  %5143 = vmatprep.mubr.bf16.mxu1 %v8034_v19  ;;  %v9165_v19 = vld [vmem:[%s10604_s1 + $0xd70] sm:$0xff]  ;;  %v9441_v63 = vld [vmem:[%s10604_s1 + $0xf78] sm:$0xff] }
 0x1c9   :  { %10691 = vst [vmem:[#allocation26_spill] sm:$0xff] %v9441_v63  ;;  %v10696_v14 = vcombine.high %v9160_v55, %v9165_v19 }
 0x1ca   :  { %4765 = vmatpush1.bf16.msra.mxu0 %v6524_v41  ;;  %5217 = vmatpush1.bf16.msra.mxu1 %v6526_v5  ;;  %v9271_v41 = vld [vmem:[%s10604_s1 + $0xe18] sm:$0xff] }
 0x1cb   :  { %4766 = vmatprep.subr.bf16.mxu0 %v6533_v49  ;;  %5218 = vmatprep.subr.bf16.mxu1 %v6535_v53  ;;  %v9276_v5 = vld [vmem:[%s10604_s1 + $0xe38] sm:$0xff]  ;;  %v9283_v49 = vrot.slane %v5711_v22, %v613_v4  ;;  %v9417_v4 = vld [vmem:[%s10604_s1 + $0xf50] sm:$0xff] }
 0x1cc   :  { %v9324_v22 = vld [vmem:[%s10604_s1 + $0xe98] sm:$0xff]  ;;  %v9488_v53 = vld [vmem:[%s10604_s1 + $0xfd0] sm:$0xff] }
 0x1cd   :  { %4692 = vmatmul.mubr.bf16.gmra.mrb[36].mxu0 %v8061_v45  ;;  %5144 = vmatmul.mubr.bf16.gmra.mrb[36].mxu1 %v8061_v45  ;;  %v9281_v45 = vld [vmem:[%s10604_s1 + $0xe50] sm:$0xff]  ;;  %10697 = vst [vmem:[#allocation30_spill] sm:$0xff] %v9488_v53 }
 0x1ce   :  { %4767 = vmatpush1.bf16.msra.mxu0 %v6532_v1  ;;  %5219 = vmatpush1.bf16.msra.mxu1 %v6534_v54  ;;  %v9348_v1 = vld [vmem:[%s10604_s1 + $0xef0] sm:$0xff] }
 0x1cf   :  { %4768 = vmatprep.subr.bf16.mxu0 %v6541_v36  ;;  %5220 = vmatprep.subr.bf16.mxu1 %v6543_v17  ;;  %v9314_v36 = vld [vmem:[%s10604_s1 + $0xe90] sm:$0xff] }
 0x1d0   :  { %4701 = vmatprep.mubr.bf16.mxu0 %v8072_v62  ;;  %v9319_v17 = vld [vmem:[%s10604_s1 + $0xeb0] sm:$0xff]  ;;  %5153 = vmatprep.mubr.bf16.mxu1 %v8072_v62 }
 0x1d1   :  { %v9343_v62 = vld [vmem:[%s10604_s1 + $0xed0] sm:$0xff] }
 0x1d2   :  { %4769 = vmatpush1.bf16.msra.mxu0 %v6540_v30  ;;  %5221 = vmatpush1.bf16.msra.mxu1 %v6542_v52  ;;  %v9391_v54 = vld [vmem:[%s10604_s1 + $0xf30] sm:$0xff]  ;;  %v9427_v52 = vld [vmem:[%s10604_s1 + $0xf58] sm:$0xff] }
 0x1d3   :  { %4770 = vmatprep.subr.bf16.mxu0 %v6549_v56  ;;  %5222 = vmatprep.subr.bf16.mxu1 %v6551_v8  ;;  %v9422_v8 = vld [vmem:[%s10604_s1 + $0xf70] sm:$0xff] }
 0x1d5   :  { %4702 = vmatmul.mubr.bf16.gmra.mrb[40].mxu0 %v8099_v24  ;;  %5154 = vmatmul.mubr.bf16.gmra.mrb[40].mxu1 %v8099_v24  ;;  %v9471_v24 = vld [vmem:[%s10604_s1 + $0xfb8] sm:$0xff] }
 0x1d6   :  { %4771 = vmatpush1.bf16.msra.mxu0 %v6548_v40  ;;  %10694 = vst [vmem:[#allocation29_spill] sm:$0xff] %v9471_v24  ;;  %5223 = vmatpush1.bf16.msra.mxu1 %v10695_v59  ;;  %v10699_v59 = vcombine.high %v9170_v18, %v9186_v13  ;;  %v10703_v24 = vcombine.high %v9207_v34, %v9212_v47 }
 0x1d7   :  { %4772 = vmatprep.subr.bf16.mxu0 %v10696_v14  ;;  %4711 = vmatprep.mubr.bf16.mxu0 %v8110_v43  ;;  %v10702_v14 = vcombine.high %v9191_v32, %v9202_v0 }
 0x1d8   :  { %v3892_v3 = vpop.f32.mrb[0].mxu0  ;;  %5224 = vmatprep.subr.bf16.mxu1 %v10699_v59  ;;  %v4344_v39 = vpop.f32.mrb[0].mxu1  ;;  %5163 = vmatprep.mubr.bf16.mxu1 %v8110_v43  ;;  %v10701_v43 = vcombine.low %v9170_v18, %v9186_v13  ;;  %v10705_v13 = vcombine.low %v9207_v34, %v9212_v47 }
 0x1d9   :  { %v6640_v40 = vadd.f32 %v3892_v3, %v9214_v25  ;;  %v3894_v31 = vpop.f32.mrb[1].mxu0  ;;  %v6672_v30 = vadd.f32 %v4344_v39, %v9216_v26  ;;  %v4346_v56 = vpop.f32.mrb[1].mxu1  ;;  %v10700_v3 = vcombine.low %v9160_v55, %v9165_v19 }
 0x1da   :  { %v6641_v9 = vadd.f32 %v3894_v31, %v9218_v42  ;;  %v3896_v63 = vpop.f32.mrb[2].mxu0  ;;  %v9530_v31 = vld [vmem:[%s10604_s1 + $0xff8] sm:$0xff]  ;;  %v6673_v55 = vadd.f32 %v4346_v56, %v9238_v27  ;;  %5225 = vmatpush1.bf16.msra.mxu1 %v10701_v43 }
 0x1db   :  { %4773 = vmatpush1.bf16.msra.mxu0 %v10700_v3  ;;  %vm5327_vm0 = vcmp.ge.f32.partialorder %v6640_v40, 0.0  ;;  %v5455_v39 = vmul.f32 0.01, %v6640_v40  ;;  %v6642_v19 = vadd.f32 %v3896_v63, %v9214_v25  ;;  %v4348_v3 = vpop.f32.mrb[2].mxu1  ;;  %v3898_v59 = vpop.f32.mrb[3].mxu0  ;;  %vm5329_vm1 = vcmp.ge.f32.partialorder %v6672_v30, 0.0  ;;  %5226 = vmatprep.subr.bf16.mxu1 %v10703_v24 }
 0x1dc   :  { %4774 = vmatprep.subr.bf16.mxu0 %v10702_v14  ;;  %v5457_v21 = vmul.f32 0.01, %v6672_v30  ;;  %vm5328_vm2 = vcmp.ge.f32.partialorder %v6641_v9, 0.0  ;;  %v5456_v53 = vmul.f32 0.01, %v6641_v9  ;;  %v4350_v63 = vpop.f32.mrb[3].mxu1  ;;  %v10704_v24 = vcombine.low %v9191_v32, %v9202_v0 }
 0x1dd   :  { %v5583_v56 = vsel %vm5327_vm0, %v6640_v40, %v5455_v39  ;;  %vm5335_vm3 = vcmp.ge.f32.partialorder %v6642_v19, 0.0  ;;  %4712 = vmatmul.mubr.bf16.gmra.mrb[44].mxu0 %v8137_v10  ;;  %v5463_v51 = vmul.f32 0.01, %v6642_v19  ;;  %5164 = vmatmul.mubr.bf16.gmra.mrb[44].mxu1 %v8137_v10  ;;  %vm5330_vm4 = vcmp.ge.f32.partialorder %v6673_v55, 0.0 }
 0x1de   :  { %v5753_v14 = vmul.f32 %v9262_v16, %v5583_v56  ;;  %v5585_v43 = vsel %vm5329_vm1, %v6672_v30, %v5457_v21  ;;  %v5584_v58 = vsel %vm5328_vm2, %v6641_v9, %v5456_v53  ;;  %v5458_v39 = vmul.f32 0.01, %v6673_v55  ;;  %5227 = vmatpush1.bf16.msra.mxu1 %v10705_v13  ;;  %4721 = vmatprep.mubr.bf16.mxu0 %v8148_v29 }
 0x1df   :  { %4775 = vmatpush1.bf16.msra.mxu0 %v10704_v24  ;;  %v5754_v40 = vmul.f32 %v9266_v12, %v5584_v58  ;;  %v6674_v18 = vadd.f32 %v4348_v3, %v9216_v26  ;;  %v9559_v30 = vmul.f32 %v9264_v2, %v5585_v43  ;;  %v5591_v9 = vsel %vm5335_vm3, %v6642_v19, %v5463_v51 }
 0x1e0   :  { %v6643_v10 = vadd.f32 %v3898_v59, %v9218_v42  ;;  %v6675_v32 = vadd.f32 %v4350_v63, %v9238_v27  ;;  %v3902_v0 = vpop.f32.mrb[4].mxu0  ;;  %v10706_v58 = vcombine.high %v9225_v28, %v9230_v33  ;;  %v5761_v21 = vmul.f32 %v9262_v16, %v5591_v9  ;;  %v4354_v47 = vpop.f32.mrb[4].mxu1  ;;  %5173 = vmatprep.mubr.bf16.mxu1 %v8148_v29 }
 0x1e1   :  { %v9567_v53 = vadd.f32 %v5754_v40, %v5753_v14  ;;  %vm5337_vm5 = vcmp.ge.f32.partialorder %v6674_v18, 0.0  ;;  %v5465_v34 = vmul.f32 0.01, %v6674_v18  ;;  %v3904_v3 = vpop.f32.mrb[5].mxu0  ;;  %v10707_v51 = vcombine.high %v9235_v50, %v9249_v60  ;;  %v4356_v24 = vpop.f32.mrb[5].mxu1 }
 0x1e2   :  { %4776 = vmatprep.subr.bf16.mxu0 %v10706_v58  ;;  %vm5336_vm6 = vcmp.ge.f32.partialorder %v6643_v10, 0.0  ;;  %v5464_v59 = vmul.f32 0.01, %v6643_v10  ;;  %vm5338_vm7 = vcmp.ge.f32.partialorder %v6675_v32, 0.0  ;;  %v5466_v19 = vmul.f32 0.01, %v6675_v32 }
 0x1e3   :  { %5228 = vmatprep.subr.bf16.mxu1 %v10707_v51  ;;  %v10708_v56 = vcombine.low %v9225_v28, %v9230_v33  ;;  %v5593_v63 = vsel %vm5337_vm5, %v6674_v18, %v5465_v34  ;;  %v6644_v13 = vadd.f32 %v3902_v0, %v9214_v25  ;;  %v6676_v14 = vadd.f32 %v4354_v47, %v9216_v26  ;;  %v3906_v40 = vpop.f32.mrb[6].mxu0  ;;  %v4358_v18 = vpop.f32.mrb[6].mxu1 }
 0x1e4   :  { %v6645_v43 = vadd.f32 %v3904_v3, %v9218_v42  ;;  %v10709_v9 = vcombine.low %v9235_v50, %v9249_v60  ;;  %v5586_v58 = vsel %vm5330_vm4, %v6673_v55, %v5458_v39  ;;  %v5763_v28 = vmul.f32 %v9264_v2, %v5593_v63  ;;  %v3908_v34 = vpop.f32.mrb[7].mxu0  ;;  %v4360_v60 = vpop.f32.mrb[7].mxu1 }
 0x1e5   :  { %4777 = vmatpush1.bf16.msra.mxu0 %v10708_v56  ;;  %v5592_v33 = vsel %vm5336_vm6, %v6643_v10, %v5464_v59  ;;  %v6677_v29 = vadd.f32 %v4356_v24, %v9238_v27  ;;  %v10710_v0 = vcombine.high %v9254_v38, %v9259_v44  ;;  %v5594_v3 = vsel %vm5338_vm7, %v6675_v32, %v5466_v19 }
 0x1e6   :  { %5229 = vmatpush1.bf16.msra.mxu1 %v10709_v9  ;;  %v5762_v47 = vmul.f32 %v9266_v12, %v5592_v33  ;;  %vm5343_vm8 = vcmp.ge.f32.partialorder %v6644_v13, 0.0  ;;  %v5471_v50 = vmul.f32 0.01, %v6644_v13  ;;  %4722 = vmatmul.mubr.bf16.gmra.mrb[48].mxu0 %v8175_v61  ;;  %v10711_v55 = vcombine.high %v9271_v41, %v9276_v5 }
 0x1e7   :  { %4778 = vmatprep.subr.bf16.mxu0 %v10710_v0  ;;  %vm5345_vm9 = vcmp.ge.f32.partialorder %v6676_v14, 0.0  ;;  %v5473_v39 = vmul.f32 0.01, %v6676_v14  ;;  %vm5344_vm10 = vcmp.ge.f32.partialorder %v6645_v43, 0.0  ;;  %v5472_v10 = vmul.f32 0.01, %v6645_v43  ;;  %5174 = vmatmul.mubr.bf16.gmra.mrb[48].mxu1 %v8175_v61 }
 0x1e8   :  { %5230 = vmatprep.subr.bf16.mxu1 %v10711_v55  ;;  %v10712_v51 = vcombine.low %v9254_v38, %v9259_v44  ;;  %v5890_v32 = vadd.f32 %v5762_v47, %v5761_v21  ;;  %v5599_v59 = vsel %vm5343_vm8, %v6644_v13, %v5471_v50  ;;  %vm5346_vm11 = vcmp.ge.f32.partialorder %v6677_v29, 0.0  ;;  %v3912_v44 = vpop.f32.mrb[8].mxu0  ;;  %v10716_v47 = vld [vmem:[#allocation3_spill] sm:$0xff] }
 0x1e9   :  { %v5474_v19 = vmul.f32 0.01, %v6677_v29  ;;  %v10713_v56 = vcombine.low %v9271_v41, %v9276_v5  ;;  %v10714_v63 = vcombine.high %v9281_v45, %v9292_v23  ;;  %v9607_v24 = vmul.f32 %v9283_v49, %v5586_v58  ;;  %v4364_v58 = vpop.f32.mrb[8].mxu1  ;;  %v3914_v0 = vpop.f32.mrb[9].mxu0  ;;  %4731 = vmatprep.mubr.bf16.mxu0 %v10716_v47  ;;  %5183 = vmatprep.mubr.bf16.mxu1 %v10716_v47 }
 0x1ea   :  { %4779 = vmatpush1.bf16.msra.mxu0 %v10712_v51  ;;  %v5769_v61 = vmul.f32 %v9262_v16, %v5599_v59  ;;  %v5600_v9 = vsel %vm5344_vm10, %v6645_v43, %v5472_v10  ;;  %v6646_v38 = vadd.f32 %v3906_v40, %v9214_v25  ;;  %v10715_v21 = vcombine.high %v9297_v6, %v9302_v35  ;;  %v4366_v55 = vpop.f32.mrb[9].mxu1  ;;  %v3916_v10 = vpop.f32.mrb[10].mxu0 }
 0x1eb   :  { %5231 = vmatpush1.bf16.msra.mxu1 %v10713_v56  ;;  %4780 = vmatprep.subr.bf16.mxu0 %v10714_v63  ;;  %v5764_v41 = vmul.f32 %v9283_v49, %v5594_v3  ;;  %v5891_v5 = vadd.f32 %v5890_v32, %v5763_v28  ;;  %v9616_v13 = vsel %vm5345_vm9, %v6676_v14, %v5473_v39  ;;  %v4368_v51 = vpop.f32.mrb[10].mxu1  ;;  %v3918_v32 = vpop.f32.mrb[11].mxu0 }
 0x1ec   :  { %5232 = vmatprep.subr.bf16.mxu1 %v10715_v21  ;;  %v5770_v33 = vmul.f32 %v9266_v12, %v5600_v9  ;;  %v9621_v43 = vsel %vm5346_vm11, %v6677_v29, %v5474_v19  ;;  %vm5351_vm12 = vcmp.ge.f32.partialorder %v6646_v38, 0.0  ;;  %v5479_v40 = vmul.f32 0.01, %v6646_v38  ;;  %v9638_v19 = vpop.f32.mrb[11].mxu1 }
 0x1ed   :  { %v6678_v50 = vadd.f32 %v4358_v18, %v9216_v26  ;;  %v10717_v28 = vcombine.low %v9281_v45, %v9292_v23  ;;  %v9628_v14 = vadd.f32 %v5891_v5, %v5764_v41  ;;  %v6647_v39 = vadd.f32 %v3908_v34, %v9218_v42 }
 0x1ee   :  { %v9630_v3 = vadd.f32 %v5770_v33, %v5769_v61  ;;  %v6679_v29 = vadd.f32 %v4360_v60, %v9238_v27  ;;  %v10718_v18 = vcombine.low %v9297_v6, %v9302_v35  ;;  %v5607_v59 = vsel %vm5351_vm12, %v6646_v38, %v5479_v40  ;;  %v10721_v35 = vld [vmem:[#allocation4_spill] sm:$0xff] }
 0x1ef   :  { %4781 = vmatpush1.bf16.msra.mxu0 %v10717_v28  ;;  %vm5353_vm13 = vcmp.ge.f32.partialorder %v6678_v50, 0.0  ;;  %v5481_v45 = vmul.f32 0.01, %v6678_v50  ;;  %v6648_v23 = vadd.f32 %v3912_v44, %v9214_v25  ;;  %v10719_v56 = vcombine.high %v9314_v36, %v9319_v17  ;;  %5184 = vmatmul.mubr.bf16.gmra.mrb[52].mxu1 %v10721_v35 }
 0x1f0   :  { %5233 = vmatpush1.bf16.msra.mxu1 %v10718_v18  ;;  %v10720_v34 = vcombine.high %v9324_v22, %v9338_v48  ;;  %v5777_v60 = vmul.f32 %v9262_v16, %v5607_v59  ;;  %vm5352_vm14 = vcmp.ge.f32.partialorder %v6647_v39, 0.0  ;;  %v5480_v6 = vmul.f32 0.01, %v6647_v39  ;;  %4732 = vmatmul.mubr.bf16.gmra.mrb[52].mxu0 %v10721_v35  ;;  %v3922_v18 = vpop.f32.mrb[12].mxu0 }
 0x1f1   :  { %4782 = vmatprep.subr.bf16.mxu0 %v10719_v56  ;;  %vm5354_vm15 = vcmp.ge.f32.partialorder %v6679_v29, 0.0  ;;  %v5609_v63 = vsel %vm5353_vm13, %v6678_v50, %v5481_v45  ;;  %v5482_v61 = vmul.f32 0.01, %v6679_v29  ;;  %vm5359_vm0 = vcmp.ge.f32.partialorder %v6648_v23, 0.0 }
 0x1f2   :  { %5234 = vmatprep.subr.bf16.mxu1 %v10720_v34  ;;  %v5487_v9 = vmul.f32 0.01, %v6648_v23  ;;  %v10722_v38 = vcombine.low %v9314_v36, %v9319_v17  ;;  %v5779_v44 = vmul.f32 %v9264_v2, %v5609_v63  ;;  %v5608_v21 = vsel %vm5352_vm14, %v6647_v39, %v5480_v6  ;;  %v4374_v39 = vpop.f32.mrb[12].mxu1 }
 0x1f3   :  { %v6680_v41 = vadd.f32 %v4364_v58, %v9216_v26  ;;  %v6649_v5 = vadd.f32 %v3914_v0, %v9218_v42  ;;  %v10723_v33 = vcombine.low %v9324_v22, %v9338_v48  ;;  %v5778_v47 = vmul.f32 %v9266_v12, %v5608_v21  ;;  %v9665_v48 = vpop.f32.mrb[13].mxu0  ;;  %v9671_v45 = vpop.f32.mrb[13].mxu1 }
 0x1f4   :  { %4783 = vmatpush1.bf16.msra.mxu0 %v10722_v38  ;;  %v5610_v40 = vsel %vm5354_vm15, %v6679_v29, %v5482_v61  ;;  %v5615_v50 = vsel %vm5359_vm0, %v6648_v23, %v5487_v9  ;;  %v6681_v28 = vadd.f32 %v4366_v55, %v9238_v27  ;;  %v10724_v36 = vcombine.high %v9343_v62, %v9348_v1  ;;  %v10726_v29 = vld [vmem:[#allocation5_spill] sm:$0xff]  ;;  %v9673_v23 = vpop.f32.mrb[14].mxu0 }
 0x1f5   :  { %5235 = vmatpush1.bf16.msra.mxu1 %v10723_v33  ;;  %v5780_v17 = vmul.f32 %v9283_v49, %v5610_v40  ;;  %v5785_v58 = vmul.f32 %v9262_v16, %v5615_v50  ;;  %vm5361_vm1 = vcmp.ge.f32.partialorder %v6680_v41, 0.0  ;;  %v5489_v0 = vmul.f32 0.01, %v6680_v41  ;;  %4741 = vmatprep.mubr.bf16.mxu0 %v10726_v29  ;;  %v9686_v9 = vpop.f32.mrb[15].mxu0 }
 0x1f6   :  { %4784 = vmatprep.subr.bf16.mxu0 %v10724_v36  ;;  %v10725_v22 = vcombine.high %v9364_v37, %v9369_v57  ;;  %v5908_v55 = vadd.f32 %v5778_v47, %v5777_v60  ;;  %vm5360_vm2 = vcmp.ge.f32.partialorder %v6649_v5, 0.0  ;;  %v5488_v59 = vmul.f32 0.01, %v6649_v5  ;;  %5193 = vmatprep.mubr.bf16.mxu1 %v10726_v29  ;;  %v9681_v60 = vpop.f32.mrb[14].mxu1  ;;  %v10731_v47 = vld [vmem:[#allocation6_spill] sm:$0xff] }
 0x1f7   :  { %vm5362_vm3 = vcmp.ge.f32.partialorder %v6681_v28, 0.0  ;;  %v10727_v56 = vcombine.low %v9343_v62, %v9348_v1  ;;  %v5617_v34 = vsel %vm5361_vm1, %v6680_v41, %v5489_v0  ;;  %v5490_v6 = vmul.f32 0.01, %v6681_v28  ;;  %5194 = vmatmul.mubr.bf16.gmra.mrb[56].mxu1 %v10731_v47 }
 0x1f8   :  { %5236 = vmatprep.subr.bf16.mxu1 %v10725_v22  ;;  %v6650_v35 = vadd.f32 %v3916_v10, %v9214_v25  ;;  %v6682_v63 = vadd.f32 %v4368_v51, %v9216_v26  ;;  %v10728_v61 = vcombine.low %v9364_v37, %v9369_v57  ;;  %v10729_v1 = vcombine.high %v9374_v7, %v9391_v54  ;;  %v9694_v51 = vpop.f32.mrb[15].mxu1 }
 0x1f9   :  { %4785 = vmatpush1.bf16.msra.mxu0 %v10727_v56  ;;  %v5909_v62 = vadd.f32 %v5908_v55, %v5779_v44  ;;  %v5787_v38 = vmul.f32 %v9264_v2, %v5617_v34  ;;  %v5616_v21 = vsel %vm5360_vm2, %v6649_v5, %v5488_v59  ;;  %v6651_v10 = vadd.f32 %v3918_v32, %v9218_v42 }
 0x1fa   :  { %5237 = vmatpush1.bf16.msra.mxu1 %v10728_v61  ;;  %4786 = vmatprep.subr.bf16.mxu0 %v10729_v1  ;;  %v10730_v41 = vcombine.high %v9396_v15, %v9401_v11  ;;  %v5786_v37 = vmul.f32 %v9266_v12, %v5616_v21  ;;  %v5618_v57 = vsel %vm5362_vm3, %v6681_v28, %v5490_v6  ;;  %vm5367_vm4 = vcmp.ge.f32.partialorder %v6650_v35, 0.0  ;;  %v9724_v6 = vpop.f32.mrb[16].mxu1 }
 0x1fb   :  { %v5495_v33 = vmul.f32 0.01, %v6650_v35  ;;  %4742 = vmatmul.mubr.bf16.gmra.mrb[56].mxu0 %v10731_v47  ;;  %v9702_v44 = vadd.f32 %v5909_v62, %v5780_v17  ;;  %v5788_v5 = vmul.f32 %v9283_v49, %v5618_v57  ;;  %vm5369_vm5 = vcmp.ge.f32.partialorder %v6682_v63, 0.0  ;;  %v9730_v61 = vpop.f32.mrb[17].mxu1 }
 0x1fc   :  { %5238 = vmatprep.subr.bf16.mxu1 %v10730_v41  ;;  %v5497_v32 = vmul.f32 0.01, %v6682_v63  ;;  %v10732_v40 = vcombine.low %v9374_v7, %v9391_v54  ;;  %v5917_v50 = vadd.f32 %v5786_v37, %v5785_v58  ;;  %vm5368_vm6 = vcmp.ge.f32.partialorder %v6651_v10, 0.0  ;;  %v3932_v7 = vpop.f32.mrb[16].mxu0  ;;  %v10735_v58 = vld [vmem:[#allocation26_spill] sm:$0xff]  ;;  %v10740_v37 = vld [vmem:[#allocation27_spill] sm:$0xff] }
 0x1fd   :  { %v5623_v36 = vsel %vm5367_vm4, %v6650_v35, %v5495_v33  ;;  %v5496_v28 = vmul.f32 0.01, %v6651_v10  ;;  %v10733_v0 = vcombine.low %v9396_v15, %v9401_v11  ;;  %v10734_v17 = vcombine.high %v9417_v4, %v9422_v8  ;;  %v9726_v35 = vpop.f32.mrb[17].mxu0 }
 0x1fe   :  { %4787 = vmatpush1.bf16.msra.mxu0 %v10732_v40  ;;  %v5793_v22 = vmul.f32 %v9262_v16, %v5623_v36  ;;  %v5625_v29 = vsel %vm5369_vm5, %v6682_v63, %v5497_v32  ;;  %v6683_v55 = vadd.f32 %v9638_v19, %v9238_v27  ;;  %v6652_v54 = vadd.f32 %v3922_v18, %v9214_v25  ;;  %v10737_v63 = vld [vmem:[#allocation7_spill] sm:$0xff]  ;;  %v9732_v1 = vpop.f32.mrb[18].mxu0  ;;  %v10742_v40 = vld [vmem:[#allocation28_spill] sm:$0xff] }
 0x1ff   :  { %5239 = vmatpush1.bf16.msra.mxu1 %v10733_v0  ;;  %4788 = vmatprep.subr.bf16.mxu0 %v10734_v17  ;;  %v10736_v59 = vcombine.high %v9427_v52, %v10735_v58  ;;  %v5918_v56 = vadd.f32 %v5917_v50, %v5787_v38  ;;  %v5795_v15 = vmul.f32 %v9264_v2, %v5625_v29  ;;  %v10743_v50 = vld [vmem:[#allocation29_spill] sm:$0xff] }
 0x200   :  { %v5624_v11 = vsel %vm5368_vm6, %v6651_v10, %v5496_v28  ;;  %v6684_v34 = vadd.f32 %v4374_v39, %v9216_v26  ;;  %4751 = vmatprep.mubr.bf16.mxu0 %v10737_v63  ;;  %vm5370_vm7 = vcmp.ge.f32.partialorder %v6683_v55, 0.0  ;;  %v5498_v18 = vmul.f32 0.01, %v6683_v55  ;;  %5203 = vmatprep.mubr.bf16.mxu1 %v10737_v63  ;;  %v9740_v10 = vpop.f32.mrb[18].mxu1 }
 0x201   :  { %5240 = vmatprep.subr.bf16.mxu1 %v10736_v59  ;;  %v5794_v19 = vmul.f32 %v9266_v12, %v5624_v11  ;;  %vm5375_vm8 = vcmp.ge.f32.partialorder %v6652_v54, 0.0  ;;  %v10738_v62 = vcombine.low %v9417_v4, %v9422_v8  ;;  %v9738_v39 = vadd.f32 %v5918_v56, %v5788_v5  ;;  %v9752_v5 = vpop.f32.mrb[19].mxu0  ;;  %v9754_v32 = vpop.f32.mrb[19].mxu1  ;;  %v10748_v59 = vld [vmem:[#allocation30_spill] sm:$0xff]  ;;  %v10749_v56 = vld [vmem:[#allocation31_spill] sm:$0xff] }
 0x202   :  { %v5503_v38 = vmul.f32 0.01, %v6652_v54  ;;  %vm5377_vm9 = vcmp.ge.f32.partialorder %v6684_v34, 0.0  ;;  %v5505_v21 = vmul.f32 0.01, %v6684_v34  ;;  %v10739_v41 = vcombine.low %v9427_v52, %v10735_v58 }
 0x203   :  { %4789 = vmatpush1.bf16.msra.mxu0 %v10738_v62  ;;  %v10741_v57 = vcombine.high %v9446_v20, %v10740_v37  ;;  %v5926_v33 = vadd.f32 %v5794_v19, %v5793_v22  ;;  %v5626_v4 = vsel %vm5370_vm7, %v6683_v55, %v5498_v18  ;;  %v6653_v8 = vadd.f32 %v9665_v48, %v9218_v42  ;;  %v10745_v48 = vld [vmem:[#allocation8_spill] sm:$0xff]  ;;  %v9782_v19 = vpop.f32.mrb[20].mxu0  ;;  %v10752_v62 = vld [vmem:[#allocation9_spill] sm:$0xff] }
 0x204   :  { %5241 = vmatpush1.bf16.msra.mxu1 %v10739_v41  ;;  %v6685_v47 = vadd.f32 %v9671_v45, %v9238_v27  ;;  %v10744_v52 = vcombine.high %v10742_v40, %v10743_v50  ;;  %v5796_v36 = vmul.f32 %v9283_v49, %v5626_v4  ;;  %v5631_v28 = vsel %vm5375_vm8, %v6652_v54, %v5503_v38 }
 0x205   :  { %4790 = vmatprep.subr.bf16.mxu0 %v10741_v57  ;;  %v5633_v0 = vsel %vm5377_vm9, %v6684_v34, %v5505_v21  ;;  %v6654_v17 = vadd.f32 %v9673_v23, %v9214_v25  ;;  %4752 = vmatmul.mubr.bf16.gmra.mrb[60].mxu0 %v10745_v48  ;;  %v5927_v22 = vadd.f32 %v5926_v33, %v5795_v15  ;;  %vm5376_vm10 = vcmp.ge.f32.partialorder %v6653_v8, 0.0  ;;  %v9794_v57 = vpop.f32.mrb[21].mxu0 }
 0x206   :  { %5242 = vmatprep.subr.bf16.mxu1 %v10744_v52  ;;  %v5801_v45 = vmul.f32 %v9262_v16, %v5631_v28  ;;  %v5803_v29 = vmul.f32 %v9264_v2, %v5633_v0  ;;  %5204 = vmatmul.mubr.bf16.gmra.mrb[60].mxu1 %v10745_v48  ;;  %v10746_v55 = vcombine.low %v9446_v20, %v10740_v37  ;;  %v5504_v58 = vmul.f32 0.01, %v6653_v8 }
 0x207   :  { %vm5378_vm11 = vcmp.ge.f32.partialorder %v6685_v47, 0.0  ;;  %v5506_v54 = vmul.f32 0.01, %v6685_v47  ;;  %vm5383_vm12 = vcmp.ge.f32.partialorder %v6654_v17, 0.0  ;;  %v10747_v23 = vcombine.low %v10742_v40, %v10743_v50  ;;  %4794 = vmatprep.mubr.bf16.mxu0 %v10752_v62  ;;  %5246 = vmatprep.mubr.bf16.mxu1 %v10752_v62 }
 0x208   :  { %4791 = vmatpush1.bf16.msra.mxu0 %v10746_v55  ;;  %v10750_v15 = vcombine.high %v10748_v59, %v10749_v56  ;;  %v9776_v11 = vadd.f32 %v5927_v22, %v5796_v36  ;;  %v5511_v34 = vmul.f32 0.01, %v6654_v17  ;;  %v6686_v63 = vadd.f32 %v9681_v60, %v9216_v26  ;;  %v9792_v60 = vpop.f32.mrb[20].mxu1 }
 0x209   :  { %5243 = vmatpush1.bf16.msra.mxu1 %v10747_v23  ;;  %v6655_v20 = vadd.f32 %v9686_v9, %v9218_v42  ;;  %v10751_v18 = vcombine.high %v9525_v46, %v9530_v31  ;;  %v5632_v38 = vsel %vm5376_vm10, %v6653_v8, %v5504_v58  ;;  %v5634_v21 = vsel %vm5378_vm11, %v6685_v47, %v5506_v54  ;;  %v9800_v8 = vpop.f32.mrb[21].mxu1  ;;  %v9802_v47 = vpop.f32.mrb[22].mxu0  ;;  %v10755_v23 = vld [vmem:[#allocation10_spill] sm:$0xff] }
 0x20a   :  { %4792 = vmatprep.subr.bf16.mxu0 %v10750_v15  ;;  %v6687_v41 = vadd.f32 %v9694_v51, %v9238_v27  ;;  %v6656_v37 = vadd.f32 %v3932_v7, %v9214_v25  ;;  %v5802_v9 = vmul.f32 %v9266_v12, %v5632_v38  ;;  %v5804_v33 = vmul.f32 %v9283_v49, %v5634_v21  ;;  %v9808_v52 = vpop.f32.mrb[22].mxu1 }
 0x20b   :  { %5244 = vmatprep.subr.bf16.mxu1 %v10751_v18  ;;  %v5639_v4 = vsel %vm5383_vm12, %v6654_v17, %v5511_v34  ;;  %vm5385_vm13 = vcmp.ge.f32.partialorder %v6686_v63, 0.0  ;;  %v10753_v51 = vcombine.low %v10748_v59, %v10749_v56  ;;  %v5513_v40 = vmul.f32 0.01, %v6686_v63  ;;  %v9813_v17 = vpop.f32.mrb[23].mxu0  ;;  %v9815_v48 = vpop.f32.mrb[23].mxu1 }
 0x20c   :  { %v5809_v7 = vmul.f32 %v9262_v16, %v5639_v4  ;;  %vm5384_vm14 = vcmp.ge.f32.partialorder %v6655_v20, 0.0  ;;  %v5512_v50 = vmul.f32 0.01, %v6655_v20  ;;  %v10754_v36 = vcombine.low %v9525_v46, %v9530_v31  ;;  %v9832_v62 = vpop.f32.mrb[24].mxu0 }
 0x20d   :  { %4793 = vmatpush1.bf16.msra.mxu0 %v10753_v51  ;;  %v5935_v28 = vadd.f32 %v5802_v9, %v5801_v45  ;;  %vm5386_vm15 = vcmp.ge.f32.partialorder %v6687_v41, 0.0  ;;  %v5514_v0 = vmul.f32 0.01, %v6687_v41  ;;  %vm5391_vm0 = vcmp.ge.f32.partialorder %v6656_v37, 0.0  ;;  %v9840_v9 = vpop.f32.mrb[24].mxu1 }
 0x20e   :  { %5245 = vmatpush1.bf16.msra.mxu1 %v10754_v36  ;;  %v5641_v22 = vsel %vm5385_vm13, %v6686_v63, %v5513_v40  ;;  %v5640_v55 = vsel %vm5384_vm14, %v6655_v20, %v5512_v50  ;;  %v5519_v58 = vmul.f32 0.01, %v6656_v37  ;;  %v6688_v54 = vadd.f32 %v9724_v6, %v9216_v26  ;;  %v10756_v63 = vld [vmem:[#allocation11_spill] sm:$0xff] }
 0x20f   :  { %v5936_v59 = vadd.f32 %v5935_v28, %v5803_v29  ;;  %v5811_v46 = vmul.f32 %v9264_v2, %v5641_v22  ;;  %v5810_v31 = vmul.f32 %v9266_v12, %v5640_v55  ;;  %v5642_v45 = vsel %vm5386_vm15, %v6687_v41, %v5514_v0 }
 0x210   :  { %4795 = vmatmul.mubr.bf16.vlgmr.msra.gmra.mrb[32].mxu0 %v10755_v23  ;;  %v5812_v56 = vmul.f32 %v9283_v49, %v5642_v45  ;;  %v5647_v15 = vsel %vm5391_vm0, %v6656_v37, %v5519_v58  ;;  %vm5393_vm1 = vcmp.ge.f32.partialorder %v6688_v54, 0.0  ;;  %v5521_v34 = vmul.f32 0.01, %v6688_v54 }
 0x211   :  { %5247 = vmatmul.mubr.bf16.vlgmr.msra.gmra.mrb[32].mxu1 %v10755_v23  ;;  %4804 = vmatprep.mubr.bf16.mxu0 %v10756_v63  ;;  %v9827_v6 = vadd.f32 %v5936_v59, %v5804_v33  ;;  %v5944_v20 = vadd.f32 %v5810_v31, %v5809_v7  ;;  %v5817_v29 = vmul.f32 %v9262_v16, %v5647_v15  ;;  %v9842_v33 = vpop.f32.mrb[25].mxu0  ;;  %v9845_v7 = vpop.f32.mrb[25].mxu1  ;;  %v10757_v59 = vld [vmem:[#allocation12_spill] sm:$0xff] }
 0x212   :  { %5256 = vmatprep.mubr.bf16.mxu1 %v10756_v63  ;;  %v6657_v18 = vadd.f32 %v9726_v35, %v9218_v42  ;;  %v5649_v38 = vsel %vm5393_vm1, %v6688_v54, %v5521_v34  ;;  %v6689_v21 = vadd.f32 %v9730_v61, %v9238_v27  ;;  %v6658_v41 = vadd.f32 %v9732_v1, %v9214_v25  ;;  %v9847_v40 = vpop.f32.mrb[26].mxu0  ;;  %v9851_v28 = vpop.f32.mrb[26].mxu1 }
 0x213   :  { %v6690_v37 = vadd.f32 %v9740_v10, %v9216_v26  ;;  %v5945_v4 = vadd.f32 %v5944_v20, %v5811_v46  ;;  %v5819_v51 = vmul.f32 %v9264_v2, %v5649_v38  ;;  %v9853_v0 = vpop.f32.mrb[27].mxu0  ;;  %v6659_v54 = vadd.f32 %v9752_v5, %v9218_v42  ;;  %v9858_v23 = vpop.f32.mrb[27].mxu1  ;;  %v10758_v5 = vld [vmem:[#allocation13_spill] sm:$0xff] }
 0x214   :  { %vm5392_vm2 = vcmp.ge.f32.partialorder %v6657_v18, 0.0  ;;  %v5520_v35 = vmul.f32 0.01, %v6657_v18  ;;  %vm5394_vm3 = vcmp.ge.f32.partialorder %v6689_v21, 0.0  ;;  %v5522_v61 = vmul.f32 0.01, %v6689_v21 }
 0x215   :  { %vm5399_vm4 = vcmp.ge.f32.partialorder %v6658_v41, 0.0  ;;  %v5527_v1 = vmul.f32 0.01, %v6658_v41  ;;  %v9849_v50 = vadd.f32 %v5945_v4, %v5812_v56  ;;  %vm5401_vm5 = vcmp.ge.f32.partialorder %v6690_v37, 0.0  ;;  %v9879_v4 = vpop.f32.mrb[28].mxu1 }
 0x216   :  { %v5648_v10 = vsel %vm5392_vm2, %v6657_v18, %v5520_v35  ;;  %v5529_v36 = vmul.f32 0.01, %v6690_v37  ;;  %v5650_v55 = vsel %vm5394_vm3, %v6689_v21, %v5522_v61  ;;  %v6691_v56 = vadd.f32 %v9754_v32, %v9238_v27  ;;  %v9873_v32 = vpop.f32.mrb[28].mxu0 }
 0x217   :  { %v5818_v22 = vmul.f32 %v9266_v12, %v5648_v10  ;;  %v5655_v58 = vsel %vm5399_vm4, %v6658_v41, %v5527_v1  ;;  %v5820_v46 = vmul.f32 %v9283_v49, %v5650_v55  ;;  %vm5400_vm6 = vcmp.ge.f32.partialorder %v6659_v54, 0.0  ;;  %v9881_v35 = vpop.f32.mrb[29].mxu0 }
 0x218   :  { %4805 = vmatmul.mubr.bf16.gmra.mrb[36].mxu0 %v10757_v59  ;;  %v5825_v31 = vmul.f32 %v9262_v16, %v5655_v58  ;;  %v5657_v45 = vsel %vm5401_vm5, %v6690_v37, %v5529_v36  ;;  %v5528_v63 = vmul.f32 0.01, %v6659_v54  ;;  %vm5402_vm7 = vcmp.ge.f32.partialorder %v6691_v56, 0.0  ;;  %v9886_v10 = vpop.f32.mrb[30].mxu0 }
 0x219   :  { %5257 = vmatmul.mubr.bf16.gmra.mrb[36].mxu1 %v10757_v59  ;;  %v5953_v15 = vadd.f32 %v5818_v22, %v5817_v29  ;;  %v5827_v34 = vmul.f32 %v9264_v2, %v5657_v45  ;;  %4814 = vmatprep.mubr.bf16.mxu0 %v10758_v5  ;;  %v5530_v20 = vmul.f32 0.01, %v6691_v56  ;;  %v6660_v18 = vadd.f32 %v9782_v19, %v9214_v25  ;;  %v9893_v22 = vpop.f32.mrb[31].mxu0 }
 0x21a   :  { %5266 = vmatprep.mubr.bf16.mxu1 %v10758_v5  ;;  %v6692_v38 = vadd.f32 %v9792_v60, %v9216_v26  ;;  %v5656_v29 = vsel %vm5400_vm6, %v6659_v54, %v5528_v63  ;;  %v6661_v41 = vadd.f32 %v9794_v57, %v9218_v42  ;;  %v6693_v37 = vadd.f32 %v9800_v8, %v9238_v27  ;;  %v9884_v60 = vpop.f32.mrb[29].mxu1 }
 0x21b   :  { %v5954_v21 = vadd.f32 %v5953_v15, %v5819_v51  ;;  %v5826_v61 = vmul.f32 %v9266_v12, %v5656_v29  ;;  %v5658_v19 = vsel %vm5402_vm7, %v6691_v56, %v5530_v20  ;;  %vm5407_vm8 = vcmp.ge.f32.partialorder %v6660_v18, 0.0  ;;  %v9891_v8 = vpop.f32.mrb[30].mxu1  ;;  %v10759_v15 = vld [vmem:[#allocation14_spill] sm:$0xff] }
 0x21c   :  { %v5535_v1 = vmul.f32 0.01, %v6660_v18  ;;  %v5828_v57 = vmul.f32 %v9283_v49, %v5658_v19  ;;  %vm5409_vm9 = vcmp.ge.f32.partialorder %v6692_v38, 0.0  ;;  %v5537_v36 = vmul.f32 0.01, %v6692_v38  ;;  %v9895_v59 = vpop.f32.mrb[31].mxu1 }
 0x21d   :  { %v9888_v51 = vadd.f32 %v5954_v21, %v5820_v46  ;;  %v5962_v55 = vadd.f32 %v5826_v61, %v5825_v31  ;;  %vm5408_vm10 = vcmp.ge.f32.partialorder %v6661_v41, 0.0  ;;  %v5536_v54 = vmul.f32 0.01, %v6661_v41  ;;  %v10760_v61 = vld [vmem:[#allocation15_spill] sm:$0xff] }
 0x21e   :  { %v5663_v58 = vsel %vm5407_vm8, %v6660_v18, %v5535_v1  ;;  %v5665_v56 = vsel %vm5409_vm9, %v6692_v38, %v5537_v36  ;;  %vm5410_vm11 = vcmp.ge.f32.partialorder %v6693_v37, 0.0  ;;  %v5538_v46 = vmul.f32 0.01, %v6693_v37 }
 0x21f   :  { %v5833_v45 = vmul.f32 %v9262_v16, %v5663_v58  ;;  %v5963_v63 = vadd.f32 %v5962_v55, %v5827_v34  ;;  %v5835_v5 = vmul.f32 %v9264_v2, %v5665_v56  ;;  %v5664_v20 = vsel %vm5408_vm10, %v6661_v41, %v5536_v54 }
 0x220   :  { %4815 = vmatmul.mubr.bf16.gmra.mrb[40].mxu0 %v10759_v15  ;;  %v6662_v21 = vadd.f32 %v9802_v47, %v9214_v25  ;;  %v5834_v31 = vmul.f32 %v9266_v12, %v5664_v20  ;;  %v5666_v18 = vsel %vm5410_vm11, %v6693_v37, %v5538_v46  ;;  %v6694_v29 = vadd.f32 %v9808_v52, %v9216_v26  ;;  %v10761_v20 = vld [vmem:[#allocation16_spill] sm:$0xff] }
 0x221   :  { %5267 = vmatmul.mubr.bf16.gmra.mrb[40].mxu1 %v10759_v15  ;;  %v6663_v38 = vadd.f32 %v9813_v17, %v9218_v42  ;;  %4824 = vmatprep.mubr.bf16.mxu0 %v10760_v61  ;;  %v9909_v34 = vadd.f32 %v5963_v63, %v5828_v57  ;;  %v5836_v41 = vmul.f32 %v9283_v49, %v5666_v18 }
 0x222   :  { %vm5415_vm12 = vcmp.ge.f32.partialorder %v6662_v21, 0.0  ;;  %v5543_v19 = vmul.f32 0.01, %v6662_v21  ;;  %5276 = vmatprep.mubr.bf16.mxu1 %v10760_v61  ;;  %v5971_v47 = vadd.f32 %v5834_v31, %v5833_v45  ;;  %vm5417_vm13 = vcmp.ge.f32.partialorder %v6694_v29, 0.0 }
 0x223   :  { %v5545_v1 = vmul.f32 0.01, %v6694_v29  ;;  %vm5416_vm14 = vcmp.ge.f32.partialorder %v6663_v38, 0.0  ;;  %v5544_v36 = vmul.f32 0.01, %v6663_v38  ;;  %v6695_v52 = vadd.f32 %v9815_v48, %v9238_v27 }
 0x224   :  { %v5671_v37 = vsel %vm5415_vm12, %v6662_v21, %v5543_v19  ;;  %v6664_v17 = vadd.f32 %v9832_v62, %v9214_v25  ;;  %v5972_v57 = vadd.f32 %v5971_v47, %v5835_v5  ;;  %v6696_v54 = vadd.f32 %v9840_v9, %v9216_v26  ;;  %v10762_v9 = vld [vmem:[#allocation17_spill] sm:$0xff] }
 0x225   :  { %v5841_v55 = vmul.f32 %v9262_v16, %v5671_v37  ;;  %v5673_v58 = vsel %vm5417_vm13, %v6694_v29, %v5545_v1  ;;  %v5672_v56 = vsel %vm5416_vm14, %v6663_v38, %v5544_v36  ;;  %vm5418_vm15 = vcmp.ge.f32.partialorder %v6695_v52, 0.0 }
 0x226   :  { %v5843_v45 = vmul.f32 %v9264_v2, %v5673_v58  ;;  %v5546_v46 = vmul.f32 0.01, %v6695_v52  ;;  %v9921_v15 = vadd.f32 %v5972_v57, %v5836_v41  ;;  %v5842_v63 = vmul.f32 %v9266_v12, %v5672_v56 }
 0x227   :  { %vm5423_vm0 = vcmp.ge.f32.partialorder %v6664_v17, 0.0  ;;  %v5551_v48 = vmul.f32 0.01, %v6664_v17  ;;  %vm5425_vm1 = vcmp.ge.f32.partialorder %v6696_v54, 0.0  ;;  %v5553_v5 = vmul.f32 0.01, %v6696_v54 }
 0x228   :  { %4825 = vmatmul.mubr.bf16.gmra.mrb[44].mxu0 %v10761_v20  ;;  %v5674_v62 = vsel %vm5418_vm15, %v6695_v52, %v5546_v46  ;;  %v6665_v21 = vadd.f32 %v9842_v33, %v9218_v42  ;;  %v5980_v31 = vadd.f32 %v5842_v63, %v5841_v55  ;;  %v6697_v38 = vadd.f32 %v9845_v7, %v9238_v27  ;;  %v10763_v46 = vld [vmem:[#allocation18_spill] sm:$0xff] }
 0x229   :  { %5277 = vmatmul.mubr.bf16.gmra.mrb[44].mxu1 %v10761_v20  ;;  %4834 = vmatprep.mubr.bf16.mxu0 %v10762_v9  ;;  %v5844_v18 = vmul.f32 %v9283_v49, %v5674_v62  ;;  %v5679_v29 = vsel %vm5423_vm0, %v6664_v17, %v5551_v48  ;;  %v5681_v41 = vsel %vm5425_vm1, %v6696_v54, %v5553_v5 }
 0x22a   :  { %5286 = vmatprep.mubr.bf16.mxu1 %v10762_v9  ;;  %v5849_v61 = vmul.f32 %v9262_v16, %v5679_v29  ;;  %vm5424_vm2 = vcmp.ge.f32.partialorder %v6665_v21, 0.0  ;;  %v5552_v19 = vmul.f32 0.01, %v6665_v21  ;;  %v5981_v47 = vadd.f32 %v5980_v31, %v5843_v45 }
 0x22b   :  { %v5851_v33 = vmul.f32 %v9264_v2, %v5681_v41  ;;  %vm5426_vm3 = vcmp.ge.f32.partialorder %v6697_v38, 0.0  ;;  %v5554_v1 = vmul.f32 0.01, %v6697_v38  ;;  %v6666_v36 = vadd.f32 %v9847_v40, %v9214_v25 }
 0x22c   :  { %v5680_v37 = vsel %vm5424_vm2, %v6665_v21, %v5552_v19  ;;  %v6698_v52 = vadd.f32 %v9851_v28, %v9216_v26  ;;  %v6667_v7 = vadd.f32 %v9853_v0, %v9218_v42  ;;  %v9941_v17 = vadd.f32 %v5981_v47, %v5844_v18 }
 0x22d   :  { %v5850_v57 = vmul.f32 %v9266_v12, %v5680_v37  ;;  %v5682_v55 = vsel %vm5426_vm3, %v6697_v38, %v5554_v1  ;;  %v6699_v58 = vadd.f32 %v9858_v23, %v9238_v27  ;;  %vm5431_vm4 = vcmp.ge.f32.partialorder %v6666_v36, 0.0  ;;  %v10764_v23 = vld [vmem:[#allocation19_spill] sm:$0xff] }
 0x22e   :  { %v5852_v54 = vmul.f32 %v9283_v49, %v5682_v55  ;;  %v5559_v45 = vmul.f32 0.01, %v6666_v36  ;;  %vm5433_vm5 = vcmp.ge.f32.partialorder %v6698_v52, 0.0  ;;  %v5561_v56 = vmul.f32 0.01, %v6698_v52  ;;  %v10766_v55 = vld [vmem:[#allocation20_spill] sm:$0xff] }
 0x22f   :  { %v5989_v40 = vadd.f32 %v5850_v57, %v5849_v61  ;;  %vm5432_vm6 = vcmp.ge.f32.partialorder %v6667_v7, 0.0  ;;  %v5560_v28 = vmul.f32 0.01, %v6667_v7  ;;  %vm5434_vm7 = vcmp.ge.f32.partialorder %v6699_v58, 0.0 }
 0x230   :  { %4835 = vmatmul.mubr.bf16.gmra.mrb[48].mxu0 %v10763_v46  ;;  %v5687_v0 = vsel %vm5431_vm4, %v6666_v36, %v5559_v45  ;;  %v5562_v63 = vmul.f32 0.01, %v6699_v58  ;;  %v6668_v48 = vadd.f32 %v9873_v32, %v9214_v25  ;;  %v5689_v5 = vsel %vm5433_vm5, %v6698_v52, %v5561_v56 }
 0x231   :  { %5287 = vmatmul.mubr.bf16.gmra.mrb[48].mxu1 %v10763_v46  ;;  %4844 = vmatprep.mubr.bf16.mxu0 %v10764_v23  ;;  %v5990_v20 = vadd.f32 %v5989_v40, %v5851_v33  ;;  %v5857_v62 = vmul.f32 %v9262_v16, %v5687_v0  ;;  %v5688_v21 = vsel %vm5432_vm6, %v6667_v7, %v5560_v28 }
 0x232   :  { %5296 = vmatprep.mubr.bf16.mxu1 %v10764_v23  ;;  %v5859_v9 = vmul.f32 %v9264_v2, %v5689_v5  ;;  %v5858_v31 = vmul.f32 %v9266_v12, %v5688_v21  ;;  %v5690_v18 = vsel %vm5434_vm7, %v6699_v58, %v5562_v63  ;;  %vm5439_vm8 = vcmp.ge.f32.partialorder %v6668_v48, 0.0 }
 0x233   :  { %v9956_v29 = vadd.f32 %v5990_v20, %v5852_v54  ;;  %v5860_v32 = vmul.f32 %v9283_v49, %v5690_v18  ;;  %v5567_v38 = vmul.f32 0.01, %v6668_v48  ;;  %v6700_v61 = vadd.f32 %v9879_v4, %v9216_v26 }
 0x234   :  { %v5998_v41 = vadd.f32 %v5858_v31, %v5857_v62  ;;  %v6669_v19 = vadd.f32 %v9881_v35, %v9218_v42  ;;  %v6701_v47 = vadd.f32 %v9884_v60, %v9238_v27  ;;  %v6670_v33 = vadd.f32 %v9886_v10, %v9214_v25 }
 0x235   :  { %10765 = vst [vmem:[#allocation3_spill] sm:$0xff] %v9956_v29  ;;  %v5695_v1 = vsel %vm5439_vm8, %v6668_v48, %v5567_v38  ;;  %vm5441_vm9 = vcmp.ge.f32.partialorder %v6700_v61, 0.0  ;;  %v5569_v37 = vmul.f32 0.01, %v6700_v61  ;;  %v6702_v36 = vadd.f32 %v9891_v8, %v9216_v26  ;;  %v10768_v26 = vld [vmem:[#allocation21_spill] sm:$0xff] }
 0x236   :  { %v5999_v52 = vadd.f32 %v5998_v41, %v5859_v9  ;;  %v5865_v7 = vmul.f32 %v9262_v16, %v5695_v1  ;;  %vm5440_vm10 = vcmp.ge.f32.partialorder %v6669_v19, 0.0  ;;  %v5568_v4 = vmul.f32 0.01, %v6669_v19  ;;  %v10770_v9 = vld [vmem:[#allocation22_spill] sm:$0xff]  ;;  %v10774_v38 = vld [vmem:[#allocation25_spill] sm:$0xff] }
 0x237   :  { %v5697_v57 = vsel %vm5441_vm9, %v6700_v61, %v5569_v37  ;;  %vm5442_vm11 = vcmp.ge.f32.partialorder %v6701_v47, 0.0  ;;  %v5570_v35 = vmul.f32 0.01, %v6701_v47  ;;  %vm5447_vm12 = vcmp.ge.f32.partialorder %v6670_v33, 0.0 }
 0x238   :  { %4845 = vmatmul.mubr.bf16.gmra.mrb[52].mxu0 %v10766_v55  ;;  %v5771_v25 = vmul.f32 %v9264_v2, %v9616_v13  ;;  %v9973_v60 = vadd.f32 %v5999_v52, %v5860_v32  ;;  %v5696_v10 = vsel %vm5440_vm10, %v6669_v19, %v5568_v4  ;;  %v5575_v58 = vmul.f32 0.01, %v6670_v33 }
 0x239   :  { %5297 = vmatmul.mubr.bf16.gmra.mrb[52].mxu1 %v10766_v55  ;;  %4854 = vmatprep.mubr.bf16.mxu0 %v10768_v26  ;;  %v5772_v8 = vmul.f32 %v9283_v49, %v9621_v43  ;;  %v5867_v54 = vmul.f32 %v9264_v2, %v5697_v57  ;;  %v5866_v45 = vmul.f32 %v9266_v12, %v5696_v10  ;;  %v5577_v13 = vmul.f32 0.01, %v6702_v36 }
 0x23a   :  { %10767 = vst [vmem:[#allocation4_spill] sm:$0xff] %v9973_v60  ;;  %v5698_v40 = vsel %vm5442_vm11, %v6701_v47, %v5570_v35  ;;  %5306 = vmatprep.mubr.bf16.mxu1 %v10768_v26  ;;  %v5703_v56 = vsel %vm5447_vm12, %v6670_v33, %v5575_v58  ;;  %v6671_v28 = vadd.f32 %v9893_v22, %v9218_v42  ;;  %vm5449_vm13 = vcmp.ge.f32.partialorder %v6702_v36, 0.0  ;;  %v7152_v47 = vld [vmem:[%s10606_s2] sm:$0xff] }
 0x23b   :  { %v6703_v46 = vadd.f32 %v9895_v59, %v9238_v27  ;;  %v6007_v0 = vadd.f32 %v5866_v45, %v5865_v7  ;;  %v5868_v63 = vmul.f32 %v9283_v49, %v5698_v40  ;;  %v5882_v43 = vadd.f32 %v9567_v53, %v9559_v30  ;;  %v10771_v53 = vld [vmem:[#allocation23_spill] sm:$0xff] }
 0x23c   :  { %v5873_v48 = vmul.f32 %v9262_v16, %v5703_v56  ;;  %vm5448_vm14 = vcmp.ge.f32.partialorder %v6671_v28, 0.0  ;;  %v5576_v23 = vmul.f32 0.01, %v6671_v28  ;;  %v5900_v42 = vadd.f32 %v9630_v3, %v5771_v25  ;;  %v7153_v40 = vld [vmem:[%s10607_s3] sm:$0xff] }
 0x23d   :  { %vm5450_vm15 = vcmp.ge.f32.partialorder %v6703_v46, 0.0  ;;  %v6008_v20 = vadd.f32 %v6007_v0, %v5867_v54  ;;  %v5578_v62 = vmul.f32 0.01, %v6703_v46  ;;  %v9991_v5 = vadd.f32 %v5882_v43, %v9607_v24 }
 0x23e   :  { %v5705_v27 = vsel %vm5449_vm13, %v6702_v36, %v5577_v13  ;;  %v5704_v22 = vsel %vm5448_vm14, %v6671_v28, %v5576_v23  ;;  %v9998_v30 = vadd.f32 %v5900_v42, %v5772_v8  ;;  %v617_v61 = vsub.s32 4, %v10774_v38 }
 0x23f   :  { %v9994_v59 = vadd.f32 %v6008_v20, %v5868_v63  ;;  %v5874_v21 = vmul.f32 %v9266_v12, %v5704_v22  ;;  %v5706_v16 = vsel %vm5450_vm15, %v6703_v46, %v5578_v62  ;;  %v5875_v24 = vmul.f32 %v9264_v2, %v5705_v27  ;;  %v10773_v12 = vld [vmem:[#allocation24_spill] sm:$0xff] }
 0x240   :  { %4855 = vmatmul.mubr.bf16.gmra.mrb[56].mxu0 %v10770_v9  ;;  %v5876_v3 = vmul.f32 %v9283_v49, %v5706_v16  ;;  %v625_v41 = vsub.s32 6, %v10774_v38  ;;  %v621_v19 = vsub.s32 5, %v10774_v38  ;;  %v629_v2 = vsub.s32 7, %v10774_v38 }
 0x241   :  { %10769 = vst [vmem:[#allocation5_spill] sm:$0xff] %v9994_v59  ;;  %5307 = vmatmul.mubr.bf16.gmra.mrb[56].mxu1 %v10770_v9  ;;  %4864 = vmatprep.mubr.bf16.mxu0 %v10771_v53  ;;  %v6016_v31 = vadd.f32 %v5874_v21, %v5873_v48  ;;  %v10016_v49 = vrot.slane %v7152_v47, %v617_v61 }
 0x242   :  { %5316 = vmatprep.mubr.bf16.mxu1 %v10771_v53  ;;  %v10018_v1 = vrot.slane %v7152_v47, %v625_v41  ;;  %v10020_v37 = vrot.slane %v7152_v47, %v621_v19  ;;  %v10022_v7 = vrot.slane %v7152_v47, %v629_v2  ;;  %v10032_v56 = vrot.slane %v7153_v40, %v617_v61 }
 0x243   :  { %v6017_v18 = vadd.f32 %v6016_v31, %v5875_v24  ;;  %v10036_v43 = vrot.slane %v7153_v40, %v621_v19  ;;  %v10038_v42 = vrot.slane %v7153_v40, %v625_v41  ;;  %v10040_v9 = vrot.slane %v7153_v40, %v629_v2 }
 0x245   :  { %v10005_v32 = vadd.f32 %v6017_v18, %v5876_v3 }
 0x247   :  { %10772 = vst [vmem:[#allocation6_spill] sm:$0xff] %v10005_v32 }
 0x248   :  { %4865 = vmatmul.mubr.bf16.gmra.mrb[60].mxu0 %v10773_v12 }
 0x249   :  { %5317 = vmatmul.mubr.bf16.gmra.mrb[60].mxu1 %v10773_v12 }
 0x2e3   :  { %v4796_v33 = vpop.f32.mrb[32].mxu0 }
 0x2e4   :  { %v5248_v36 = vpop.f32.mrb[32].mxu1  ;;  %v4798_v52 = vpop.f32.mrb[33].mxu0  ;;  %v6704_v35 = vadd.f32 %v4796_v33, %v10016_v49 }
 0x2e5   :  { %v5250_v4 = vpop.f32.mrb[33].mxu1  ;;  %v4800_v57 = vpop.f32.mrb[34].mxu0  ;;  %v6736_v10 = vadd.f32 %v5248_v36, %v10018_v1  ;;  %v6705_v58 = vadd.f32 %v4798_v52, %v10020_v37 }
 0x2e6   :  { %v5252_v55 = vpop.f32.mrb[34].mxu1  ;;  %v4802_v25 = vpop.f32.mrb[35].mxu0  ;;  %v6737_v26 = vadd.f32 %v5250_v4, %v10022_v7  ;;  %v6706_v8 = vadd.f32 %v4800_v57, %v10016_v49  ;;  %vm5331_vm0 = vcmp.ge.f32.partialorder %v6704_v35, 0.0  ;;  %v5459_v45 = vmul.f32 0.01, %v6704_v35 }
 0x2e7   :  { %v5254_v54 = vpop.f32.mrb[35].mxu1  ;;  %v6707_v13 = vadd.f32 %v4802_v25, %v10020_v37  ;;  %v5461_v28 = vmul.f32 0.01, %v6736_v10  ;;  %vm5332_vm1 = vcmp.ge.f32.partialorder %v6705_v58, 0.0  ;;  %v5460_v46 = vmul.f32 0.01, %v6705_v58 }
 0x2e8   :  { %v6738_v0 = vadd.f32 %v5252_v55, %v10018_v1  ;;  %v5462_v48 = vmul.f32 0.01, %v6737_v26  ;;  %v5467_v23 = vmul.f32 0.01, %v6706_v8  ;;  %vm5333_vm2 = vcmp.ge.f32.partialorder %v6736_v10, 0.0 }
 0x2e9   :  { %vm5339_vm3 = vcmp.ge.f32.partialorder %v6706_v8, 0.0  ;;  %v5468_v27 = vmul.f32 0.01, %v6707_v13  ;;  %v5587_v16 = vsel %vm5331_vm0, %v6704_v35, %v5459_v45  ;;  %vm5334_vm4 = vcmp.ge.f32.partialorder %v6737_v26, 0.0 }
 0x2ea   :  { %vm5340_vm5 = vcmp.ge.f32.partialorder %v6707_v13, 0.0  ;;  %v10044_v53 = vadd.f32 %v5254_v54, %v10022_v7  ;;  %v5588_v3 = vsel %vm5332_vm1, %v6705_v58, %v5460_v46  ;;  %v5469_v18 = vmul.f32 0.01, %v6738_v0 }
 0x2eb   :  { %v4806_v63 = vpop.f32.mrb[36].mxu0  ;;  %v5595_v41 = vsel %vm5339_vm3, %v6706_v8, %v5467_v23  ;;  %vm5341_vm6 = vcmp.ge.f32.partialorder %v6738_v0, 0.0  ;;  %v5757_v47 = vmul.f32 %v10032_v56, %v5587_v16  ;;  %v5596_v33 = vsel %vm5340_vm5, %v6707_v13, %v5468_v27 }
 0x2ec   :  { %v5258_v20 = vpop.f32.mrb[36].mxu1  ;;  %v4808_v62 = vpop.f32.mrb[37].mxu0  ;;  %v6708_v12 = vadd.f32 %v4806_v63, %v10016_v49  ;;  %v5589_v36 = vsel %vm5333_vm2, %v6736_v10, %v5461_v28  ;;  %v5590_v52 = vsel %vm5334_vm4, %v6737_v26, %v5462_v48  ;;  %v10060_v4 = vmul.f32 0.01, %v10044_v53 }
 0x2ed   :  { %v5260_v22 = vpop.f32.mrb[37].mxu1  ;;  %v4810_v21 = vpop.f32.mrb[38].mxu0  ;;  %v10049_v38 = vadd.f32 %v5258_v20, %v10018_v1  ;;  %v10053_v19 = vadd.f32 %v4808_v62, %v10020_v37  ;;  %v5758_v55 = vmul.f32 %v10036_v43, %v5588_v3  ;;  %v10068_v25 = vmul.f32 %v10032_v56, %v5595_v41 }
 0x2ee   :  { %v5262_v24 = vpop.f32.mrb[38].mxu1  ;;  %v4812_v31 = vpop.f32.mrb[39].mxu0  ;;  %v6710_v2 = vadd.f32 %v4810_v21, %v10016_v49  ;;  %v10063_v57 = vadd.f32 %v5260_v22, %v10022_v7  ;;  %v10070_v58 = vsel %vm5341_vm6, %v6738_v0, %v5469_v18  ;;  %v5475_v8 = vmul.f32 0.01, %v6708_v12 }
 0x2ef   :  { %v5264_v61 = vpop.f32.mrb[39].mxu1  ;;  %v6711_v35 = vadd.f32 %v4812_v31, %v10020_v37  ;;  %v10073_v10 = vmul.f32 0.01, %v10049_v38  ;;  %v10076_v54 = vmul.f32 %v10036_v43, %v5596_v33  ;;  %vm5342_vm7 = vcmp.ge.f32.partialorder %v10044_v53, 0.0 }
 0x2f0   :  { %vm5347_vm8 = vcmp.ge.f32.partialorder %v6708_v12, 0.0  ;;  %vm5348_vm9 = vcmp.ge.f32.partialorder %v10053_v19, 0.0  ;;  %v5483_v45 = vmul.f32 0.01, %v6710_v2  ;;  %v5476_v28 = vmul.f32 0.01, %v10053_v19 }
 0x2f1   :  { %vm5355_vm10 = vcmp.ge.f32.partialorder %v6710_v2, 0.0  ;;  %v6742_v46 = vadd.f32 %v5262_v24, %v10018_v1  ;;  %v10084_v48 = vmul.f32 0.01, %v10063_v57  ;;  %v5484_v23 = vmul.f32 0.01, %v6711_v35 }
 0x2f2   :  { %v5884_v62 = vadd.f32 %v9991_v5, %v5757_v47  ;;  %v5603_v21 = vsel %vm5347_vm8, %v6708_v12, %v5475_v8  ;;  %vm5349_vm11 = vcmp.ge.f32.partialorder %v10049_v38, 0.0  ;;  %vm5356_vm12 = vcmp.ge.f32.partialorder %v6711_v35, 0.0 }
 0x2f3   :  { %v4816_v26 = vpop.f32.mrb[40].mxu0  ;;  %vm5350_vm13 = vcmp.ge.f32.partialorder %v10063_v57, 0.0  ;;  %v5611_v18 = vsel %vm5355_vm10, %v6710_v2, %v5483_v45  ;;  %v5759_v41 = vmul.f32 %v10038_v42, %v5589_v36  ;;  %vm5357_vm15 = vcmp.ge.f32.partialorder %v6742_v46, 0.0 }
 0x2f4   :  { %v5268_v40 = vpop.f32.mrb[40].mxu1  ;;  %v4818_v13 = vpop.f32.mrb[41].mxu0  ;;  %v6712_v0 = vadd.f32 %v4816_v26, %v10016_v49  ;;  %v5885_v5 = vadd.f32 %v5884_v62, %v5758_v55  ;;  %v5485_v47 = vmul.f32 0.01, %v6742_v46  ;;  %v10095_v12 = vadd.f32 %v5264_v61, %v10022_v7 }
 0x2f5   :  { %v5270_v63 = vpop.f32.mrb[41].mxu1  ;;  %v6744_v20 = vadd.f32 %v5268_v40, %v10018_v1  ;;  %v4820_v27 = vpop.f32.mrb[42].mxu0  ;;  %v6713_v24 = vadd.f32 %v4818_v13, %v10020_v37  ;;  %v5760_v33 = vmul.f32 %v10040_v9, %v5590_v52  ;;  %v5612_v8 = vsel %vm5356_vm12, %v6711_v35, %v5484_v23 }
 0x2f6   :  { %v5272_v22 = vpop.f32.mrb[42].mxu1  ;;  %v5491_v16 = vmul.f32 0.01, %v6712_v0  ;;  %v4822_v31 = vpop.f32.mrb[43].mxu0  ;;  %vm5363_vm14 = vcmp.ge.f32.partialorder %v6712_v0, 0.0  ;;  %v5886_v40 = vadd.f32 %v5885_v5, %v5759_v41  ;;  %v10099_v13 = vadd.f32 %v5270_v63, %v10022_v7 }
 0x2f7   :  { %v5274_v3 = vpop.f32.mrb[43].mxu1  ;;  %v5493_v26 = vmul.f32 0.01, %v6744_v20  ;;  %vm5365_vm0 = vcmp.ge.f32.partialorder %v6744_v20, 0.0  ;;  %v5492_v2 = vmul.f32 0.01, %v6713_v24  ;;  %v6714_v45 = vadd.f32 %v4820_v27, %v10016_v49 }
 0x2f8   :  { %v5619_v32 = vsel %vm5363_vm14, %v6712_v0, %v5491_v16  ;;  %v5773_v55 = vmul.f32 %v10032_v56, %v5603_v21  ;;  %v5887_v62 = vadd.f32 %v5886_v40, %v5760_v33  ;;  %vm5364_vm1 = vcmp.ge.f32.partialorder %v6713_v24, 0.0 }
 0x2f9   :  { %v10104_v61 = vadd.f32 %v5272_v22, %v10018_v1  ;;  %v5604_v63 = vsel %vm5348_vm9, %v10053_v19, %v5476_v28  ;;  %v10110_v0 = vmul.f32 %v10032_v56, %v5611_v18  ;;  %v10113_v23 = vmul.f32 0.01, %v10095_v12 }
 0x2fa   :  { %v6715_v27 = vadd.f32 %v4822_v31, %v10020_v37  ;;  %v10117_v21 = vsel %vm5357_vm15, %v6742_v46, %v5485_v47  ;;  %v10120_v22 = vmul.f32 %v10036_v43, %v5612_v8  ;;  %v10123_v16 = vmul.f32 %v10032_v56, %v5619_v32  ;;  %5888 = vadd.xlane.f32.xlu0 %v5887_v62 }
 0x2fb   :  { %v4826_v36 = vpop.f32.mrb[44].mxu0  ;;  %v10126_v41 = vsel %vm5365_vm0, %v6744_v20, %v5493_v26  ;;  %v5620_v19 = vsel %vm5364_vm1, %v6713_v24, %v5492_v2  ;;  %v10129_v28 = vmul.f32 0.01, %v10099_v13  ;;  %v5499_v18 = vmul.f32 0.01, %v6714_v45 }
 0x2fc   :  { %v5278_v52 = vpop.f32.mrb[44].mxu1  ;;  %v4828_v35 = vpop.f32.mrb[45].mxu0  ;;  %v5598_v46 = vsel %vm5342_vm7, %v10044_v53, %v10060_v4  ;;  %vm5371_vm2 = vcmp.ge.f32.partialorder %v6714_v45, 0.0  ;;  %vm5373_vm3 = vcmp.ge.f32.partialorder %v10104_v61, 0.0  ;;  %v5893_v32 = vadd.f32 %v9628_v14, %v10068_v25 }
 0x2fd   :  { %v5280_v31 = vpop.f32.mrb[45].mxu1  ;;  %v4830_v5 = vpop.f32.mrb[46].mxu0  ;;  %v6716_v20 = vadd.f32 %v4826_v36, %v10016_v49  ;;  %vm5358_vm4 = vcmp.ge.f32.partialorder %v10095_v12, 0.0  ;;  %v5501_v33 = vmul.f32 0.01, %v10104_v61  ;;  %vm5372_vm5 = vcmp.ge.f32.partialorder %v6715_v27, 0.0 }
 0x2fe   :  { %v5282_v24 = vpop.f32.mrb[46].mxu1  ;;  %v4832_v47 = vpop.f32.mrb[47].mxu0  ;;  %v5500_v8 = vmul.f32 0.01, %v6715_v27  ;;  %v10142_v53 = vadd.f32 %v5274_v3, %v10022_v7  ;;  %v5767_v26 = vmul.f32 %v10038_v42, %v10070_v58  ;;  %v5894_v40 = vadd.f32 %v5893_v32, %v10076_v54 }
 0x2ff   :  { %v5284_v4 = vpop.f32.mrb[47].mxu1  ;;  %v5605_v14 = vsel %vm5349_vm11, %v10049_v38, %v10073_v10  ;;  %v5774_v25 = vmul.f32 %v10036_v43, %v5604_v63  ;;  %v5627_v2 = vsel %vm5371_vm2, %v6714_v45, %v5499_v18  ;;  %v5768_v36 = vmul.f32 %v10040_v9, %v5598_v46 }
 0x300   :  { %v6748_v3 = vadd.f32 %v5278_v52, %v10018_v1  ;;  %v5606_v58 = vsel %vm5350_vm13, %v10063_v57, %v10084_v48  ;;  %v5895_v54 = vadd.f32 %v5894_v40, %v5767_v26  ;;  %v5507_v32 = vmul.f32 0.01, %v6716_v20 }
 0x301   :  { %v5902_v59 = vadd.f32 %v9998_v30, %v5773_v55  ;;  %v6717_v38 = vadd.f32 %v4828_v35, %v10020_v37  ;;  %v5628_v45 = vsel %vm5372_vm5, %v6715_v27, %v5500_v8  ;;  %vm5379_vm6 = vcmp.ge.f32.partialorder %v6716_v20, 0.0 }
 0x302   :  { %v5775_v52 = vmul.f32 %v10038_v42, %v5605_v14  ;;  %v6718_v18 = vadd.f32 %v4830_v5, %v10016_v49  ;;  %vm5366_vm7 = vcmp.ge.f32.partialorder %v10099_v13, 0.0  ;;  %v5896_v48 = vadd.f32 %v5895_v54, %v5768_v36 }
 0x303   :  { %v4836_v62 = vpop.f32.mrb[48].mxu0  ;;  %v5903_v30 = vadd.f32 %v5902_v59, %v5774_v25  ;;  %vm5380_vm8 = vcmp.ge.f32.partialorder %v6717_v38, 0.0  ;;  %v5508_v55 = vmul.f32 0.01, %v6717_v38  ;;  %vm5381_vm9 = vcmp.ge.f32.partialorder %v6748_v3, 0.0 }
 0x304   :  { %v5288_v10 = vpop.f32.mrb[48].mxu1  ;;  %v10161_v63 = vpop.f32.mrb[49].mxu0  ;;  %v5509_v27 = vmul.f32 0.01, %v6748_v3  ;;  %v5776_v8 = vmul.f32 %v10040_v9, %v5606_v58  ;;  %v5515_v40 = vmul.f32 0.01, %v6718_v18  ;;  %5897 = vadd.xlane.f32.xlu0 %v5896_v48  ;;  %v5635_v5 = vsel %vm5379_vm6, %v6716_v20, %v5507_v32 }
 0x305   :  { %v10166_v46 = vpop.f32.mrb[49].mxu1  ;;  %v10168_v57 = vpop.f32.mrb[50].mxu0  ;;  %v5904_v14 = vadd.f32 %v5903_v30, %v5775_v52  ;;  %v10178_v60 = vadd.f32 %v5280_v31, %v10022_v7  ;;  %vm5387_vm10 = vcmp.ge.f32.partialorder %v6718_v18, 0.0  ;;  %v5790_v25 = vmul.f32 %v10036_v43, %v5620_v19 }
 0x306   :  { %v10171_v35 = vpop.f32.mrb[50].mxu1  ;;  %v10173_v26 = vpop.f32.mrb[51].mxu0  ;;  %v10184_v36 = vmul.f32 0.01, %v10142_v53  ;;  %v5636_v54 = vsel %vm5380_vm8, %v6717_v38, %v5508_v55  ;;  %v6719_v58 = vadd.f32 %v4832_v47, %v10020_v37  ;;  %v5797_v48 = vmul.f32 %v10032_v56, %v5627_v2 }
 0x307   :  { %v10180_v59 = vpop.f32.mrb[51].mxu1  ;;  %v10192_v20 = vsel %vm5373_vm3, %v10104_v61, %v5501_v33  ;;  %v10195_v31 = vmul.f32 %v10036_v43, %v5628_v45  ;;  %v5905_v32 = vadd.f32 %v5904_v14, %v5776_v8  ;;  %vm5374_vm11 = vcmp.ge.f32.partialorder %v10142_v53, 0.0 }
 0x308   :  { %v10199_v19 = vmul.f32 %v10032_v56, %v5635_v5  ;;  %v10202_v38 = vsel %vm5381_vm9, %v6748_v3, %v5509_v27  ;;  %v5643_v47 = vsel %vm5387_vm10, %v6718_v18, %v5515_v40  ;;  %v6750_v2 = vadd.f32 %v5282_v24, %v10018_v1 }
 0x309   :  { %5906 = vadd.xlane.f32.xlu1 %v5905_v32  ;;  %v10206_v52 = vmul.f32 %v10036_v43, %v5636_v54  ;;  %v10209_v61 = vmul.f32 0.01, %v10178_v60  ;;  %v5614_v33 = vsel %vm5358_vm4, %v10095_v12, %v10113_v23  ;;  %v5911_v45 = vadd.f32 %v9702_v44, %v10110_v0 }
 0x30a   :  { %v5516_v24 = vmul.f32 0.01, %v6719_v58  ;;  %v10222_v30 = vadd.f32 %v5284_v4, %v10022_v7  ;;  %v6720_v55 = vadd.f32 %v4836_v62, %v10016_v49  ;;  %v6752_v27 = vadd.f32 %v5288_v10, %v10018_v1 }
 0x30b   :  { %v10217_v3 = vpop.f32.mrb[52].mxu0  ;;  %v10231_v12 = vmul.f32 %v10032_v56, %v5643_v47  ;;  %vm5388_vm12 = vcmp.ge.f32.partialorder %v6719_v58, 0.0  ;;  %v5783_v44 = vmul.f32 %v10038_v42, %v10117_v21  ;;  %v5912_v0 = vadd.f32 %v5911_v45, %v10120_v22 }
 0x30c   :  { %v10219_v18 = vpop.f32.mrb[52].mxu1  ;;  %v10226_v8 = vpop.f32.mrb[53].mxu0  ;;  %vm5389_vm13 = vcmp.ge.f32.partialorder %v6750_v2, 0.0  ;;  %v5517_v62 = vmul.f32 0.01, %v6750_v2  ;;  %v5784_v10 = vmul.f32 %v10040_v9, %v5614_v33  ;;  %vm5395_vm14 = vcmp.ge.f32.partialorder %v6720_v55, 0.0 }
 0x30d   :  { %v10228_v40 = vpop.f32.mrb[53].mxu1  ;;  %v10236_v23 = vpop.f32.mrb[54].mxu0  ;;  %v5523_v5 = vmul.f32 0.01, %v6720_v55  ;;  %v5913_v14 = vadd.f32 %v5912_v0, %v5783_v44  ;;  %v5920_v54 = vadd.f32 %v9738_v39, %v10123_v16  ;;  %v6721_v32 = vadd.f32 %v10161_v63, %v10020_v37 }
 0x30e   :  { %v10238_v4 = vpop.f32.mrb[54].mxu1  ;;  %v10245_v21 = vpop.f32.mrb[55].mxu0  ;;  %vm5382_vm15 = vcmp.ge.f32.partialorder %v10178_v60, 0.0  ;;  %v5644_v47 = vsel %vm5388_vm12, %v6719_v58, %v5516_v24  ;;  %v5525_v45 = vmul.f32 0.01, %v6752_v27  ;;  %v5622_v33 = vsel %vm5366_vm7, %v10099_v13, %v10129_v28 }
 0x30f   :  { %v10247_v22 = vpop.f32.mrb[55].mxu1  ;;  %v5791_v39 = vmul.f32 %v10038_v42, %v10126_v41  ;;  %v5914_v16 = vadd.f32 %v5913_v14, %v5784_v10  ;;  %vm5397_vm0 = vcmp.ge.f32.partialorder %v6752_v27, 0.0  ;;  %v5921_v63 = vadd.f32 %v5920_v54, %v5790_v25 }
 0x310   :  { %v6722_v44 = vadd.f32 %v10168_v57, %v10016_v49  ;;  %v10260_v0 = vsel %vm5389_vm13, %v6750_v2, %v5517_v62  ;;  %v10263_v58 = vmul.f32 0.01, %v10222_v30  ;;  %v5651_v24 = vsel %vm5395_vm14, %v6720_v55, %v5523_v5 }
 0x311   :  { %v5524_v29 = vmul.f32 0.01, %v6721_v32  ;;  %5915 = vadd.xlane.f32.xlu1 %v5914_v16  ;;  %v5792_v13 = vmul.f32 %v10040_v9, %v5622_v33  ;;  %v5922_v28 = vadd.f32 %v5921_v63, %v5791_v39  ;;  %vm5396_vm1 = vcmp.ge.f32.partialorder %v6721_v32, 0.0 }
 0x312   :  { %v6754_v41 = vadd.f32 %v10171_v35, %v10018_v1  ;;  %v10272_v57 = vmul.f32 %v10036_v43, %v5644_v47  ;;  %v10274_v2 = vsel %vm5397_vm0, %v6752_v27, %v5525_v45  ;;  %v10278_v62 = vadd.f32 %v10166_v46, %v10022_v7 }
 0x313   :  { %v10269_v25 = vpop.f32.mrb[56].mxu0  ;;  %v5929_v55 = vadd.f32 %v9776_v11, %v5797_v48  ;;  %v10286_v14 = vmul.f32 %v10032_v56, %v5651_v24  ;;  %v5923_v35 = vadd.f32 %v5922_v28, %v5792_v13  ;;  %v5531_v54 = vmul.f32 0.01, %v6722_v44 }
 0x314   :  { %v10281_v10 = vpop.f32.mrb[56].mxu1  ;;  %v10283_v5 = vpop.f32.mrb[57].mxu0  ;;  %v5630_v27 = vsel %vm5374_vm11, %v10142_v53, %v10184_v36  ;;  %vm5390_vm2 = vcmp.ge.f32.partialorder %v10222_v30, 0.0  ;;  %v5652_v11 = vsel %vm5396_vm1, %v6721_v32, %v5524_v29  ;;  %v5799_v48 = vmul.f32 %v10038_v42, %v10192_v20 }
 0x315   :  { %v10292_v47 = vpop.f32.mrb[57].mxu1  ;;  %v10294_v46 = vpop.f32.mrb[58].mxu0  ;;  %v5930_v45 = vadd.f32 %v5929_v55, %v10195_v31  ;;  %v6723_v33 = vadd.f32 %v10173_v26, %v10020_v37  ;;  %5924 = vadd.xlane.f32.xlu0 %v5923_v35  ;;  %vm5403_vm3 = vcmp.ge.f32.partialorder %v6722_v44, 0.0  ;;  %vm5405_vm4 = vcmp.ge.f32.partialorder %v6754_v41, 0.0 }
 0x316   :  { %v10303_v39 = vpop.f32.mrb[58].mxu1  ;;  %v10305_v16 = vpop.f32.mrb[59].mxu0  ;;  %v5533_v53 = vmul.f32 0.01, %v6754_v41  ;;  %v6724_v36 = vadd.f32 %v10217_v3, %v10016_v49  ;;  %v5800_v20 = vmul.f32 %v10040_v9, %v5630_v27  ;;  %v6756_v26 = vadd.f32 %v10219_v18, %v10018_v1 }
 0x317   :  { %v10309_v29 = vpop.f32.mrb[59].mxu1  ;;  %v5931_v32 = vadd.f32 %v5930_v45, %v5799_v48  ;;  %v5532_v31 = vmul.f32 0.01, %v6723_v33  ;;  %v10315_v63 = vmul.f32 %v10036_v43, %v5652_v11  ;;  %v10318_v24 = vmul.f32 0.01, %v10278_v62 }
 0x318   :  { %vm5404_vm5 = vcmp.ge.f32.partialorder %v6723_v33, 0.0  ;;  %v5539_v13 = vmul.f32 0.01, %v6724_v36  ;;  %v5659_v28 = vsel %vm5403_vm3, %v6722_v44, %v5531_v54  ;;  %v10322_v3 = vadd.f32 %v10180_v59, %v10022_v7 }
 0x319   :  { %v5932_v55 = vadd.f32 %v5931_v32, %v5800_v20  ;;  %vm5411_vm6 = vcmp.ge.f32.partialorder %v6724_v36, 0.0  ;;  %vm5398_vm7 = vcmp.ge.f32.partialorder %v10278_v62, 0.0  ;;  %v10328_v18 = vsel %vm5405_vm4, %v6754_v41, %v5533_v53 }
 0x31a   :  { %v5638_v27 = vsel %vm5382_vm15, %v10178_v60, %v10209_v61  ;;  %v5807_v44 = vmul.f32 %v10038_v42, %v10202_v38  ;;  %v5938_v59 = vadd.f32 %v9827_v6, %v10199_v19  ;;  %v5660_v48 = vsel %vm5404_vm5, %v6723_v33, %v5532_v31 }
 0x31b   :  { %v10324_v35 = vpop.f32.mrb[60].mxu0  ;;  %5933 = vadd.xlane.f32.xlu1 %v5932_v55  ;;  %vm5413_vm8 = vcmp.ge.f32.partialorder %v6756_v26, 0.0  ;;  %v5541_v41 = vmul.f32 0.01, %v6756_v26  ;;  %v6725_v45 = vadd.f32 %v10226_v8, %v10020_v37  ;;  %v5667_v38 = vsel %vm5411_vm6, %v6724_v36, %v5539_v13 }
 0x31c   :  { %v10338_v54 = vpop.f32.mrb[60].mxu1  ;;  %v10340_v11 = vpop.f32.mrb[61].mxu0  ;;  %v5939_v61 = vadd.f32 %v5938_v59, %v10206_v52  ;;  %v6726_v6 = vadd.f32 %v10236_v23, %v10016_v49  ;;  %v6758_v19 = vadd.f32 %v10238_v4, %v10018_v1  ;;  %v10359_v8 = vmul.f32 %v10032_v56, %v5659_v28 }
 0x31d   :  { %v10344_v53 = vpop.f32.mrb[61].mxu1  ;;  %v10346_v60 = vpop.f32.mrb[62].mxu0  ;;  %v10362_v32 = vmul.f32 0.01, %v10322_v3  ;;  %v5808_v36 = vmul.f32 %v10040_v9, %v5638_v27  ;;  %v5540_v31 = vmul.f32 0.01, %v6725_v45  ;;  %v10368_v4 = vmul.f32 %v10036_v43, %v5660_v48 }
 0x31e   :  { %v10354_v33 = vpop.f32.mrb[62].mxu1  ;;  %v10356_v20 = vpop.f32.mrb[63].mxu0  ;;  %v5940_v52 = vadd.f32 %v5939_v61, %v5807_v44  ;;  %vm5412_vm9 = vcmp.ge.f32.partialorder %v6725_v45, 0.0  ;;  %vm5419_vm10 = vcmp.ge.f32.partialorder %v6726_v6, 0.0  ;;  %v5547_v23 = vmul.f32 0.01, %v6726_v6 }
 0x31f   :  { %v10365_v13 = vpop.f32.mrb[63].mxu1  ;;  %v10371_v55 = vmul.f32 %v10032_v56, %v5667_v38  ;;  %v10374_v28 = vsel %vm5413_vm8, %v6756_v26, %v5541_v41  ;;  %v10378_v59 = vadd.f32 %v10228_v40, %v10022_v7  ;;  %vm5406_vm11 = vcmp.ge.f32.partialorder %v10322_v3, 0.0 }
 0x320   :  { %v5941_v27 = vadd.f32 %v5940_v52, %v5808_v36  ;;  %vm5421_vm12 = vcmp.ge.f32.partialorder %v6758_v19, 0.0  ;;  %v5646_v44 = vsel %vm5390_vm2, %v10222_v30, %v10263_v58  ;;  %v5947_v48 = vadd.f32 %v9849_v50, %v10231_v12 }
 0x321   :  { %v5668_v38 = vsel %vm5412_vm9, %v6725_v45, %v5540_v31  ;;  %v5675_v61 = vsel %vm5419_vm10, %v6726_v6, %v5547_v23  ;;  %v5549_v26 = vmul.f32 0.01, %v6758_v19  ;;  %v6727_v41 = vadd.f32 %v10245_v21, %v10020_v37 }
 0x322   :  { %5942 = vadd.xlane.f32.xlu0 %v5941_v27  ;;  %v5815_v40 = vmul.f32 %v10038_v42, %v10260_v0  ;;  %v5948_v36 = vadd.f32 %v5947_v48, %v10272_v57  ;;  %v6728_v52 = vadd.f32 %v10269_v25, %v10016_v49  ;;  %v6760_v30 = vadd.f32 %v10281_v10, %v10018_v1 }
 0x323   :  { %v10397_v50 = vmul.f32 0.01, %v10378_v59  ;;  %v5816_v12 = vmul.f32 %v10040_v9, %v5646_v44  ;;  %vm5420_vm13 = vcmp.ge.f32.partialorder %v6727_v41, 0.0  ;;  %v5548_v58 = vmul.f32 0.01, %v6727_v41 }
 0x324   :  { %v10401_v21 = vmul.f32 %v10036_v43, %v5668_v38  ;;  %v10404_v0 = vmul.f32 %v10032_v56, %v5675_v61  ;;  %v5949_v57 = vadd.f32 %v5948_v36, %v5815_v40  ;;  %v5555_v45 = vmul.f32 0.01, %v6728_v52 }
 0x325   :  { %v10407_v25 = vsel %vm5421_vm12, %v6758_v19, %v5549_v26  ;;  %v10411_v10 = vadd.f32 %v10247_v22, %v10022_v7  ;;  %vm5427_vm14 = vcmp.ge.f32.partialorder %v6728_v52, 0.0  ;;  %v5654_v6 = vsel %vm5398_vm7, %v10278_v62, %v10318_v24 }
 0x326   :  { %vm5414_vm15 = vcmp.ge.f32.partialorder %v10378_v59, 0.0  ;;  %v5950_v31 = vadd.f32 %v5949_v57, %v5816_v12  ;;  %v5676_v23 = vsel %vm5420_vm13, %v6727_v41, %v5548_v58  ;;  %vm5429_vm0 = vcmp.ge.f32.partialorder %v6760_v30, 0.0 }
 0x327   :  { %v5956_v27 = vadd.f32 %v9888_v51, %v10286_v14  ;;  %v5557_v19 = vmul.f32 0.01, %v6760_v30  ;;  %v5823_v44 = vmul.f32 %v10038_v42, %v10274_v2  ;;  %v6729_v22 = vadd.f32 %v10283_v5, %v10020_v37 }
 0x328   :  { %v10426_v48 = vadd.f32 %v10292_v47, %v10022_v7  ;;  %5951 = vadd.xlane.f32.xlu1 %v5950_v31  ;;  %v5683_v62 = vsel %vm5427_vm14, %v6728_v52, %v5555_v45  ;;  %v6730_v38 = vadd.f32 %v10294_v46, %v10016_v49  ;;  %v6762_v51 = vadd.f32 %v10303_v39, %v10018_v1 }
 0x329   :  { %v5957_v24 = vadd.f32 %v5956_v27, %v10315_v63  ;;  %v10434_v14 = vmul.f32 0.01, %v10411_v10  ;;  %v5824_v2 = vmul.f32 %v10040_v9, %v5654_v6  ;;  %vm5428_vm1 = vcmp.ge.f32.partialorder %v6729_v22, 0.0 }
 0x32a   :  { %v5556_v5 = vmul.f32 0.01, %v6729_v22  ;;  %v10438_v47 = vmul.f32 %v10036_v43, %v5676_v23  ;;  %vm5435_vm2 = vcmp.ge.f32.partialorder %v6730_v38, 0.0  ;;  %v5563_v26 = vmul.f32 0.01, %v6730_v38 }
 0x32b   :  { %v5958_v61 = vadd.f32 %v5957_v24, %v5823_v44  ;;  %v10441_v63 = vmul.f32 %v10032_v56, %v5683_v62  ;;  %v10444_v46 = vsel %vm5429_vm0, %v6760_v30, %v5557_v19  ;;  %v10447_v39 = vmul.f32 0.01, %v10426_v48 }
 0x32c   :  { %v5662_v41 = vsel %vm5406_vm11, %v10322_v3, %v10362_v32  ;;  %vm5422_vm3 = vcmp.ge.f32.partialorder %v10411_v10, 0.0  ;;  %v5684_v36 = vsel %vm5428_vm1, %v6729_v22, %v5556_v5  ;;  %vm5437_vm4 = vcmp.ge.f32.partialorder %v6762_v51, 0.0 }
 0x32d   :  { %v5959_v40 = vadd.f32 %v5958_v61, %v5824_v2  ;;  %v5965_v52 = vadd.f32 %v9909_v34, %v10359_v8  ;;  %v5691_v12 = vsel %vm5435_vm2, %v6730_v38, %v5563_v26  ;;  %v5565_v58 = vmul.f32 0.01, %v6762_v51 }
 0x32e   :  { %v6731_v30 = vadd.f32 %v10305_v16, %v10020_v37  ;;  %v10460_v57 = vadd.f32 %v10309_v29, %v10022_v7  ;;  %v5831_v3 = vmul.f32 %v10038_v42, %v10328_v18  ;;  %v6732_v45 = vadd.f32 %v10324_v35, %v10016_v49 }
 0x32f   :  { %5960 = vadd.xlane.f32.xlu0 %v5959_v40  ;;  %v5966_v32 = vadd.f32 %v5965_v52, %v10368_v4  ;;  %v6764_v34 = vadd.f32 %v10338_v54, %v10018_v1  ;;  %v5854_v8 = vmul.f32 %v10036_v43, %v5684_v36  ;;  %v5832_v16 = vmul.f32 %v10040_v9, %v5662_v41 }
 0x330   :  { %vm5436_vm5 = vcmp.ge.f32.partialorder %v6731_v30, 0.0  ;;  %v5564_v6 = vmul.f32 0.01, %v6731_v30  ;;  %vm5430_vm6 = vcmp.ge.f32.partialorder %v10426_v48, 0.0  ;;  %v5861_v29 = vmul.f32 %v10032_v56, %v5691_v12  ;;  %v10775_v12 = vld [vmem:[#allocation3_spill] sm:$0xff] }
 0x331   :  { %v5967_v31 = vadd.f32 %v5966_v32, %v5831_v3  ;;  %vm5443_vm7 = vcmp.ge.f32.partialorder %v6732_v45, 0.0  ;;  %v5571_v18 = vmul.f32 0.01, %v6732_v45  ;;  %v5693_v4 = vsel %vm5437_vm4, %v6762_v51, %v5565_v58 }
 0x332   :  { %v5692_v23 = vsel %vm5436_vm5, %v6731_v30, %v5564_v6  ;;  %v5566_v35 = vmul.f32 0.01, %v10460_v57  ;;  %v5670_v54 = vsel %vm5414_vm15, %v10378_v59, %v10397_v50  ;;  %vm5438_vm8 = vcmp.ge.f32.partialorder %v10460_v57, 0.0 }
 0x333   :  { %v5968_v27 = vadd.f32 %v5967_v31, %v5832_v16  ;;  %v5699_v19 = vsel %vm5443_vm7, %v6732_v45, %v5571_v18  ;;  %v5573_v44 = vmul.f32 0.01, %v6764_v34  ;;  %v5974_v22 = vadd.f32 %v9921_v15, %v10371_v55 }
 0x334   :  { %vm5445_vm9 = vcmp.ge.f32.partialorder %v6764_v34, 0.0  ;;  %v5839_v62 = vmul.f32 %v10038_v42, %v10374_v28  ;;  %v6733_v24 = vadd.f32 %v10340_v11, %v10020_v37  ;;  %v6765_v38 = vadd.f32 %v10344_v53, %v10022_v7 }
 0x335   :  { %5969 = vadd.xlane.f32.xlu1 %v5968_v27  ;;  %v5840_v59 = vmul.f32 %v10040_v9, %v5670_v54  ;;  %v5975_v50 = vadd.f32 %v5974_v22, %v10401_v21  ;;  %v6734_v51 = vadd.f32 %v10346_v60, %v10016_v49  ;;  %v6766_v15 = vadd.f32 %v10354_v33, %v10018_v1 }
 0x336   :  { %v5862_v55 = vmul.f32 %v10036_v43, %v5692_v23  ;;  %v5869_v28 = vmul.f32 %v10032_v56, %v5699_v19  ;;  %vm5444_vm10 = vcmp.ge.f32.partialorder %v6733_v24, 0.0  ;;  %v5572_v11 = vmul.f32 0.01, %v6733_v24 }
 0x337   :  { %v5701_v2 = vsel %vm5445_vm9, %v6764_v34, %v5573_v44  ;;  %v5976_v5 = vadd.f32 %v5975_v50, %v5839_v62  ;;  %vm5451_vm11 = vcmp.ge.f32.partialorder %v6734_v51, 0.0  ;;  %v5579_v53 = vmul.f32 0.01, %v6734_v51 }
 0x338   :  { %v5700_v61 = vsel %vm5444_vm10, %v6733_v24, %v5572_v11  ;;  %vm5446_vm12 = vcmp.ge.f32.partialorder %v6765_v38, 0.0  ;;  %v5574_v26 = vmul.f32 0.01, %v6765_v38  ;;  %v5678_v49 = vsel %vm5422_vm3, %v10411_v10, %v10434_v14 }
 0x339   :  { %v5977_v60 = vadd.f32 %v5976_v5, %v5840_v59  ;;  %v5707_v1 = vsel %vm5451_vm11, %v6734_v51, %v5579_v53  ;;  %vm5453_vm13 = vcmp.ge.f32.partialorder %v6766_v15, 0.0  ;;  %v5983_v33 = vadd.f32 %v9941_v17, %v10404_v0 }
 0x33a   :  { %v5581_v21 = vmul.f32 0.01, %v6766_v15  ;;  %v5847_v41 = vmul.f32 %v10038_v42, %v10407_v25  ;;  %v6735_v40 = vadd.f32 %v10356_v20, %v10020_v37  ;;  %v6767_v36 = vadd.f32 %v10365_v13, %v10022_v7 }
 0x33b   :  { %5978 = vadd.xlane.f32.xlu0 %v5977_v60  ;;  %v5870_v52 = vmul.f32 %v10036_v43, %v5700_v61  ;;  %v5848_v10 = vmul.f32 %v10040_v9, %v5678_v49  ;;  %v5984_v14 = vadd.f32 %v5983_v33, %v10438_v47  ;;  %v5992_v17 = vadd.f32 %v10775_v12, %v10441_v63 }
 0x33c   :  { %v5877_v0 = vmul.f32 %v10032_v56, %v5707_v1  ;;  %vm5452_vm14 = vcmp.ge.f32.partialorder %v6735_v40, 0.0  ;;  %v5580_v25 = vmul.f32 0.01, %v6735_v40  ;;  %v5686_v37 = vsel %vm5430_vm6, %v10426_v48, %v10447_v39  ;;  %v10776_v56 = vld [vmem:[#allocation4_spill] sm:$0xff] }
 0x33d   :  { %v5985_v7 = vadd.f32 %v5984_v14, %v5847_v41  ;;  %vm5454_vm15 = vcmp.ge.f32.partialorder %v6767_v36, 0.0  ;;  %v5855_v20 = vmul.f32 %v10038_v42, %v10444_v46  ;;  %v5993_v13 = vadd.f32 %v5992_v17, %v5854_v8  ;;  %v10777_v8 = vld [vmem:[#allocation5_spill] sm:$0xff] }
 0x33e   :  { %v5708_v58 = vsel %vm5452_vm14, %v6735_v40, %v5580_v25  ;;  %v5582_v47 = vmul.f32 0.01, %v6767_v36  ;;  %v5694_v63 = vsel %vm5438_vm8, %v10460_v57, %v5566_v35  ;;  %v6001_v30 = vadd.f32 %v10776_v56, %v5861_v29  ;;  %v10778_v29 = vld [vmem:[#allocation6_spill] sm:$0xff] }
 0x33f   :  { %v5986_v3 = vadd.f32 %v5985_v7, %v5848_v10  ;;  %v5878_v32 = vmul.f32 %v10036_v43, %v5708_v58  ;;  %v5856_v45 = vmul.f32 %v10040_v9, %v5686_v37  ;;  %v5994_v48 = vadd.f32 %v5993_v13, %v5855_v20 }
 0x340   :  { %v5709_v39 = vsel %vm5453_vm13, %v6766_v15, %v5581_v21  ;;  %v5863_v34 = vmul.f32 %v10038_v42, %v5693_v4  ;;  %v6002_v46 = vadd.f32 %v6001_v30, %v5862_v55  ;;  %v6010_v16 = vadd.f32 %v10777_v8, %v5869_v28 }
 0x341   :  { %5987 = vadd.xlane.f32.xlu1 %v5986_v3  ;;  %v5995_v6 = vadd.f32 %v5994_v48, %v5856_v45  ;;  %v5864_v31 = vmul.f32 %v10040_v9, %v5694_v63  ;;  %v5702_v57 = vsel %vm5446_vm12, %v6765_v38, %v5574_v26  ;;  %v6019_v18 = vadd.f32 %v10778_v29, %v5877_v0 }
 0x342   :  { %v6003_v23 = vadd.f32 %v6002_v46, %v5863_v34  ;;  %v5871_v43 = vmul.f32 %v10038_v42, %v5701_v2  ;;  %v6011_v35 = vadd.f32 %v6010_v16, %v5870_v52  ;;  %v5710_v54 = vsel %vm5454_vm15, %v6767_v36, %v5582_v47 }
 0x343   :  { %5996 = vadd.xlane.f32.xlu0 %v5995_v6  ;;  %v5879_v4 = vmul.f32 %v10038_v42, %v5709_v39  ;;  %v6020_v27 = vadd.f32 %v6019_v18, %v5878_v32  ;;  %v5872_v44 = vmul.f32 %v10040_v9, %v5702_v57  ;;  %v5880_v62 = vmul.f32 %v10040_v9, %v5710_v54 }
 0x344   :  { %v6004_v19 = vadd.f32 %v6003_v23, %v5864_v31  ;;  %v6012_v22 = vadd.f32 %v6011_v35, %v5871_v43  ;;  %v6026_v50 = vstv %s10608_s4  ;;  %vm6043_vm0 = vcmask 7168  }
 0x345   :  { %v6021_v24 = vadd.f32 %v6020_v27, %v5879_v4 }
 0x346   :  { %6005 = vadd.xlane.f32.xlu1 %v6004_v19  ;;  %v6013_v38 = vadd.f32 %v6012_v22, %v5872_v44 }
 0x347   :  { %v6022_v59 = vadd.f32 %v6021_v24, %v5880_v62 }
 0x348   :  { %6014 = vadd.xlane.f32.xlu0 %v6013_v38 }
 0x34a   :  { %6023 = vadd.xlane.f32.xlu1 %v6022_v59 }
 0x387   :  { %v5889_v51 = vpop.xlane.xlu0 %5888 }
 0x388   :  { %v6027_v42 = vadd.f32 %v6026_v50, %v5889_v51 }
 0x38a   :  { %6044 = vst.msk [vmem:[%s10609_s5] sm:$0xff] %vm6043_vm0, %v6027_v42 }
 0x391   :  { %v5898_v15 = vpop.xlane.xlu0 %5897 }
 0x392   :  { %v6028_v9 = vadd.f32 %v6026_v50, %v5898_v15 }
 0x394   :  { %6045 = vst.msk [vmem:[%s10609_s5 + $0x8] sm:$0xff] %vm6043_vm0, %v6028_v9 }
 0x396   :  { %v5907_v55 = vpop.xlane.xlu1 %5906 }
 0x397   :  { %v6029_v28 = vadd.f32 %v6026_v50, %v5907_v55 }
 0x399   :  { %6046 = vst.msk [vmem:[%s10609_s5 + $0x10] sm:$0xff] %vm6043_vm0, %v6029_v28 }
 0x39e   :  { %v5916_v11 = vpop.xlane.xlu1 %5915 }
 0x39f   :  { %v6030_v2 = vadd.f32 %v6026_v50, %v5916_v11 }
 0x3a1   :  { %6047 = vst.msk [vmem:[%s10609_s5 + $0x18] sm:$0xff] %vm6043_vm0, %v6030_v2 }
 0x3a2   :  { %v5925_v5 = vpop.xlane.xlu0 %5924 }
 0x3a3   :  { %v6031_v53 = vadd.f32 %v6026_v50, %v5925_v5 }
 0x3a5   :  { %6048 = vst.msk [vmem:[%s10609_s5 + $0x20] sm:$0xff] %vm6043_vm0, %v6031_v53 }
 0x3a8   :  { %v5934_v61 = vpop.xlane.xlu1 %5933 }
 0x3a9   :  { %v6032_v26 = vadd.f32 %v6026_v50, %v5934_v61 }
 0x3ab   :  { %6049 = vst.msk [vmem:[%s10609_s5 + $0x28] sm:$0xff] %vm6043_vm0, %v6032_v26 }
 0x3af   :  { %v5943_v49 = vpop.xlane.xlu0 %5942 }
 0x3b0   :  { %v6033_v60 = vadd.f32 %v6026_v50, %v5943_v49 }
 0x3b2   :  { %6050 = vst.msk [vmem:[%s10609_s5 + $0x30] sm:$0xff] %vm6043_vm0, %v6033_v60 }
 0x3b5   :  { %v5952_v1 = vpop.xlane.xlu1 %5951 }
 0x3b6   :  { %v6034_v33 = vadd.f32 %v6026_v50, %v5952_v1 }
 0x3b8   :  { %6051 = vst.msk [vmem:[%s10609_s5 + $0x38] sm:$0xff] %vm6043_vm0, %v6034_v33 }
 0x3bc   :  { %v5961_v21 = vpop.xlane.xlu0 %5960 }
 0x3bd   :  { %v6035_v41 = vadd.f32 %v6026_v50, %v5961_v21 }
 0x3bf   :  { %6052 = vst.msk [vmem:[%s10609_s5 + $0x40] sm:$0xff] %vm6043_vm0, %v6035_v41 }
 0x3c2   :  { %v5970_v40 = vpop.xlane.xlu1 %5969 }
 0x3c3   :  { %v6036_v36 = vadd.f32 %v6026_v50, %v5970_v40 }
 0x3c5   :  { %6053 = vst.msk [vmem:[%s10609_s5 + $0x48] sm:$0xff] %vm6043_vm0, %v6036_v36 }
 0x3c8   :  { %v5979_v52 = vpop.xlane.xlu0 %5978 }
 0x3c9   :  { %v6037_v10 = vadd.f32 %v6026_v50, %v5979_v52 }
 0x3cb   :  { %6054 = vst.msk [vmem:[%s10609_s5 + $0x50] sm:$0xff] %vm6043_vm0, %v6037_v10 }
 0x3ce   :  { %v5988_v14 = vpop.xlane.xlu1 %5987 }
 0x3cf   :  { %v6038_v12 = vadd.f32 %v6026_v50, %v5988_v14 }
 0x3d0   :  { %v5997_v17 = vpop.xlane.xlu0 %5996 }
 0x3d1   :  { %6055 = vst.msk [vmem:[%s10609_s5 + $0x58] sm:$0xff] %vm6043_vm0, %v6038_v12  ;;  %v6039_v0 = vadd.f32 %v6026_v50, %v5997_v17 }
 0x3d3   :  { %6056 = vst.msk [vmem:[%s10609_s5 + $0x60] sm:$0xff] %vm6043_vm0, %v6039_v0  ;;  %v6006_v25 = vpop.xlane.xlu1 %6005 }
 0x3d4   :  { %v6040_v37 = vadd.f32 %v6026_v50, %v6006_v25 }
 0x3d5   :  { %v6015_v7 = vpop.xlane.xlu0 %6014 }
 0x3d6   :  { %6057 = vst.msk [vmem:[%s10609_s5 + $0x68] sm:$0xff] %vm6043_vm0, %v6040_v37  ;;  %v6041_v20 = vadd.f32 %v6026_v50, %v6015_v7 }
 0x3d7   :  { %v6024_v13 = vpop.xlane.xlu1 %6023 }
 0x3d8   :  { %6058 = vst.msk [vmem:[%s10609_s5 + $0x70] sm:$0xff] %vm6043_vm0, %v6041_v20  ;;  %v6042_v58 = vadd.f32 %v6026_v50, %v6024_v13 }
 0x3da   :  { %6059 = vst.msk [vmem:[%s10609_s5 + $0x78] sm:$0xff] %vm6043_vm0, %v6042_v58 }

</bundles_post_ra>
